<compile_context>
chip_gen: v7x
topology: tpu7x:2x2x1
jax: 0.10.0
libtpu: 0.0.40
codegen_flags: <defaults>
</compile_context>

<pallas_src>
import functools

import jax
import jax.numpy as jnp
from jax import lax
from jax.experimental import pallas as pl
from jax.experimental.pallas import tpu as pltpu


def _digitcaps_kernel(x_ref, w_ref, out_ref, *,
                      out_num_caps, in_num_caps, in_dim_caps, out_dim_caps,
                      batch_tile, num_iters):
    # x_ref  : (TB, in_dim, in_num)                lane axis = in_num
    # w_ref  : (out_num, in_dim, out_dim, in_num)  lane axis = in_num
    # out_ref: (TB, out_num * out_dim)             lane-dense slab
    TB = batch_tile
    x = x_ref[...]
    W = w_ref[...]

    # x_hat[b, j, d, i] = sum_k W[j, k, d, i] * x[b, k, i]
    # Static unroll over the tiny contraction dim (in_dim = 8): pure VPU
    # multiply-add with the 128-wide in_num axis on lanes; no MXU, no XLU
    # transposes.
    x_hat = jnp.zeros((TB, out_num_caps, out_dim_caps, in_num_caps), jnp.float32)
    for k in range(in_dim_caps):
        x_hat = x_hat + W[None, :, k, :, :] * x[:, None, k, None, :]

    def squash(s):
        # squared_norm * s / ((1 + squared_norm) * sqrt(squared_norm))
        #   == s * sqrt(sn) / (1 + sn)
        # rsqrt + approximate reciprocal go to the (otherwise idle) EUP slot.
        # Same 0/0 hazard as the reference when sn == 0 (kept to match).
        sn = jnp.sum(s * s, axis=-1, keepdims=True)
        scale = sn * lax.rsqrt(sn) * pl.reciprocal(1.0 + sn, approx=True)
        return s * scale

    # Dynamic routing, fully vectorized over the TB samples of this tile.
    # The reference's detach() only changes gradients; forward values are
    # identical when using x_hat everywhere.
    b = jnp.zeros((TB, out_num_caps, in_num_caps), jnp.float32)
    v = jnp.zeros((TB, out_num_caps, out_dim_caps), jnp.float32)
    for it in range(num_iters):
        if it == 0:
            # softmax of all-zero logits is exactly uniform -> skip exp on pass 0.
            c = jnp.full((TB, out_num_caps, in_num_caps),
                         1.0 / out_num_caps, jnp.float32)
        else:
            bmax = jnp.max(b, axis=1, keepdims=True)
            e = jnp.exp(b - bmax)                        # single exp, reused
            c = e / jnp.sum(e, axis=1, keepdims=True)    # softmax over out_num axis
        # s[b, j, d] = sum_i c[b, j, i] * x_hat[b, j, d, i]   (lane reduce)
        s = jnp.sum(c[:, :, None, :] * x_hat, axis=-1)   # (TB, out_num, out_dim)
        v = squash(s)
        if it != num_iters - 1:
            # b[b, j, i] += sum_d v[b, j, d] * x_hat[b, j, d, i]  (sublane reduce)
            b = b + jnp.sum(v[:, :, :, None] * x_hat, axis=2)

    # Lane-dense store: pack each capsule's out_dim lanes into the flat slab
    # (avoids a (2, 64) trailing-tile output and its masked partial stores).
    for j in range(out_num_caps):
        out_ref[:, j * out_dim_caps:(j + 1) * out_dim_caps] = v[:, j, :]


def prepare_digitcaps_weight(W):
    """PyTorch layout (out_num, in_num, out_dim, in_dim) -> kernel layout
    (out_num, in_dim, out_dim, in_num).  Call ONCE at parameter-init time so
    the per-forward wrapper never re-transposes W in HBM."""
    return jnp.transpose(W, (0, 3, 2, 1))


def digitcaps_forward(x, W_k, *, num_iters=3, batch_tile=8):
    """x: (B, in_num_caps, in_dim_caps) (PyTorch convention);
    W_k: pre-transposed weight (out_num, in_dim, out_dim, in_num)."""
    B, in_num_caps, in_dim_caps = x.shape
    out_num_caps, wk_in_dim, out_dim_caps, wk_in_num = W_k.shape
    assert wk_in_dim == in_dim_caps and wk_in_num == in_num_caps

    # Batch tiling: TB >= 8 samples per step when possible; pad B up to a
    # multiple of TB (padded rows are discarded after the kernel).  On v7x,
    # choose B large enough that the resulting grid is >= 2 so the "parallel"
    # batch axis shards across both TensorCores.
    TB = batch_tile if B >= batch_tile else B
    Bp = pl.cdiv(B, TB) * TB

    # Small per-call layout glue on activations only (W is already kernel-layout).
    x_k = jnp.transpose(x, (0, 2, 1))                    # (B, in_dim, in_num)
    if Bp != B:
        x_k = jnp.pad(x_k, ((0, Bp - B), (0, 0), (0, 0)))

    kernel = functools.partial(
        _digitcaps_kernel,
        out_num_caps=out_num_caps, in_num_caps=in_num_caps,
        in_dim_caps=in_dim_caps, out_dim_caps=out_dim_caps,
        batch_tile=TB, num_iters=num_iters)

    grid_spec = pltpu.PrefetchScalarGridSpec(
        num_scalar_prefetch=0,
        grid=(Bp // TB,),
        in_specs=[
            pl.BlockSpec((TB, in_dim_caps, in_num_caps), lambda b: (b, 0, 0)),
            # Constant block index -> W stays resident in VMEM across steps.
            pl.BlockSpec((out_num_caps, in_dim_caps, out_dim_caps, in_num_caps),
                         lambda b: (0, 0, 0, 0)),
        ],
        out_specs=pl.BlockSpec((TB, out_num_caps * out_dim_caps),
                               lambda b: (b, 0)),
    )

    out_flat = pl.pallas_call(
        kernel,
        grid_spec=grid_spec,
        out_shape=jax.ShapeDtypeStruct((Bp, out_num_caps * out_dim_caps),
                                       jnp.float32),
        compiler_params=pltpu.CompilerParams(
            dimension_semantics=("parallel",)),
    )(x_k, W_k)

    outputs = out_flat[:B].reshape(B, out_num_caps, out_dim_caps)

    # decode_idx == -1 branch (tiny; done in plain JAX on the lane-dense slab).
    # sqrt and softmax are monotone, so argmax over squared norms is identical.
    norms = jnp.sum(outputs * outputs, axis=-1)          # (B, out_num)
    idx = jnp.argmax(norms, axis=-1)                     # first max idx (torch-like)
    mask = jax.nn.one_hot(idx, out_num_caps, dtype=outputs.dtype)
    t = jnp.sum(outputs * mask[:, :, None], axis=1, keepdims=True)  # (B, 1, out_dim)
    return t, outputs


if __name__ == "__main__":
    # Module defaults: out_num_caps=2, in_num_caps=32*2*2=128, in_dim_caps=8,
    # out_dim_caps=64, decode_idx=-1.
    out_num_caps, in_num_caps, in_dim_caps, out_dim_caps = 2, 32 * 2 * 2, 8, 64
    B = 2

    key = jax.random.PRNGKey(0)
    kx, kw = jax.random.split(key)
    x = jax.random.normal(kx, (B, in_num_caps, in_dim_caps), dtype=jnp.float32)
    # W = 0.01 * randn(out_num_caps, in_num_caps, out_dim_caps, in_dim_caps)
    W = 0.01 * jax.random.normal(
        kw, (out_num_caps, in_num_caps, out_dim_caps, in_dim_caps),
        dtype=jnp.float32)

    # Weight re-layout happens ONCE (parameter init), not per forward call.
    W_k = jax.block_until_ready(prepare_digitcaps_weight(W))

    fwd = jax.jit(digitcaps_forward)
    t, outputs = fwd(x, W_k)
    jax.block_until_ready((t, outputs))

    assert t.shape == (B, 1, out_dim_caps)
    assert outputs.shape == (B, out_num_caps, out_dim_caps)
    print("KERNEL_OK")
</pallas_src>

<mosaic_0001>
module attributes {stable_mosaic.version = 11 : i64} {
  func.func @_digitcaps_kernel(%arg0: i32, %arg1: memref<2x8x128xf32, #tpu.memory_space<vmem>>, %arg2: memref<2x8x64x128xf32, #tpu.memory_space<vmem>>, %arg3: memref<2x128xf32, #tpu.memory_space<vmem>>) attributes {dimension_semantics = [#tpu.dimension_semantics<parallel>], iteration_bounds = array<i64: 1>, scalar_prefetch = 0 : i64, scratch_operands = 0 : i64, tpu.core_type = #tpu.core_type<tc>, window_params = [{transform_indices = @transform_0, window_bounds = array<i64: 2, 8, 128>}, {pipeline_mode = #tpu.pipeline_mode<synchronous>, transform_indices = @transform_1, window_bounds = array<i64: 2, 8, 64, 128>}, {transform_indices = @transform_2, window_bounds = array<i64: 2, 128>}]} {
    %c0 = arith.constant 0 : index
    %c0_0 = arith.constant 0 : index
    %c0_1 = arith.constant 0 : index
    %0 = vector.load %arg1[%c0, %c0_0, %c0_1] : memref<2x8x128xf32, #tpu.memory_space<vmem>>, vector<2x8x128xf32>
    %c0_2 = arith.constant 0 : index
    %c0_3 = arith.constant 0 : index
    %c0_4 = arith.constant 0 : index
    %c0_5 = arith.constant 0 : index
    %1 = vector.load %arg2[%c0_2, %c0_3, %c0_4, %c0_5] : memref<2x8x64x128xf32, #tpu.memory_space<vmem>>, vector<2x8x64x128xf32>
    %cst = arith.constant 0.000000e+00 : f32
    %2 = vector.broadcast %cst : f32 to vector<2x2x64x128xf32>
    %3 = vector.extract_strided_slice %1 {offsets = [0, 0, 0, 0], sizes = [2, 1, 64, 128], strides = [1, 1, 1, 1]} : vector<2x8x64x128xf32> to vector<2x1x64x128xf32>
    %4 = vector.shape_cast %3 : vector<2x1x64x128xf32> to vector<2x64x128xf32>
    %5 = vector.shape_cast %4 : vector<2x64x128xf32> to vector<1x2x64x128xf32>
    %6 = vector.extract_strided_slice %0 {offsets = [0, 0, 0], sizes = [2, 1, 128], strides = [1, 1, 1]} : vector<2x8x128xf32> to vector<2x1x128xf32>
    %7 = vector.shape_cast %6 : vector<2x1x128xf32> to vector<2x128xf32>
    %8 = vector.shape_cast %7 : vector<2x128xf32> to vector<2x1x1x128xf32>
    %9 = vector.broadcast %5 : vector<1x2x64x128xf32> to vector<2x2x64x128xf32>
    %10 = vector.broadcast %8 : vector<2x1x1x128xf32> to vector<2x2x64x128xf32>
    %11 = arith.mulf %9, %10 : vector<2x2x64x128xf32>
    %12 = arith.addf %2, %11 : vector<2x2x64x128xf32>
    %13 = vector.extract_strided_slice %1 {offsets = [0, 1, 0, 0], sizes = [2, 1, 64, 128], strides = [1, 1, 1, 1]} : vector<2x8x64x128xf32> to vector<2x1x64x128xf32>
    %14 = vector.shape_cast %13 : vector<2x1x64x128xf32> to vector<2x64x128xf32>
    %15 = vector.shape_cast %14 : vector<2x64x128xf32> to vector<1x2x64x128xf32>
    %16 = vector.extract_strided_slice %0 {offsets = [0, 1, 0], sizes = [2, 1, 128], strides = [1, 1, 1]} : vector<2x8x128xf32> to vector<2x1x128xf32>
    %17 = vector.shape_cast %16 : vector<2x1x128xf32> to vector<2x128xf32>
    %18 = vector.shape_cast %17 : vector<2x128xf32> to vector<2x1x1x128xf32>
    %19 = vector.broadcast %15 : vector<1x2x64x128xf32> to vector<2x2x64x128xf32>
    %20 = vector.broadcast %18 : vector<2x1x1x128xf32> to vector<2x2x64x128xf32>
    %21 = arith.mulf %19, %20 : vector<2x2x64x128xf32>
    %22 = arith.addf %12, %21 : vector<2x2x64x128xf32>
    %23 = vector.extract_strided_slice %1 {offsets = [0, 2, 0, 0], sizes = [2, 1, 64, 128], strides = [1, 1, 1, 1]} : vector<2x8x64x128xf32> to vector<2x1x64x128xf32>
    %24 = vector.shape_cast %23 : vector<2x1x64x128xf32> to vector<2x64x128xf32>
    %25 = vector.shape_cast %24 : vector<2x64x128xf32> to vector<1x2x64x128xf32>
    %26 = vector.extract_strided_slice %0 {offsets = [0, 2, 0], sizes = [2, 1, 128], strides = [1, 1, 1]} : vector<2x8x128xf32> to vector<2x1x128xf32>
    %27 = vector.shape_cast %26 : vector<2x1x128xf32> to vector<2x128xf32>
    %28 = vector.shape_cast %27 : vector<2x128xf32> to vector<2x1x1x128xf32>
    %29 = vector.broadcast %25 : vector<1x2x64x128xf32> to vector<2x2x64x128xf32>
    %30 = vector.broadcast %28 : vector<2x1x1x128xf32> to vector<2x2x64x128xf32>
    %31 = arith.mulf %29, %30 : vector<2x2x64x128xf32>
    %32 = arith.addf %22, %31 : vector<2x2x64x128xf32>
    %33 = vector.extract_strided_slice %1 {offsets = [0, 3, 0, 0], sizes = [2, 1, 64, 128], strides = [1, 1, 1, 1]} : vector<2x8x64x128xf32> to vector<2x1x64x128xf32>
    %34 = vector.shape_cast %33 : vector<2x1x64x128xf32> to vector<2x64x128xf32>
    %35 = vector.shape_cast %34 : vector<2x64x128xf32> to vector<1x2x64x128xf32>
    %36 = vector.extract_strided_slice %0 {offsets = [0, 3, 0], sizes = [2, 1, 128], strides = [1, 1, 1]} : vector<2x8x128xf32> to vector<2x1x128xf32>
    %37 = vector.shape_cast %36 : vector<2x1x128xf32> to vector<2x128xf32>
    %38 = vector.shape_cast %37 : vector<2x128xf32> to vector<2x1x1x128xf32>
    %39 = vector.broadcast %35 : vector<1x2x64x128xf32> to vector<2x2x64x128xf32>
    %40 = vector.broadcast %38 : vector<2x1x1x128xf32> to vector<2x2x64x128xf32>
    %41 = arith.mulf %39, %40 : vector<2x2x64x128xf32>
    %42 = arith.addf %32, %41 : vector<2x2x64x128xf32>
    %43 = vector.extract_strided_slice %1 {offsets = [0, 4, 0, 0], sizes = [2, 1, 64, 128], strides = [1, 1, 1, 1]} : vector<2x8x64x128xf32> to vector<2x1x64x128xf32>
    %44 = vector.shape_cast %43 : vector<2x1x64x128xf32> to vector<2x64x128xf32>
    %45 = vector.shape_cast %44 : vector<2x64x128xf32> to vector<1x2x64x128xf32>
    %46 = vector.extract_strided_slice %0 {offsets = [0, 4, 0], sizes = [2, 1, 128], strides = [1, 1, 1]} : vector<2x8x128xf32> to vector<2x1x128xf32>
    %47 = vector.shape_cast %46 : vector<2x1x128xf32> to vector<2x128xf32>
    %48 = vector.shape_cast %47 : vector<2x128xf32> to vector<2x1x1x128xf32>
    %49 = vector.broadcast %45 : vector<1x2x64x128xf32> to vector<2x2x64x128xf32>
    %50 = vector.broadcast %48 : vector<2x1x1x128xf32> to vector<2x2x64x128xf32>
    %51 = arith.mulf %49, %50 : vector<2x2x64x128xf32>
    %52 = arith.addf %42, %51 : vector<2x2x64x128xf32>
    %53 = vector.extract_strided_slice %1 {offsets = [0, 5, 0, 0], sizes = [2, 1, 64, 128], strides = [1, 1, 1, 1]} : vector<2x8x64x128xf32> to vector<2x1x64x128xf32>
    %54 = vector.shape_cast %53 : vector<2x1x64x128xf32> to vector<2x64x128xf32>
    %55 = vector.shape_cast %54 : vector<2x64x128xf32> to vector<1x2x64x128xf32>
    %56 = vector.extract_strided_slice %0 {offsets = [0, 5, 0], sizes = [2, 1, 128], strides = [1, 1, 1]} : vector<2x8x128xf32> to vector<2x1x128xf32>
    %57 = vector.shape_cast %56 : vector<2x1x128xf32> to vector<2x128xf32>
    %58 = vector.shape_cast %57 : vector<2x128xf32> to vector<2x1x1x128xf32>
    %59 = vector.broadcast %55 : vector<1x2x64x128xf32> to vector<2x2x64x128xf32>
    %60 = vector.broadcast %58 : vector<2x1x1x128xf32> to vector<2x2x64x128xf32>
    %61 = arith.mulf %59, %60 : vector<2x2x64x128xf32>
    %62 = arith.addf %52, %61 : vector<2x2x64x128xf32>
    %63 = vector.extract_strided_slice %1 {offsets = [0, 6, 0, 0], sizes = [2, 1, 64, 128], strides = [1, 1, 1, 1]} : vector<2x8x64x128xf32> to vector<2x1x64x128xf32>
    %64 = vector.shape_cast %63 : vector<2x1x64x128xf32> to vector<2x64x128xf32>
    %65 = vector.shape_cast %64 : vector<2x64x128xf32> to vector<1x2x64x128xf32>
    %66 = vector.extract_strided_slice %0 {offsets = [0, 6, 0], sizes = [2, 1, 128], strides = [1, 1, 1]} : vector<2x8x128xf32> to vector<2x1x128xf32>
    %67 = vector.shape_cast %66 : vector<2x1x128xf32> to vector<2x128xf32>
    %68 = vector.shape_cast %67 : vector<2x128xf32> to vector<2x1x1x128xf32>
    %69 = vector.broadcast %65 : vector<1x2x64x128xf32> to vector<2x2x64x128xf32>
    %70 = vector.broadcast %68 : vector<2x1x1x128xf32> to vector<2x2x64x128xf32>
    %71 = arith.mulf %69, %70 : vector<2x2x64x128xf32>
    %72 = arith.addf %62, %71 : vector<2x2x64x128xf32>
    %73 = vector.extract_strided_slice %1 {offsets = [0, 7, 0, 0], sizes = [2, 1, 64, 128], strides = [1, 1, 1, 1]} : vector<2x8x64x128xf32> to vector<2x1x64x128xf32>
    %74 = vector.shape_cast %73 : vector<2x1x64x128xf32> to vector<2x64x128xf32>
    %75 = vector.shape_cast %74 : vector<2x64x128xf32> to vector<1x2x64x128xf32>
    %76 = vector.extract_strided_slice %0 {offsets = [0, 7, 0], sizes = [2, 1, 128], strides = [1, 1, 1]} : vector<2x8x128xf32> to vector<2x1x128xf32>
    %77 = vector.shape_cast %76 : vector<2x1x128xf32> to vector<2x128xf32>
    %78 = vector.shape_cast %77 : vector<2x128xf32> to vector<2x1x1x128xf32>
    %79 = vector.broadcast %75 : vector<1x2x64x128xf32> to vector<2x2x64x128xf32>
    %80 = vector.broadcast %78 : vector<2x1x1x128xf32> to vector<2x2x64x128xf32>
    %81 = arith.mulf %79, %80 : vector<2x2x64x128xf32>
    %82 = arith.addf %72, %81 : vector<2x2x64x128xf32>
    %cst_6 = arith.constant 0.000000e+00 : f32
    %83 = vector.broadcast %cst_6 : f32 to vector<2x2x128xf32>
    %cst_7 = arith.constant 5.000000e-01 : f32
    %84 = vector.broadcast %cst_7 : f32 to vector<2x2x128xf32>
    %85 = vector.shape_cast %84 : vector<2x2x128xf32> to vector<2x2x1x128xf32>
    %86 = vector.broadcast %85 : vector<2x2x1x128xf32> to vector<2x2x64x128xf32>
    %87 = arith.mulf %86, %82 : vector<2x2x64x128xf32>
    %cst_8 = arith.constant dense<0.000000e+00> : vector<2x2x64xf32>
    %88 = vector.multi_reduction <add>, %87, %cst_8 [3] : vector<2x2x64x128xf32> to vector<2x2x64xf32>
    %89 = arith.mulf %88, %88 : vector<2x2x64xf32>
    %cst_9 = arith.constant dense<0.000000e+00> : vector<2x2xf32>
    %90 = vector.multi_reduction <add>, %89, %cst_9 [2] : vector<2x2x64xf32> to vector<2x2xf32>
    %91 = vector.shape_cast %90 : vector<2x2xf32> to vector<2x2x1xf32>
    %92 = math.rsqrt %91 : vector<2x2x1xf32>
    %93 = arith.mulf %91, %92 : vector<2x2x1xf32>
    %cst_10 = arith.constant 1.000000e+00 : f32
    %94 = vector.broadcast %cst_10 : f32 to vector<2x2x1xf32>
    %95 = arith.addf %94, %91 : vector<2x2x1xf32>
    %96 = tpu.reciprocal %95 {approx = true} : vector<2x2x1xf32> -> vector<2x2x1xf32>
    %97 = arith.mulf %93, %96 : vector<2x2x1xf32>
    %98 = vector.broadcast %97 : vector<2x2x1xf32> to vector<2x2x64xf32>
    %99 = arith.mulf %88, %98 : vector<2x2x64xf32>
    %100 = vector.shape_cast %99 : vector<2x2x64xf32> to vector<2x2x64x1xf32>
    %101 = vector.broadcast %100 : vector<2x2x64x1xf32> to vector<2x2x64x128xf32>
    %102 = arith.mulf %101, %82 : vector<2x2x64x128xf32>
    %cst_11 = arith.constant dense<0.000000e+00> : vector<2x2x128xf32>
    %103 = vector.multi_reduction <add>, %102, %cst_11 [2] : vector<2x2x64x128xf32> to vector<2x2x128xf32>
    %104 = arith.addf %83, %103 : vector<2x2x128xf32>
    %cst_12 = arith.constant dense<0xFF800000> : vector<2x128xf32>
    %105 = vector.multi_reduction <maximumf>, %104, %cst_12 [1] : vector<2x2x128xf32> to vector<2x128xf32>
    %106 = vector.shape_cast %105 : vector<2x128xf32> to vector<2x1x128xf32>
    %107 = vector.broadcast %106 : vector<2x1x128xf32> to vector<2x2x128xf32>
    %108 = arith.subf %104, %107 : vector<2x2x128xf32>
    %109 = math.exp %108 : vector<2x2x128xf32>
    %cst_13 = arith.constant dense<0.000000e+00> : vector<2x128xf32>
    %110 = vector.multi_reduction <add>, %109, %cst_13 [1] : vector<2x2x128xf32> to vector<2x128xf32>
    %111 = vector.shape_cast %110 : vector<2x128xf32> to vector<2x1x128xf32>
    %112 = vector.broadcast %111 : vector<2x1x128xf32> to vector<2x2x128xf32>
    %113 = arith.divf %109, %112 : vector<2x2x128xf32>
    %114 = vector.shape_cast %113 : vector<2x2x128xf32> to vector<2x2x1x128xf32>
    %115 = vector.broadcast %114 : vector<2x2x1x128xf32> to vector<2x2x64x128xf32>
    %116 = arith.mulf %115, %82 : vector<2x2x64x128xf32>
    %cst_14 = arith.constant dense<0.000000e+00> : vector<2x2x64xf32>
    %117 = vector.multi_reduction <add>, %116, %cst_14 [3] : vector<2x2x64x128xf32> to vector<2x2x64xf32>
    %118 = arith.mulf %117, %117 : vector<2x2x64xf32>
    %cst_15 = arith.constant dense<0.000000e+00> : vector<2x2xf32>
    %119 = vector.multi_reduction <add>, %118, %cst_15 [2] : vector<2x2x64xf32> to vector<2x2xf32>
    %120 = vector.shape_cast %119 : vector<2x2xf32> to vector<2x2x1xf32>
    %121 = math.rsqrt %120 : vector<2x2x1xf32>
    %122 = arith.mulf %120, %121 : vector<2x2x1xf32>
    %cst_16 = arith.constant 1.000000e+00 : f32
    %123 = vector.broadcast %cst_16 : f32 to vector<2x2x1xf32>
    %124 = arith.addf %123, %120 : vector<2x2x1xf32>
    %125 = tpu.reciprocal %124 {approx = true} : vector<2x2x1xf32> -> vector<2x2x1xf32>
    %126 = arith.mulf %122, %125 : vector<2x2x1xf32>
    %127 = vector.broadcast %126 : vector<2x2x1xf32> to vector<2x2x64xf32>
    %128 = arith.mulf %117, %127 : vector<2x2x64xf32>
    %129 = vector.shape_cast %128 : vector<2x2x64xf32> to vector<2x2x64x1xf32>
    %130 = vector.broadcast %129 : vector<2x2x64x1xf32> to vector<2x2x64x128xf32>
    %131 = arith.mulf %130, %82 : vector<2x2x64x128xf32>
    %cst_17 = arith.constant dense<0.000000e+00> : vector<2x2x128xf32>
    %132 = vector.multi_reduction <add>, %131, %cst_17 [2] : vector<2x2x64x128xf32> to vector<2x2x128xf32>
    %133 = arith.addf %104, %132 : vector<2x2x128xf32>
    %cst_18 = arith.constant dense<0xFF800000> : vector<2x128xf32>
    %134 = vector.multi_reduction <maximumf>, %133, %cst_18 [1] : vector<2x2x128xf32> to vector<2x128xf32>
    %135 = vector.shape_cast %134 : vector<2x128xf32> to vector<2x1x128xf32>
    %136 = vector.broadcast %135 : vector<2x1x128xf32> to vector<2x2x128xf32>
    %137 = arith.subf %133, %136 : vector<2x2x128xf32>
    %138 = math.exp %137 : vector<2x2x128xf32>
    %cst_19 = arith.constant dense<0.000000e+00> : vector<2x128xf32>
    %139 = vector.multi_reduction <add>, %138, %cst_19 [1] : vector<2x2x128xf32> to vector<2x128xf32>
    %140 = vector.shape_cast %139 : vector<2x128xf32> to vector<2x1x128xf32>
    %141 = vector.broadcast %140 : vector<2x1x128xf32> to vector<2x2x128xf32>
    %142 = arith.divf %138, %141 : vector<2x2x128xf32>
    %143 = vector.shape_cast %142 : vector<2x2x128xf32> to vector<2x2x1x128xf32>
    %144 = vector.broadcast %143 : vector<2x2x1x128xf32> to vector<2x2x64x128xf32>
    %145 = arith.mulf %144, %82 : vector<2x2x64x128xf32>
    %cst_20 = arith.constant dense<0.000000e+00> : vector<2x2x64xf32>
    %146 = vector.multi_reduction <add>, %145, %cst_20 [3] : vector<2x2x64x128xf32> to vector<2x2x64xf32>
    %147 = arith.mulf %146, %146 : vector<2x2x64xf32>
    %cst_21 = arith.constant dense<0.000000e+00> : vector<2x2xf32>
    %148 = vector.multi_reduction <add>, %147, %cst_21 [2] : vector<2x2x64xf32> to vector<2x2xf32>
    %149 = vector.shape_cast %148 : vector<2x2xf32> to vector<2x2x1xf32>
    %150 = math.rsqrt %149 : vector<2x2x1xf32>
    %151 = arith.mulf %149, %150 : vector<2x2x1xf32>
    %cst_22 = arith.constant 1.000000e+00 : f32
    %152 = vector.broadcast %cst_22 : f32 to vector<2x2x1xf32>
    %153 = arith.addf %152, %149 : vector<2x2x1xf32>
    %154 = tpu.reciprocal %153 {approx = true} : vector<2x2x1xf32> -> vector<2x2x1xf32>
    %155 = arith.mulf %151, %154 : vector<2x2x1xf32>
    %156 = vector.broadcast %155 : vector<2x2x1xf32> to vector<2x2x64xf32>
    %157 = arith.mulf %146, %156 : vector<2x2x64xf32>
    %158 = vector.extract_strided_slice %157 {offsets = [0, 0, 0], sizes = [2, 1, 64], strides = [1, 1, 1]} : vector<2x2x64xf32> to vector<2x1x64xf32>
    %159 = vector.shape_cast %158 : vector<2x1x64xf32> to vector<2x64xf32>
    %c0_23 = arith.constant 0 : index
    %c0_24 = arith.constant 0 : index
    %160 = vector.load %arg3[%c0_23, %c0_24] : memref<2x128xf32, #tpu.memory_space<vmem>>, vector<2x64xf32>
    tpu.vector_store %arg3[%c0_23, %c0_24], %159 {strides = array<i32>} : memref<2x128xf32, #tpu.memory_space<vmem>>, vector<2x64xf32>,
    %161 = vector.extract_strided_slice %157 {offsets = [0, 1, 0], sizes = [2, 1, 64], strides = [1, 1, 1]} : vector<2x2x64xf32> to vector<2x1x64xf32>
    %162 = vector.shape_cast %161 : vector<2x1x64xf32> to vector<2x64xf32>
    %c0_25 = arith.constant 0 : index
    %c64 = arith.constant 64 : index
    %163 = vector.load %arg3[%c0_25, %c64] : memref<2x128xf32, #tpu.memory_space<vmem>>, vector<2x64xf32>
    tpu.vector_store %arg3[%c0_25, %c64], %162 {strides = array<i32>} : memref<2x128xf32, #tpu.memory_space<vmem>>, vector<2x64xf32>,
    return
  }
  func.func @transform_0(%arg0: i32) -> (i32, i32, i32) {
    %c0_i32 = arith.constant 0 : i32
    %c0_i32_0 = arith.constant 0 : i32
    %c0_i32_1 = arith.constant 0 : i32
    return %arg0, %c0_i32, %c0_i32_0 : i32, i32, i32
  }
  func.func @transform_1(%arg0: i32) -> (i32, i32, i32, i32) {
    %c0_i32 = arith.constant 0 : i32
    %c0_i32_0 = arith.constant 0 : i32
    %c0_i32_1 = arith.constant 0 : i32
    %c0_i32_2 = arith.constant 0 : i32
    %c0_i32_3 = arith.constant 0 : i32
    return %c0_i32, %c0_i32_0, %c0_i32_1, %c0_i32_2 : i32, i32, i32, i32
  }
  func.func @transform_2(%arg0: i32) -> (i32, i32) {
    %c0_i32 = arith.constant 0 : i32
    %c0_i32_0 = arith.constant 0 : i32
    return %arg0, %c0_i32 : i32, i32
  }
}

</mosaic_0001>

<bundles_post_ra>
// kernel: digitcaps_forward.1
= control target key start
LH: loop header
LB: loop body
LE: loop exit
PB: predicated region body
PF: predicated region fallthrough
CT: control target
= control target key end

     0   :  { %7 = vsyncpa [#allocation3], 0  ;;  %s4604_s0 = inlined_call_operand.hbm [shape: f32[2,8,128], index: 0, kind: input, shape index: {}]   ;;  %s4605_s1 = inlined_call_operand.hbm [shape: f32[2,8,64,128], index: 1, kind: input, shape index: {}]   ;;  %s4606_s2 = inlined_call_operand.vmem [shape: f32[2,128], index: 2, kind: output, shape index: {}]  }
   0x1   :  { %8 = vsyncpa [#allocation5], 0  ;;  %s2981_s9 = smov [#allocation2]   ;;  %s2933_s13 = scalar_lea.hbm %s4604_s0, 256 }
   0x2   :  { %s14_s10 = sshll.u32 %s2981_s9, 4  ;;  %p2934_p0 = scmp.ne.s32.totalorder %s4604_s0, %s2933_s13  ;;  %s15_s10 = int_to_ptr.vmem [resolvable:$true] %s14_s10 }
   0x3   :  { %p2937_p1 = scmp.lt.u32.totalorder %s2933_s13, %s4604_s0 }
   0x5   :  { %p2939_p2 = pnand %p2937_p1, %p2934_p0 }
   0x7   :  { %2942 = shalt.err (!%p2939_p2)
}
   0x8   :  { %s2943_s18 = scalar_lea.vmem %s15_s10, 256  ;;  %p2948_p4 = scmp.lt.s32.totalorder %s15_s10, %s15_s10 }
   0x9   :  { %p2944_p3 = scmp.ne.s32.totalorder %s15_s10, %s2943_s18  ;;  %p2949_p5 = scmp.lt.s32.totalorder %s2943_s18, %s2943_s18 }
   0xb   :  { %p2950_p6 = por %p2949_p5, %p2948_p4 }
   0xd   :  { %p2951_p7 = pnand %p2950_p6, %p2944_p3 }
   0xf   :  { %2954 = shalt.err (!%p2951_p7)
}
  0x10   :  { %s2982_s19 = smov 128   ;;  %s2983_s20 = smov 8  }
  0x11   :  { %20 = dma.hbm_to_vmem [thread:$0]  %s4604_s0, 256, %s15_s10, [#allocation3], %s2982_s19, %s2982_s19, %s2983_s20  }
  0x12   :  { %s2984_s23 = smov [#allocation4]   ;;  %s2955_s27 = scalar_lea.hbm %s4605_s1, 16384 }
  0x13   :  { %s26_s24 = sshll.u32 %s2984_s23, 4  ;;  %p2956_p8 = scmp.ne.s32.totalorder %s4605_s1, %s2955_s27  ;;  %s27_s24 = int_to_ptr.vmem [resolvable:$true] %s26_s24 }
  0x14   :  { %p2959_p9 = scmp.lt.u32.totalorder %s2955_s27, %s4605_s1 }
  0x16   :  { %p2961_p10 = pnand %p2959_p9, %p2956_p8 }
  0x18   :  { %2964 = shalt.err (!%p2961_p10)
}
  0x19   :  { %s2965_s4 = scalar_lea.vmem %s27_s24, 16384  ;;  %p2970_p12 = scmp.lt.s32.totalorder %s27_s24, %s27_s24 }
  0x1a   :  { %p2966_p11 = scmp.ne.s32.totalorder %s27_s24, %s2965_s4  ;;  %p2971_p13 = scmp.lt.s32.totalorder %s2965_s4, %s2965_s4 }
  0x1c   :  { %p2972_p0 = por %p2971_p13, %p2970_p12 }
  0x1e   :  { %p2973_p1 = pnand %p2972_p0, %p2966_p11 }
  0x20   :  { %2976 = shalt.err (!%p2973_p1)
}
  0x21   :  { %32 = dma.hbm_to_vmem [thread:$0]  %s4605_s1, 16384, %s27_s24, [#allocation5], %s2982_s19, %s2982_s19, %s2983_s20  }
  0x22   :  { %2977 = dma.done.wait [#allocation3], 256  }
  0x23   :  { %2978 = vsyncadd [#allocation3], 4294967040 }
  0x24   :  { %2979 = dma.done.wait [#allocation5], 16384  }
  0x25   :  { %2980 = vsyncadd [#allocation5], 4294950912  ;;  %v4607_v0 = vlaneseq  ;;  %v39_v10 = vld [vmem:[#allocation2] sm:$0xff]  ;;  %v3040_v11 = vld [vmem:[#allocation4 + $0x200] sm:$0xff]  ;;  %vm916_vm0 = vcmask 130112   ;;  %vm923_vm1 = vcmask 195712  }
  0x26   :  { %4757 = vst [vmem:[#allocation10_spill] sm:$0xff] %v3040_v11  ;;  %v3042_v12 = vld [vmem:[#allocation4 + $0x240] sm:$0xff]  ;;  %v3128_v47 = vld [vmem:[#allocation4 + $0x208] sm:$0xff]  ;;  %vm930_vm2 = vcmask 261312   ;;  %vm937_vm3 = vcmask 326912   ;;  %vm944_vm4 = vcmask 392512  }
  0x27   :  { %v3026_v1 = vshrl.u32 %v4607_v0, 7  ;;  %4758 = vst [vmem:[#allocation11_spill] sm:$0xff] %v3042_v12  ;;  %v3044_v13 = vld [vmem:[#allocation4 + $0x280] sm:$0xff]  ;;  %v3138_v52 = vld [vmem:[#allocation4 + $0x248] sm:$0xff]  ;;  %vm951_vm5 = vcmask 458112   ;;  %vm958_vm6 = vcmask 523712  }
  0x28   :  { %4759 = vst [vmem:[#allocation12_spill] sm:$0xff] %v3044_v13  ;;  %v3046_v14 = vld [vmem:[#allocation4 + $0x2c0] sm:$0xff]  ;;  %v3140_v53 = vld [vmem:[#allocation4 + $0x288] sm:$0xff]  ;;  %vm1077_vm7 = vcmask 1041409   ;;  %vm1082_vm8 = vcmask 517120   ;;  %vm1425_vm9 = vcmask 1041408  }
  0x29   :  { %4755 = vst [vmem:[#allocation8_spill] sm:$0xff] %v3026_v1  ;;  %v3029_v2 = vsub.s32 0, %v3026_v1  ;;  %v3032_v3 = vsub.s32 1, %v3026_v1  ;;  %v4613_v4 = vsub.s32 2, %v3026_v1  ;;  %v4612_v5 = vsub.s32 3, %v3026_v1  ;;  %4760 = vst [vmem:[#allocation13_spill] sm:$0xff] %v3046_v14 }
  0x2a   :  { %v4611_v6 = vsub.s32 4, %v3026_v1  ;;  %v4610_v7 = vsub.s32 5, %v3026_v1  ;;  %v4609_v8 = vsub.s32 6, %v3026_v1  ;;  %v4608_v9 = vsub.s32 7, %v3026_v1  ;;  %v3048_v15 = vld [vmem:[#allocation4 + $0x300] sm:$0xff]  ;;  %v3142_v54 = vld [vmem:[#allocation4 + $0x2c8] sm:$0xff] }
  0x2b   :  { %4756 = vst [vmem:[#allocation9_spill] sm:$0xff] %v3032_v3  ;;  %4761 = vst [vmem:[#allocation14_spill] sm:$0xff] %v3048_v15  ;;  %v3051_v16 = vrot.slane %v39_v10, %v3029_v2  ;;  %v3054_v17 = vrot.slane %v39_v10, %v3032_v3  ;;  %v3058_v18 = vrot.slane %v39_v10, %v4613_v4  ;;  %v3064_v20 = vld [vmem:[#allocation4 + $0x340] sm:$0xff]  ;;  %v3146_v58 = vld [vmem:[#allocation4 + $0x308] sm:$0xff]  ;;  %vm2785_vm10 = vcmask 654912  }
  0x2c   :  { %v3062_v19 = vrot.slane %v39_v10, %v4612_v5  ;;  %4764 = vst [vmem:[#allocation17_spill] sm:$0xff] %v3064_v20  ;;  %v3066_v21 = vld [vmem:[#allocation4 + $0x380] sm:$0xff]  ;;  %v3072_v23 = vrot.slane %v39_v10, %v4611_v6  ;;  %v3076_v24 = vrot.slane %v39_v10, %v4610_v7  ;;  %v3080_v25 = vrot.slane %v39_v10, %v4609_v8  ;;  %v3148_v59 = vld [vmem:[#allocation4 + $0x348] sm:$0xff] }
  0x2d   :  { %4762 = vst [vmem:[#allocation15_spill] sm:$0xff] %v3051_v16  ;;  %4763 = vst [vmem:[#allocation16_spill] sm:$0xff] %v3054_v17  ;;  %v3068_v22 = vld [vmem:[#allocation4 + $0x3c0] sm:$0xff]  ;;  %v3084_v26 = vrot.slane %v39_v10, %v4608_v9  ;;  %v185_v27 = vmul.f32 %v3051_v16, %v3040_v11  ;;  %v257_v28 = vmul.f32 %v3054_v17, %v3042_v12  ;;  %v3150_v60 = vld [vmem:[#allocation4 + $0x388] sm:$0xff]  ;;  %vm2792_vm11 = vcmask 720512  }
  0x2e   :  { %4765 = vst [vmem:[#allocation18_spill] sm:$0xff] %v3066_v21  ;;  %4766 = vst [vmem:[#allocation19_spill] sm:$0xff] %v3068_v22  ;;  %v329_v29 = vmul.f32 %v3058_v18, %v3044_v13  ;;  %v401_v30 = vmul.f32 %v3062_v19, %v3046_v14  ;;  %v3094_v31 = vld [vmem:[#allocation4] sm:$0xff]  ;;  %v473_v34 = vmul.f32 %v3072_v23, %v3048_v15  ;;  %v3154_v62 = vld [vmem:[#allocation4 + $0x3c8] sm:$0xff]  ;;  %vm2799_vm12 = vcmask 786112  }
  0x2f   :  { %v3096_v32 = vld [vmem:[#allocation4 + $0x40] sm:$0xff]  ;;  %v545_v35 = vmul.f32 %v3076_v24, %v3064_v20  ;;  %v3106_v36 = vmul.f32 %v3080_v25, %v3066_v21  ;;  %v3110_v37 = vmul.f32 %v3084_v26, %v3068_v22  ;;  %v289_v41 = vadd.f32 %v257_v28, %v185_v27  ;;  %4767 = vst [vmem:[#allocation20_spill] sm:$0xff] %v3148_v59  ;;  %v58_v8 = vld [vmem:[#allocation4 + $0x88] sm:$0xff] }
  0x30   :  { %v3098_v33 = vld [vmem:[#allocation4 + $0x80] sm:$0xff]  ;;  %v177_v44 = vmul.f32 %v3051_v16, %v3094_v31  ;;  %v249_v45 = vmul.f32 %v3054_v17, %v3096_v32  ;;  %4768 = vst [vmem:[#allocation21_spill] sm:$0xff] %v3150_v60  ;;  %v186_v61 = vmul.f32 %v3051_v16, %v3128_v47  ;;  %4769 = vst [vmem:[#allocation22_spill] sm:$0xff] %v3154_v62  ;;  %v66_v7 = vld [vmem:[#allocation4 + $0xc8] sm:$0xff]  ;;  %vm2806_vm13 = vcmask 851712  }
  0x31   :  { %v3112_v38 = vld [vmem:[#allocation4 + $0xc0] sm:$0xff]  ;;  %v321_v46 = vmul.f32 %v3058_v18, %v3098_v33  ;;  %v361_v55 = vadd.f32 %v329_v29, %v289_v41  ;;  %v258_v63 = vmul.f32 %v3054_v17, %v3138_v52  ;;  %v330_v10 = vmul.f32 %v3058_v18, %v3140_v53  ;;  %v42_v29 = vld [vmem:[#allocation4 + $0x8] sm:$0xff] }
  0x32   :  { %v3114_v39 = vld [vmem:[#allocation4 + $0x100] sm:$0xff]  ;;  %v393_v48 = vmul.f32 %v3062_v19, %v3112_v38  ;;  %v281_v56 = vadd.f32 %v249_v45, %v177_v44  ;;  %v402_v27 = vmul.f32 %v3062_v19, %v3142_v54  ;;  %v474_v28 = vmul.f32 %v3072_v23, %v3146_v58  ;;  %v50_v41 = vld [vmem:[#allocation4 + $0x48] sm:$0xff] }
  0x33   :  { %v3116_v40 = vld [vmem:[#allocation4 + $0x140] sm:$0xff]  ;;  %v465_v49 = vmul.f32 %v3072_v23, %v3114_v39  ;;  %v433_v44 = vadd.f32 %v401_v30, %v361_v55  ;;  %v546_v0 = vmul.f32 %v3076_v24, %v3148_v59  ;;  %v618_v9 = vmul.f32 %v3080_v25, %v3150_v60  ;;  %v74_v6 = vld [vmem:[#allocation4 + $0x108] sm:$0xff]  ;;  %v40_v60 = vld [vmem:[#allocation2 + $0x8] sm:$0xff] }
  0x34   :  { %v3118_v42 = vld [vmem:[#allocation4 + $0x180] sm:$0xff]  ;;  %v537_v50 = vmul.f32 %v3076_v24, %v3116_v40  ;;  %v353_v45 = vadd.f32 %v321_v46, %v281_v56  ;;  %v290_v5 = vadd.f32 %v258_v63, %v186_v61  ;;  %v690_v4 = vmul.f32 %v3084_v26, %v3154_v62  ;;  %v82_v22 = vld [vmem:[#allocation4 + $0x148] sm:$0xff] }
  0x35   :  { %v3120_v43 = vld [vmem:[#allocation4 + $0x1c0] sm:$0xff]  ;;  %v609_v51 = vmul.f32 %v3080_v25, %v3118_v42  ;;  %v90_v21 = vld [vmem:[#allocation4 + $0x188] sm:$0xff]  ;;  %v178_v15 = vmul.f32 %v3051_v16, %v42_v29  ;;  %v250_v30 = vmul.f32 %v3054_v17, %v50_v41  ;;  %v505_v46 = vadd.f32 %v473_v34, %v433_v44 }
  0x36   :  { %v681_v57 = vmul.f32 %v3084_v26, %v3120_v43  ;;  %v98_v20 = vld [vmem:[#allocation4 + $0x1c8] sm:$0xff]  ;;  %v425_v55 = vadd.f32 %v393_v48, %v353_v45  ;;  %v322_v56 = vmul.f32 %v3058_v18, %v58_v8  ;;  %v394_v14 = vmul.f32 %v3062_v19, %v66_v7 }
  0x37   :  { %v362_v13 = vadd.f32 %v330_v10, %v290_v5  ;;  %v282_v59 = vadd.f32 %v250_v30, %v178_v15  ;;  %v466_v61 = vmul.f32 %v3072_v23, %v74_v6  ;;  %v538_v63 = vmul.f32 %v3076_v24, %v82_v22 }
  0x38   :  { %v577_v62 = vadd.f32 %v545_v35, %v505_v46  ;;  %v497_v12 = vadd.f32 %v465_v49, %v425_v55  ;;  %v610_v11 = vmul.f32 %v3080_v25, %v90_v21  ;;  %v682_v16 = vmul.f32 %v3084_v26, %v98_v20 }
  0x39   :  { %v434_v17 = vadd.f32 %v402_v27, %v362_v13  ;;  %v354_v34 = vadd.f32 %v322_v56, %v282_v59  ;;  %v3179_v48 = vrot.slane %v40_v60, %v3029_v2  ;;  %v3182_v44 = vrot.slane %v40_v60, %v3032_v3 }
  0x3a   :  { %v649_v5 = vadd.f32 %v3106_v36, %v577_v62  ;;  %v569_v15 = vadd.f32 %v537_v50, %v497_v12  ;;  %v4770_v10 = vsub.s32 2, %v3026_v1  ;;  %v4771_v35 = vsub.s32 3, %v3026_v1 }
  0x3b   :  { %v506_v30 = vadd.f32 %v474_v28, %v434_v17  ;;  %v426_v13 = vadd.f32 %v394_v14, %v354_v34  ;;  %v194_v59 = vmul.f32 %v3179_v48, %v42_v29  ;;  %v266_v27 = vmul.f32 %v3182_v44, %v50_v41 }
  0x3c   :  { %v3187_v45 = vrot.slane %v40_v60, %v4770_v10  ;;  %v3191_v49 = vrot.slane %v40_v60, %v4771_v35  ;;  %v3196_v46 = vadd.f32 %v3110_v37, %v649_v5  ;;  %v641_v55 = vadd.f32 %v609_v51, %v569_v15 }
  0x3d   :  { %v578_v50 = vadd.f32 %v546_v0, %v506_v30  ;;  %v498_v62 = vadd.f32 %v466_v61, %v426_v13  ;;  %v298_v56 = vadd.f32 %v266_v27, %v194_v59  ;;  %v4773_v10 = vsub.s32 4, %v3026_v1 }
  0x3e   :  { %4772 = vst [vmem:[#allocation23_spill] sm:$0xff] %v3196_v46  ;;  %v338_v12 = vmul.f32 %v3187_v45, %v58_v8  ;;  %v410_v36 = vmul.f32 %v3191_v49, %v66_v7  ;;  %v753_v14 = vmul.f32 0.5, %v3196_v46  ;;  %v3205_v17 = vadd.f32 %v681_v57, %v641_v55 }
  0x3f   :  { %v3202_v35 = vrot.slane %v40_v60, %v4773_v10  ;;  %v4775_v28 = vsub.s32 5, %v3026_v1  ;;  %v4776_v51 = vsub.s32 6, %v3026_v1  ;;  %v650_v7 = vadd.f32 %v618_v9, %v578_v50 }
  0x40   :  { %4774 = vst [vmem:[#allocation24_spill] sm:$0xff] %v3205_v17  ;;  %v570_v0 = vadd.f32 %v538_v63, %v498_v62  ;;  %v370_v29 = vadd.f32 %v338_v12, %v298_v56  ;;  %793 = vadd.xlane.f32.xlu1 %v753_v14  ;;  %v745_v61 = vmul.f32 0.5, %v3205_v17  ;;  %v4777_v57 = vsub.s32 7, %v3026_v1 }
  0x41   :  { %v3209_v37 = vrot.slane %v40_v60, %v4775_v28  ;;  %v3213_v8 = vrot.slane %v40_v60, %v4776_v51  ;;  %v482_v41 = vmul.f32 %v3202_v35, %v74_v6  ;;  %v3222_v15 = vadd.f32 %v690_v4, %v650_v7  ;;  %v4783_v51 = vld [vmem:[#allocation20_spill] sm:$0xff] }
  0x42   :  { %v3220_v5 = vrot.slane %v40_v60, %v4777_v57  ;;  %v642_v30 = vadd.f32 %v610_v11, %v570_v0  ;;  %v442_v13 = vadd.f32 %v410_v36, %v370_v29  ;;  %v193_v9 = vmul.f32 %v3179_v48, %v3094_v31  ;;  %777 = vadd.xlane.f32.xlu0 %v745_v61  ;;  %v4784_v7 = vld [vmem:[#allocation12_spill] sm:$0xff]  ;;  %v3266_v29 = vld [vmem:[#allocation4 + $0x250] sm:$0xff]  ;;  %v4786_v57 = vld [vmem:[#allocation13_spill] sm:$0xff] }
  0x43   :  { %v554_v34 = vmul.f32 %v3209_v37, %v82_v22  ;;  %4778 = vst [vmem:[#allocation25_spill] sm:$0xff] %v3222_v15  ;;  %v265_v6 = vmul.f32 %v3182_v44, %v3096_v32  ;;  %v337_v63 = vmul.f32 %v3187_v45, %v3098_v33  ;;  %v754_v22 = vmul.f32 0.5, %v3222_v15 }
  0x44   :  { %v3231_v59 = vadd.f32 %v682_v16, %v642_v30  ;;  %v514_v60 = vadd.f32 %v482_v41, %v442_v13  ;;  %v626_v4 = vmul.f32 %v3213_v8, %v90_v21  ;;  %v698_v11 = vmul.f32 %v3220_v5, %v98_v20  ;;  %v123_v13 = vld [vmem:[#allocation4 + $0x290] sm:$0xff] }
  0x45   :  { %v297_v27 = vadd.f32 %v265_v6, %v193_v9  ;;  %v409_v31 = vmul.f32 %v3191_v49, %v3112_v38  ;;  %v481_v55 = vmul.f32 %v3202_v35, %v3114_v39  ;;  %795 = vadd.xlane.f32.xlu1 %v754_v22  ;;  %v202_v16 = vmul.f32 %v3179_v48, %v3128_v47 }
  0x46   :  { %4779 = vst [vmem:[#allocation26_spill] sm:$0xff] %v3231_v59  ;;  %v746_v32 = vmul.f32 0.5, %v3231_v59  ;;  %v586_v33 = vadd.f32 %v554_v34, %v514_v60  ;;  %v274_v12 = vmul.f32 %v3182_v44, %v3138_v52  ;;  %v553_v20 = vmul.f32 %v3209_v37, %v3116_v40  ;;  %v4780_v40 = vld [vmem:[#allocation10_spill] sm:$0xff] }
  0x47   :  { %v369_v21 = vadd.f32 %v337_v63, %v297_v27  ;;  %v625_v38 = vmul.f32 %v3213_v8, %v3118_v42  ;;  %v346_v39 = vmul.f32 %v3187_v45, %v3140_v53  ;;  %v697_v50 = vmul.f32 %v3220_v5, %v3120_v43  ;;  %v4781_v42 = vld [vmem:[#allocation11_spill] sm:$0xff]  ;;  %v4787_v63 = vld [vmem:[#allocation22_spill] sm:$0xff] }
  0x48   :  { %779 = vadd.xlane.f32.xlu0 %v746_v32  ;;  %v658_v36 = vadd.f32 %v626_v4, %v586_v33  ;;  %v306_v62 = vadd.f32 %v274_v12, %v202_v16  ;;  %v418_v47 = vmul.f32 %v3191_v49, %v3142_v54  ;;  %v490_v56 = vmul.f32 %v3202_v35, %v3146_v58  ;;  %v107_v54 = vld [vmem:[#allocation4 + $0x210] sm:$0xff]  ;;  %v4785_v58 = vld [vmem:[#allocation21_spill] sm:$0xff]  ;;  %v4789_v32 = vld [vmem:[#allocation15_spill] sm:$0xff] }
  0x49   :  { %v441_v52 = vadd.f32 %v409_v31, %v369_v21  ;;  %v201_v10 = vmul.f32 %v3179_v48, %v4780_v40  ;;  %v273_v14 = vmul.f32 %v3182_v44, %v4781_v42  ;;  %v562_v43 = vmul.f32 %v3209_v37, %v4783_v51  ;;  %v4788_v60 = vld [vmem:[#allocation14_spill] sm:$0xff]  ;;  %v4790_v16 = vld [vmem:[#allocation16_spill] sm:$0xff] }
  0x4a   :  { %v3260_v53 = vadd.f32 %v698_v11, %v658_v36  ;;  %v378_v28 = vadd.f32 %v346_v39, %v306_v62  ;;  %v345_v0 = vmul.f32 %v3187_v45, %v4784_v7  ;;  %v634_v61 = vmul.f32 %v3213_v8, %v4785_v58  ;;  %v131_v11 = vld [vmem:[#allocation4 + $0x2d0] sm:$0xff]  ;;  %v4791_v36 = vld [vmem:[#allocation17_spill] sm:$0xff] }
  0x4b   :  { %v513_v41 = vadd.f32 %v481_v55, %v441_v52  ;;  %v305_v34 = vadd.f32 %v273_v14, %v201_v10  ;;  %v417_v30 = vmul.f32 %v3191_v49, %v4786_v57  ;;  %v706_v22 = vmul.f32 %v3220_v5, %v4787_v63  ;;  %v139_v55 = vld [vmem:[#allocation4 + $0x310] sm:$0xff] }
  0x4c   :  { %4782 = vst [vmem:[#allocation10_spill] sm:$0xff] %v3260_v53  ;;  %v762_v9 = vmul.f32 0.5, %v3260_v53  ;;  %v450_v6 = vadd.f32 %v418_v47, %v378_v28  ;;  %v489_v4 = vmul.f32 %v3202_v35, %v4788_v60  ;;  %v187_v33 = vmul.f32 %v4789_v32, %v107_v54  ;;  %v43_v21 = vld [vmem:[#allocation4 + $0x10] sm:$0xff] }
  0x4d   :  { %v585_v27 = vadd.f32 %v553_v20, %v513_v41  ;;  %v377_v31 = vadd.f32 %v345_v0, %v305_v34  ;;  %v259_v12 = vmul.f32 %v4790_v16, %v3266_v29  ;;  %v561_v62 = vmul.f32 %v3209_v37, %v4791_v36  ;;  %v4792_v47 = vld [vmem:[#allocation18_spill] sm:$0xff] }
  0x4e   :  { %811 = vadd.xlane.f32.xlu1 %v762_v9  ;;  %v522_v39 = vadd.f32 %v490_v56, %v450_v6  ;;  %v633_v52 = vmul.f32 %v3213_v8, %v4792_v47  ;;  %v331_v40 = vmul.f32 %v3058_v18, %v123_v13  ;;  %v51_v10 = vld [vmem:[#allocation4 + $0x50] sm:$0xff]  ;;  %v403_v51 = vmul.f32 %v3062_v19, %v131_v11  ;;  %v4793_v56 = vld [vmem:[#allocation19_spill] sm:$0xff] }
  0x4f   :  { %v657_v20 = vadd.f32 %v625_v38, %v585_v27  ;;  %v449_v42 = vadd.f32 %v417_v30, %v377_v31  ;;  %v147_v14 = vld [vmem:[#allocation4 + $0x350] sm:$0xff]  ;;  %v291_v28 = vadd.f32 %v259_v12, %v187_v33  ;;  %v705_v58 = vmul.f32 %v3220_v5, %v4793_v56 }
  0x50   :  { %v59_v7 = vld [vmem:[#allocation4 + $0x90] sm:$0xff]  ;;  %v594_v41 = vadd.f32 %v562_v43, %v522_v39  ;;  %v475_v34 = vmul.f32 %v3072_v23, %v139_v55  ;;  %v179_v57 = vmul.f32 %v4789_v32, %v43_v21  ;;  %v251_v27 = vmul.f32 %v4790_v16, %v51_v10 }
  0x51   :  { %v3286_v0 = vld [vmem:[#allocation4 + $0xd0] sm:$0xff]  ;;  %v3292_v9 = vadd.f32 %v697_v50, %v657_v20  ;;  %v521_v6 = vadd.f32 %v489_v4, %v449_v42  ;;  %v363_v63 = vadd.f32 %v331_v40, %v291_v28  ;;  %v547_v33 = vmul.f32 %v3076_v24, %v147_v14 }
  0x52   :  { %v155_v38 = vld [vmem:[#allocation4 + $0x390] sm:$0xff]  ;;  %v666_v31 = vadd.f32 %v634_v61, %v594_v41  ;;  %v323_v43 = vmul.f32 %v3058_v18, %v59_v7  ;;  %v395_v12 = vmul.f32 %v3062_v19, %v3286_v0  ;;  %v283_v4 = vadd.f32 %v251_v27, %v179_v57 }
  0x53   :  { %4794 = vst [vmem:[#allocation11_spill] sm:$0xff] %v3292_v9  ;;  %v163_v30 = vld [vmem:[#allocation4 + $0x3d0] sm:$0xff]  ;;  %v761_v39 = vmul.f32 0.5, %v3292_v9  ;;  %v593_v36 = vadd.f32 %v561_v62, %v521_v6  ;;  %v435_v50 = vadd.f32 %v403_v51, %v363_v63  ;;  %v619_v40 = vmul.f32 %v3080_v25, %v155_v38 }
  0x54   :  { %v75_v60 = vld [vmem:[#allocation4 + $0x110] sm:$0xff]  ;;  %v3300_v20 = vadd.f32 %v706_v22, %v666_v31  ;;  %v691_v42 = vmul.f32 %v3084_v26, %v163_v30  ;;  %v355_v17 = vadd.f32 %v323_v43, %v283_v4  ;;  %v203_v9 = vmul.f32 %v3179_v48, %v107_v54  ;;  %v116_v4 = vld [vmem:[#allocation4 + $0x258] sm:$0xff] }
  0x55   :  { %v83_v47 = vld [vmem:[#allocation4 + $0x150] sm:$0xff]  ;;  %v467_v28 = vmul.f32 %v3072_v23, %v75_v60  ;;  %809 = vadd.xlane.f32.xlu0 %v761_v39  ;;  %v665_v41 = vadd.f32 %v633_v52, %v593_v36  ;;  %v507_v56 = vadd.f32 %v475_v34, %v435_v50  ;;  %v275_v22 = vmul.f32 %v3182_v44, %v3266_v29  ;;  %v108_v50 = vld [vmem:[#allocation4 + $0x218] sm:$0xff] }
  0x56   :  { %4795 = vst [vmem:[#allocation20_spill] sm:$0xff] %v3300_v20  ;;  %v91_v61 = vld [vmem:[#allocation4 + $0x190] sm:$0xff]  ;;  %v770_v62 = vmul.f32 0.5, %v3300_v20  ;;  %v539_v51 = vmul.f32 %v3076_v24, %v83_v47  ;;  %v347_v57 = vmul.f32 %v3187_v45, %v123_v13  ;;  %v427_v27 = vadd.f32 %v395_v12, %v355_v17 }
  0x57   :  { %v99_v53 = vld [vmem:[#allocation4 + $0x1d0] sm:$0xff]  ;;  %v3311_v6 = vadd.f32 %v705_v58, %v665_v41  ;;  %v579_v63 = vadd.f32 %v547_v33, %v507_v56  ;;  %v611_v52 = vmul.f32 %v3080_v25, %v91_v61  ;;  %v307_v31 = vadd.f32 %v275_v22, %v203_v9  ;;  %v132_v56 = vld [vmem:[#allocation4 + $0x2d8] sm:$0xff] }
  0x58   :  { %827 = vadd.xlane.f32.xlu1 %v770_v62  ;;  %v683_v34 = vmul.f32 %v3084_v26, %v99_v53  ;;  %v419_v54 = vmul.f32 %v3191_v49, %v131_v11  ;;  %v491_v43 = vmul.f32 %v3202_v35, %v139_v55  ;;  %v499_v29 = vadd.f32 %v467_v28, %v427_v27  ;;  %v124_v28 = vld [vmem:[#allocation4 + $0x298] sm:$0xff] }
  0x59   :  { %4796 = vst [vmem:[#allocation12_spill] sm:$0xff] %v3311_v6  ;;  %v769_v39 = vmul.f32 0.5, %v3311_v6  ;;  %v651_v36 = vadd.f32 %v619_v40, %v579_v63  ;;  %v195_v13 = vmul.f32 %v3179_v48, %v43_v21  ;;  %v379_v58 = vadd.f32 %v347_v57, %v307_v31  ;;  %v140_v22 = vld [vmem:[#allocation4 + $0x318] sm:$0xff] }
  0x5a   :  { %v563_v33 = vmul.f32 %v3209_v37, %v147_v14  ;;  %v267_v17 = vmul.f32 %v3182_v44, %v51_v10  ;;  %v339_v12 = vmul.f32 %v3187_v45, %v59_v7  ;;  %v571_v11 = vadd.f32 %v539_v51, %v499_v29  ;;  %v44_v27 = vld [vmem:[#allocation4 + $0x18] sm:$0xff] }
  0x5b   :  { %825 = vadd.xlane.f32.xlu0 %v769_v39  ;;  %v3322_v9 = vadd.f32 %v691_v42, %v651_v36  ;;  %v635_v55 = vmul.f32 %v3213_v8, %v155_v38  ;;  %v707_v40 = vmul.f32 %v3220_v5, %v163_v30  ;;  %v451_v41 = vadd.f32 %v419_v54, %v379_v58  ;;  %v52_v31 = vld [vmem:[#allocation4 + $0x58] sm:$0xff] }
  0x5c   :  { %v299_v21 = vadd.f32 %v267_v17, %v195_v13  ;;  %v411_v14 = vmul.f32 %v3191_v49, %v3286_v0  ;;  %v483_v10 = vmul.f32 %v3202_v35, %v75_v60  ;;  %v643_v62 = vadd.f32 %v611_v52, %v571_v11  ;;  %v148_v54 = vld [vmem:[#allocation4 + $0x358] sm:$0xff] }
  0x5d   :  { %4797 = vst [vmem:[#allocation21_spill] sm:$0xff] %v3322_v9  ;;  %v755_v7 = vmul.f32 0.5, %v3322_v9  ;;  %v188_v42 = vmul.f32 %v4789_v32, %v108_v50  ;;  %v260_v51 = vmul.f32 %v4790_v16, %v116_v4  ;;  %v523_v38 = vadd.f32 %v491_v43, %v451_v41  ;;  %v60_v36 = vld [vmem:[#allocation4 + $0x98] sm:$0xff] }
  0x5e   :  { %v371_v57 = vadd.f32 %v339_v12, %v299_v21  ;;  %v555_v30 = vmul.f32 %v3209_v37, %v83_v47  ;;  %v332_v63 = vmul.f32 %v3058_v18, %v124_v28  ;;  %v3334_v0 = vadd.f32 %v683_v34, %v643_v62  ;;  %v156_v58 = vld [vmem:[#allocation4 + $0x398] sm:$0xff] }
  0x5f   :  { %797 = vadd.xlane.f32.xlu1 %v755_v7  ;;  %v627_v60 = vmul.f32 %v3213_v8, %v91_v61  ;;  %v292_v52 = vadd.f32 %v260_v51, %v188_v42  ;;  %v404_v39 = vmul.f32 %v3062_v19, %v132_v56  ;;  %v595_v29 = vadd.f32 %v563_v33, %v523_v38  ;;  %v68_v17 = vld [vmem:[#allocation4 + $0xd8] sm:$0xff] }
  0x60   :  { %4798 = vst [vmem:[#allocation13_spill] sm:$0xff] %v3334_v0  ;;  %v443_v13 = vadd.f32 %v411_v14, %v371_v57  ;;  %v699_v43 = vmul.f32 %v3220_v5, %v99_v53  ;;  %v476_v47 = vmul.f32 %v3072_v23, %v140_v22  ;;  %v747_v12 = vmul.f32 0.5, %v3334_v0  ;;  %v164_v11 = vld [vmem:[#allocation4 + $0x3d8] sm:$0xff] }
  0x61   :  { %v364_v34 = vadd.f32 %v332_v63, %v292_v52  ;;  %v76_v41 = vld [vmem:[#allocation4 + $0x118] sm:$0xff]  ;;  %v180_v61 = vmul.f32 %v4789_v32, %v44_v27  ;;  %v252_v21 = vmul.f32 %v4790_v16, %v52_v31  ;;  %v667_v7 = vadd.f32 %v635_v55, %v595_v29 }
  0x62   :  { %v515_v62 = vadd.f32 %v483_v10, %v443_v13  ;;  %v548_v33 = vmul.f32 %v3076_v24, %v148_v54  ;;  %v324_v14 = vmul.f32 %v3058_v18, %v60_v36  ;;  %781 = vadd.xlane.f32.xlu0 %v747_v12  ;;  %v620_v42 = vmul.f32 %v3080_v25, %v156_v58  ;;  %v84_v51 = vld [vmem:[#allocation4 + $0x158] sm:$0xff] }
  0x63   :  { %v436_v53 = vadd.f32 %v404_v39, %v364_v34  ;;  %v284_v38 = vadd.f32 %v252_v21, %v180_v61  ;;  %v396_v57 = vmul.f32 %v3062_v19, %v68_v17  ;;  %v3347_v63 = vadd.f32 %v707_v40, %v667_v7  ;;  %v92_v29 = vld [vmem:[#allocation4 + $0x198] sm:$0xff] }
  0x64   :  { %v587_v52 = vadd.f32 %v555_v30, %v515_v62  ;;  %v692_v0 = vmul.f32 %v3084_v26, %v164_v11  ;;  %v468_v55 = vmul.f32 %v3072_v23, %v76_v41  ;;  %v100_v13 = vld [vmem:[#allocation4 + $0x1d8] sm:$0xff]  ;;  %v204_v12 = vmul.f32 %v3179_v48, %v108_v50 }
  0x65   :  { %4799 = vst [vmem:[#allocation22_spill] sm:$0xff] %v3347_v63  ;;  %v508_v10 = vadd.f32 %v476_v47, %v436_v53  ;;  %v356_v59 = vadd.f32 %v324_v14, %v284_v38  ;;  %v276_v39 = vmul.f32 %v3182_v44, %v116_v4  ;;  %v771_v34 = vmul.f32 0.5, %v3347_v63 }
  0x66   :  { %v659_v61 = vadd.f32 %v627_v60, %v587_v52  ;;  %v540_v21 = vmul.f32 %v3076_v24, %v84_v51  ;;  %v348_v40 = vmul.f32 %v3187_v45, %v124_v28  ;;  %v420_v9 = vmul.f32 %v3191_v49, %v132_v56 }
  0x67   :  { %v580_v30 = vadd.f32 %v548_v33, %v508_v10  ;;  %v428_v7 = vadd.f32 %v396_v57, %v356_v59  ;;  %v308_v62 = vadd.f32 %v276_v39, %v204_v12  ;;  %829 = vadd.xlane.f32.xlu1 %v771_v34  ;;  %v612_v14 = vmul.f32 %v3080_v25, %v92_v29  ;;  %v109_v33 = vld [vmem:[#allocation4 + $0x220] sm:$0xff] }
  0x68   :  { %v3357_v47 = vadd.f32 %v699_v43, %v659_v61  ;;  %v684_v50 = vmul.f32 %v3084_v26, %v100_v13  ;;  %v492_v4 = vmul.f32 %v3202_v35, %v140_v22  ;;  %v196_v52 = vmul.f32 %v3179_v48, %v44_v27 }
  0x69   :  { %v652_v53 = vadd.f32 %v620_v42, %v580_v30  ;;  %v500_v60 = vadd.f32 %v468_v55, %v428_v7  ;;  %v380_v38 = vadd.f32 %v348_v40, %v308_v62  ;;  %v564_v59 = vmul.f32 %v3209_v37, %v148_v54  ;;  %v117_v42 = vld [vmem:[#allocation4 + $0x260] sm:$0xff] }
  0x6a   :  { %4800 = vst [vmem:[#allocation14_spill] sm:$0xff] %v3357_v47  ;;  %v763_v28 = vmul.f32 0.5, %v3357_v47  ;;  %v268_v56 = vmul.f32 %v3182_v44, %v52_v31  ;;  %v340_v43 = vmul.f32 %v3187_v45, %v60_v36  ;;  %v636_v22 = vmul.f32 %v3213_v8, %v156_v58  ;;  %v125_v55 = vld [vmem:[#allocation4 + $0x2a0] sm:$0xff] }
  0x6b   :  { %v3367_v57 = vadd.f32 %v692_v0, %v652_v53  ;;  %v572_v10 = vadd.f32 %v540_v21, %v500_v60  ;;  %v452_v12 = vadd.f32 %v420_v9, %v380_v38  ;;  %v708_v27 = vmul.f32 %v3220_v5, %v164_v11  ;;  %v133_v0 = vld [vmem:[#allocation4 + $0x2e0] sm:$0xff] }
  0x6c   :  { %813 = vadd.xlane.f32.xlu0 %v763_v28  ;;  %v300_v39 = vadd.f32 %v268_v56, %v196_v52  ;;  %v412_v34 = vmul.f32 %v3191_v49, %v68_v17  ;;  %v484_v54 = vmul.f32 %v3202_v35, %v76_v41  ;;  %v141_v40 = vld [vmem:[#allocation4 + $0x320] sm:$0xff]  ;;  %v189_v9 = vmul.f32 %v4789_v32, %v109_v33 }
  0x6d   :  { %4801 = vst [vmem:[#allocation15_spill] sm:$0xff] %v3367_v57  ;;  %v756_v31 = vmul.f32 0.5, %v3367_v57  ;;  %v644_v36 = vadd.f32 %v612_v14, %v572_v10  ;;  %v524_v61 = vadd.f32 %v492_v4, %v452_v12  ;;  %v556_v58 = vmul.f32 %v3209_v37, %v84_v51  ;;  %v45_v7 = vld [vmem:[#allocation4 + $0x20] sm:$0xff] }
  0x6e   :  { %v372_v21 = vadd.f32 %v340_v43, %v300_v39  ;;  %v261_v30 = vmul.f32 %v4790_v16, %v117_v42  ;;  %v333_v11 = vmul.f32 %v3058_v18, %v125_v55  ;;  %v53_v62 = vld [vmem:[#allocation4 + $0x60] sm:$0xff]  ;;  %v628_v14 = vmul.f32 %v3213_v8, %v92_v29 }
  0x6f   :  { %799 = vadd.xlane.f32.xlu1 %v756_v31  ;;  %v3378_v17 = vadd.f32 %v684_v50, %v644_v36  ;;  %v596_v41 = vadd.f32 %v564_v59, %v524_v61  ;;  %v700_v4 = vmul.f32 %v3220_v5, %v100_v13  ;;  %v149_v53 = vld [vmem:[#allocation4 + $0x360] sm:$0xff]  ;;  %v405_v51 = vmul.f32 %v3062_v19, %v133_v0 }
  0x70   :  { %v61_v60 = vld [vmem:[#allocation4 + $0xa0] sm:$0xff]  ;;  %v444_v38 = vadd.f32 %v412_v34, %v372_v21  ;;  %v293_v28 = vadd.f32 %v261_v30, %v189_v9  ;;  %v477_v56 = vmul.f32 %v3072_v23, %v141_v40  ;;  %v181_v59 = vmul.f32 %v4789_v32, %v45_v7 }
  0x71   :  { %4802 = vst [vmem:[#allocation16_spill] sm:$0xff] %v3378_v17  ;;  %v157_v52 = vld [vmem:[#allocation4 + $0x3a0] sm:$0xff]  ;;  %v748_v10 = vmul.f32 0.5, %v3378_v17  ;;  %v668_v12 = vadd.f32 %v636_v22, %v596_v41  ;;  %v253_v29 = vmul.f32 %v4790_v16, %v53_v62  ;;  %v549_v34 = vmul.f32 %v3076_v24, %v149_v53 }
  0x72   :  { %v69_v43 = vld [vmem:[#allocation4 + $0xe0] sm:$0xff]  ;;  %v516_v13 = vadd.f32 %v484_v54, %v444_v38  ;;  %v365_v31 = vadd.f32 %v333_v11, %v293_v28  ;;  %v325_v36 = vmul.f32 %v3058_v18, %v61_v60  ;;  %v621_v9 = vmul.f32 %v3080_v25, %v157_v52 }
  0x73   :  { %v165_v50 = vld [vmem:[#allocation4 + $0x3e0] sm:$0xff]  ;;  %783 = vadd.xlane.f32.xlu0 %v748_v10  ;;  %v3389_v61 = vadd.f32 %v708_v27, %v668_v12  ;;  %v285_v30 = vadd.f32 %v253_v29, %v181_v59  ;;  %v397_v22 = vmul.f32 %v3062_v19, %v69_v43  ;;  %v205_v27 = vmul.f32 %v3179_v48, %v109_v33 }
  0x74   :  { %v77_v39 = vld [vmem:[#allocation4 + $0x120] sm:$0xff]  ;;  %v588_v41 = vadd.f32 %v556_v58, %v516_v13  ;;  %v437_v47 = vadd.f32 %v405_v51, %v365_v31  ;;  %v693_v17 = vmul.f32 %v3084_v26, %v165_v50  ;;  %v277_v10 = vmul.f32 %v3182_v44, %v117_v42 }
  0x75   :  { %4803 = vst [vmem:[#allocation17_spill] sm:$0xff] %v3389_v61  ;;  %v85_v21 = vld [vmem:[#allocation4 + $0x160] sm:$0xff]  ;;  %v469_v54 = vmul.f32 %v3072_v23, %v77_v39  ;;  %v772_v11 = vmul.f32 0.5, %v3389_v61  ;;  %v357_v28 = vadd.f32 %v325_v36, %v285_v30  ;;  %v349_v58 = vmul.f32 %v3187_v45, %v125_v55 }
  0x76   :  { %v93_v57 = vld [vmem:[#allocation4 + $0x1a0] sm:$0xff]  ;;  %v660_v12 = vadd.f32 %v628_v14, %v588_v41  ;;  %v509_v63 = vadd.f32 %v477_v56, %v437_v47  ;;  %v541_v59 = vmul.f32 %v3076_v24, %v85_v21  ;;  %v309_v13 = vadd.f32 %v277_v10, %v205_v27 }
  0x77   :  { %v101_v38 = vld [vmem:[#allocation4 + $0x1e0] sm:$0xff]  ;;  %831 = vadd.xlane.f32.xlu1 %v772_v11  ;;  %v429_v51 = vadd.f32 %v397_v22, %v357_v28  ;;  %v613_v29 = vmul.f32 %v3080_v25, %v93_v57  ;;  %v421_v31 = vmul.f32 %v3191_v49, %v133_v0  ;;  %v493_v42 = vmul.f32 %v3202_v35, %v141_v40  ;;  %v118_v40 = vld [vmem:[#allocation4 + $0x268] sm:$0xff] }
  0x78   :  { %v3402_v61 = vadd.f32 %v700_v4, %v660_v12  ;;  %v581_v36 = vadd.f32 %v549_v34, %v509_v63  ;;  %v685_v33 = vmul.f32 %v3084_v26, %v101_v38  ;;  %v381_v47 = vadd.f32 %v349_v58, %v309_v13  ;;  %v110_v4 = vld [vmem:[#allocation4 + $0x228] sm:$0xff] }
  0x79   :  { %v501_v14 = vadd.f32 %v469_v54, %v429_v51  ;;  %v197_v56 = vmul.f32 %v3179_v48, %v45_v7  ;;  %v269_v55 = vmul.f32 %v3182_v44, %v53_v62  ;;  %v565_v41 = vmul.f32 %v3209_v37, %v149_v53  ;;  %v126_v54 = vld [vmem:[#allocation4 + $0x2a8] sm:$0xff] }
  0x7a   :  { %4804 = vst [vmem:[#allocation18_spill] sm:$0xff] %v3402_v61  ;;  %v764_v30 = vmul.f32 0.5, %v3402_v61  ;;  %v653_v22 = vadd.f32 %v621_v9, %v581_v36  ;;  %v341_v0 = vmul.f32 %v3187_v45, %v61_v60  ;;  %v453_v63 = vadd.f32 %v421_v31, %v381_v47  ;;  %v134_v12 = vld [vmem:[#allocation4 + $0x2e8] sm:$0xff] }
  0x7b   :  { %v573_v11 = vadd.f32 %v541_v59, %v501_v14  ;;  %v301_v34 = vadd.f32 %v269_v55, %v197_v56  ;;  %v413_v28 = vmul.f32 %v3191_v49, %v69_v43  ;;  %v637_v7 = vmul.f32 %v3213_v8, %v157_v52  ;;  %v142_v59 = vld [vmem:[#allocation4 + $0x328] sm:$0xff] }
  0x7c   :  { %815 = vadd.xlane.f32.xlu0 %v764_v30  ;;  %v3412_v27 = vadd.f32 %v693_v17, %v653_v22  ;;  %v709_v62 = vmul.f32 %v3220_v5, %v165_v50  ;;  %v485_v9 = vmul.f32 %v3202_v35, %v77_v39  ;;  %v525_v10 = vadd.f32 %v493_v42, %v453_v63  ;;  %v46_v52 = vld [vmem:[#allocation4 + $0x28] sm:$0xff] }
  0x7d   :  { %v645_v53 = vadd.f32 %v613_v29, %v573_v11  ;;  %v373_v60 = vadd.f32 %v341_v0, %v301_v34  ;;  %v190_v58 = vmul.f32 %v4789_v32, %v110_v4  ;;  %v557_v51 = vmul.f32 %v3209_v37, %v85_v21  ;;  %v150_v36 = vld [vmem:[#allocation4 + $0x368] sm:$0xff] }
  0x7e   :  { %4805 = vst [vmem:[#allocation19_spill] sm:$0xff] %v3412_v27  ;;  %v757_v43 = vmul.f32 0.5, %v3412_v27  ;;  %v262_v17 = vmul.f32 %v4790_v16, %v118_v40  ;;  %v334_v13 = vmul.f32 %v3058_v18, %v126_v54  ;;  %v597_v50 = vadd.f32 %v565_v41, %v525_v10  ;;  %v54_v42 = vld [vmem:[#allocation4 + $0x68] sm:$0xff] }
  0x7f   :  { %v3422_v31 = vadd.f32 %v685_v33, %v645_v53  ;;  %v445_v39 = vadd.f32 %v413_v28, %v373_v60  ;;  %v629_v29 = vmul.f32 %v3213_v8, %v93_v57  ;;  %v62_v14 = vld [vmem:[#allocation4 + $0xa8] sm:$0xff]  ;;  %v701_v47 = vmul.f32 %v3220_v5, %v101_v38 }
  0x80   :  { %801 = vadd.xlane.f32.xlu1 %v757_v43  ;;  %v158_v56 = vld [vmem:[#allocation4 + $0x3a8] sm:$0xff]  ;;  %v294_v21 = vadd.f32 %v262_v17, %v190_v58  ;;  %v406_v30 = vmul.f32 %v3062_v19, %v134_v12  ;;  %v478_v22 = vmul.f32 %v3072_v23, %v142_v59  ;;  %v669_v0 = vadd.f32 %v637_v7, %v597_v50 }
  0x81   :  { %4806 = vst [vmem:[#allocation27_spill] sm:$0xff] %v3422_v31  ;;  %v166_v55 = vld [vmem:[#allocation4 + $0x3e8] sm:$0xff]  ;;  %v749_v33 = vmul.f32 0.5, %v3422_v31  ;;  %v517_v41 = vadd.f32 %v485_v9, %v445_v39  ;;  %v182_v57 = vmul.f32 %v4789_v32, %v46_v52  ;;  %v550_v28 = vmul.f32 %v3076_v24, %v150_v36 }
  0x82   :  { %v70_v11 = vld [vmem:[#allocation4 + $0xe8] sm:$0xff]  ;;  %v366_v34 = vadd.f32 %v334_v13, %v294_v21  ;;  %v254_v38 = vmul.f32 %v4790_v16, %v54_v42  ;;  %v326_v53 = vmul.f32 %v3058_v18, %v62_v14  ;;  %v3433_v10 = vadd.f32 %v709_v62, %v669_v0 }
  0x83   :  { %v78_v63 = vld [vmem:[#allocation4 + $0x128] sm:$0xff]  ;;  %785 = vadd.xlane.f32.xlu0 %v749_v33  ;;  %v589_v60 = vadd.f32 %v557_v51, %v517_v41  ;;  %v622_v58 = vmul.f32 %v3080_v25, %v158_v56  ;;  %v694_v7 = vmul.f32 %v3084_v26, %v166_v55  ;;  %v398_v13 = vmul.f32 %v3062_v19, %v70_v11 }
  0x84   :  { %4807 = vst [vmem:[#allocation28_spill] sm:$0xff] %v3433_v10  ;;  %v86_v9 = vld [vmem:[#allocation4 + $0x168] sm:$0xff]  ;;  %v438_v43 = vadd.f32 %v406_v30, %v366_v34  ;;  %v286_v50 = vadd.f32 %v254_v38, %v182_v57  ;;  %v470_v39 = vmul.f32 %v3072_v23, %v78_v63  ;;  %v773_v21 = vmul.f32 0.5, %v3433_v10 }
  0x85   :  { %v94_v17 = vld [vmem:[#allocation4 + $0x1a8] sm:$0xff]  ;;  %v661_v61 = vadd.f32 %v629_v29, %v589_v60  ;;  %v206_v62 = vmul.f32 %v3179_v48, %v110_v4  ;;  %v278_v51 = vmul.f32 %v3182_v44, %v118_v40  ;;  %v542_v41 = vmul.f32 %v3076_v24, %v86_v9 }
  0x86   :  { %v102_v31 = vld [vmem:[#allocation4 + $0x1e8] sm:$0xff]  ;;  %v510_v33 = vadd.f32 %v478_v22, %v438_v43  ;;  %v358_v0 = vadd.f32 %v326_v53, %v286_v50  ;;  %v350_v30 = vmul.f32 %v3187_v45, %v126_v54  ;;  %833 = vadd.xlane.f32.xlu1 %v773_v21  ;;  %v614_v34 = vmul.f32 %v3080_v25, %v94_v17 }
  0x87   :  { %v3444_v57 = vadd.f32 %v701_v47, %v661_v61  ;;  %v310_v38 = vadd.f32 %v278_v51, %v206_v62  ;;  %v422_v10 = vmul.f32 %v3191_v49, %v134_v12  ;;  %v686_v4 = vmul.f32 %v3084_v26, %v102_v31  ;;  %v111_v12 = vld [vmem:[#allocation4 + $0x230] sm:$0xff] }
  0x88   :  { %v582_v29 = vadd.f32 %v550_v28, %v510_v33  ;;  %v430_v60 = vadd.f32 %v398_v13, %v358_v0  ;;  %v494_v40 = vmul.f32 %v3202_v35, %v142_v59  ;;  %v198_v43 = vmul.f32 %v3179_v48, %v46_v52  ;;  %v3455_v28 = vld [vmem:[#allocation4 + $0x270] sm:$0xff] }
  0x89   :  { %4808 = vst [vmem:[#allocation29_spill] sm:$0xff] %v3444_v57  ;;  %v765_v22 = vmul.f32 0.5, %v3444_v57  ;;  %v382_v53 = vadd.f32 %v350_v30, %v310_v38  ;;  %v270_v54 = vmul.f32 %v3182_v44, %v54_v42  ;;  %v566_v50 = vmul.f32 %v3209_v37, %v150_v36  ;;  %v127_v33 = vld [vmem:[#allocation4 + $0x2b0] sm:$0xff] }
  0x8a   :  { %v654_v61 = vadd.f32 %v622_v58, %v582_v29  ;;  %v502_v47 = vadd.f32 %v470_v39, %v430_v60  ;;  %v342_v21 = vmul.f32 %v3187_v45, %v62_v14  ;;  %v638_v59 = vmul.f32 %v3213_v8, %v158_v56  ;;  %v135_v39 = vld [vmem:[#allocation4 + $0x2f0] sm:$0xff] }
  0x8b   :  { %817 = vadd.xlane.f32.xlu0 %v765_v22  ;;  %v454_v13 = vadd.f32 %v422_v10, %v382_v53  ;;  %v302_v62 = vadd.f32 %v270_v54, %v198_v43  ;;  %v414_v51 = vmul.f32 %v3191_v49, %v70_v11  ;;  %v710_v58 = vmul.f32 %v3220_v5, %v166_v55  ;;  %v143_v30 = vld [vmem:[#allocation4 + $0x330] sm:$0xff] }
  0x8c   :  { %v3459_v52 = vadd.f32 %v694_v7, %v654_v61  ;;  %v574_v42 = vadd.f32 %v542_v41, %v502_v47  ;;  %v486_v36 = vmul.f32 %v3202_v35, %v78_v63  ;;  %v191_v38 = vmul.f32 %v4789_v32, %v111_v12  ;;  %v47_v29 = vld [vmem:[#allocation4 + $0x30] sm:$0xff] }
  0x8d   :  { %v526_v14 = vadd.f32 %v494_v40, %v454_v13  ;;  %v374_v0 = vadd.f32 %v342_v21, %v302_v62  ;;  %v263_v56 = vmul.f32 %v4790_v16, %v3455_v28  ;;  %v558_v7 = vmul.f32 %v3209_v37, %v86_v9  ;;  %v151_v63 = vld [vmem:[#allocation4 + $0x370] sm:$0xff] }
  0x8e   :  { %4809 = vst [vmem:[#allocation30_spill] sm:$0xff] %v3459_v52  ;;  %v758_v10 = vmul.f32 0.5, %v3459_v52  ;;  %v646_v11 = vadd.f32 %v614_v34, %v574_v42  ;;  %v335_v41 = vmul.f32 %v3058_v18, %v127_v33  ;;  %v407_v40 = vmul.f32 %v3062_v19, %v135_v39  ;;  %v55_v53 = vld [vmem:[#allocation4 + $0x70] sm:$0xff] }
  0x8f   :  { %v598_v55 = vadd.f32 %v566_v50, %v526_v14  ;;  %v446_v60 = vadd.f32 %v414_v51, %v374_v0  ;;  %v295_v22 = vadd.f32 %v263_v56, %v191_v38  ;;  %v63_v43 = vld [vmem:[#allocation4 + $0xb0] sm:$0xff]  ;;  %v630_v61 = vmul.f32 %v3213_v8, %v94_v17 }
  0x90   :  { %803 = vadd.xlane.f32.xlu1 %v758_v10  ;;  %v3470_v54 = vadd.f32 %v686_v4, %v646_v11  ;;  %v702_v34 = vmul.f32 %v3220_v5, %v102_v31  ;;  %v159_v47 = vld [vmem:[#allocation4 + $0x3b0] sm:$0xff]  ;;  %v479_v9 = vmul.f32 %v3072_v23, %v143_v30  ;;  %v183_v14 = vmul.f32 %v4789_v32, %v47_v29 }
  0x91   :  { %v670_v21 = vadd.f32 %v638_v59, %v598_v55  ;;  %v518_v13 = vadd.f32 %v486_v36, %v446_v60  ;;  %v167_v50 = vld [vmem:[#allocation4 + $0x3f0] sm:$0xff]  ;;  %v367_v62 = vadd.f32 %v335_v41, %v295_v22  ;;  %v551_v4 = vmul.f32 %v3076_v24, %v151_v63 }
  0x92   :  { %4810 = vst [vmem:[#allocation31_spill] sm:$0xff] %v3470_v54  ;;  %v71_v51 = vld [vmem:[#allocation4 + $0xf0] sm:$0xff]  ;;  %v750_v0 = vmul.f32 0.5, %v3470_v54  ;;  %v255_v38 = vmul.f32 %v4790_v16, %v55_v53  ;;  %v327_v17 = vmul.f32 %v3058_v18, %v63_v43  ;;  %v623_v59 = vmul.f32 %v3080_v25, %v159_v47 }
  0x93   :  { %v79_v42 = vld [vmem:[#allocation4 + $0x130] sm:$0xff]  ;;  %v3480_v31 = vadd.f32 %v710_v58, %v670_v21  ;;  %v590_v56 = vadd.f32 %v558_v7, %v518_v13  ;;  %v439_v10 = vadd.f32 %v407_v40, %v367_v62  ;;  %v695_v11 = vmul.f32 %v3084_v26, %v167_v50 }
  0x94   :  { %v87_v36 = vld [vmem:[#allocation4 + $0x170] sm:$0xff]  ;;  %787 = vadd.xlane.f32.xlu0 %v750_v0  ;;  %v287_v60 = vadd.f32 %v255_v38, %v183_v14  ;;  %v399_v22 = vmul.f32 %v3062_v19, %v71_v51  ;;  %v471_v57 = vmul.f32 %v3072_v23, %v79_v42  ;;  %v207_v7 = vmul.f32 %v3179_v48, %v111_v12 }
  0x95   :  { %4811 = vst [vmem:[#allocation32_spill] sm:$0xff] %v3480_v31  ;;  %v95_v41 = vld [vmem:[#allocation4 + $0x1b0] sm:$0xff]  ;;  %v774_v54 = vmul.f32 0.5, %v3480_v31  ;;  %v662_v52 = vadd.f32 %v630_v61, %v590_v56  ;;  %v511_v58 = vadd.f32 %v479_v9, %v439_v10  ;;  %v543_v21 = vmul.f32 %v3076_v24, %v87_v36 }
  0x96   :  { %v103_v55 = vld [vmem:[#allocation4 + $0x1f0] sm:$0xff]  ;;  %v359_v40 = vadd.f32 %v327_v17, %v287_v60  ;;  %v279_v13 = vmul.f32 %v3182_v44, %v3455_v28  ;;  %v351_v62 = vmul.f32 %v3187_v45, %v127_v33  ;;  %v615_v38 = vmul.f32 %v3080_v25, %v95_v41  ;;  %v112_v60 = vld [vmem:[#allocation4 + $0x238] sm:$0xff] }
  0x97   :  { %835 = vadd.xlane.f32.xlu1 %v774_v54  ;;  %v3492_v14 = vadd.f32 %v702_v34, %v662_v52  ;;  %v583_v0 = vadd.f32 %v551_v4, %v511_v58  ;;  %v687_v31 = vmul.f32 %v3084_v26, %v103_v55  ;;  %v423_v12 = vmul.f32 %v3191_v49, %v135_v39 }
  0x98   :  { %v431_v61 = vadd.f32 %v399_v22, %v359_v40  ;;  %v311_v9 = vadd.f32 %v279_v13, %v207_v7  ;;  %v495_v17 = vmul.f32 %v3202_v35, %v143_v30  ;;  %v199_v28 = vmul.f32 %v3179_v48, %v47_v29  ;;  %v120_v22 = vld [vmem:[#allocation4 + $0x278] sm:$0xff] }
  0x99   :  { %4812 = vst [vmem:[#allocation33_spill] sm:$0xff] %v3492_v14  ;;  %v766_v56 = vmul.f32 0.5, %v3492_v14  ;;  %v655_v10 = vadd.f32 %v623_v59, %v583_v0  ;;  %v271_v33 = vmul.f32 %v3182_v44, %v55_v53  ;;  %v567_v34 = vmul.f32 %v3209_v37, %v151_v63  ;;  %v128_v7 = vld [vmem:[#allocation4 + $0x2b8] sm:$0xff] }
  0x9a   :  { %v503_v52 = vadd.f32 %v471_v57, %v431_v61  ;;  %v383_v54 = vadd.f32 %v351_v62, %v311_v9  ;;  %v343_v4 = vmul.f32 %v3187_v45, %v63_v43  ;;  %v639_v39 = vmul.f32 %v3213_v8, %v159_v47  ;;  %v136_v63 = vld [vmem:[#allocation4 + $0x2f8] sm:$0xff] }
  0x9b   :  { %819 = vadd.xlane.f32.xlu0 %v766_v56  ;;  %v3503_v58 = vadd.f32 %v695_v11, %v655_v10  ;;  %v303_v30 = vadd.f32 %v271_v33, %v199_v28  ;;  %v415_v59 = vmul.f32 %v3191_v49, %v71_v51  ;;  %v711_v57 = vmul.f32 %v3220_v5, %v167_v50  ;;  %v3510_v62 = vld [vmem:[#allocation4 + $0x338] sm:$0xff] }
  0x9c   :  { %v575_v29 = vadd.f32 %v543_v21, %v503_v52  ;;  %v455_v40 = vadd.f32 %v423_v12, %v383_v54  ;;  %v487_v53 = vmul.f32 %v3202_v35, %v79_v42  ;;  %v192_v11 = vmul.f32 %v4789_v32, %v112_v60  ;;  %v48_v9 = vld [vmem:[#allocation4 + $0x38] sm:$0xff] }
  0x9d   :  { %4813 = vst [vmem:[#allocation34_spill] sm:$0xff] %v3503_v58  ;;  %v759_v43 = vmul.f32 0.5, %v3503_v58  ;;  %v375_v13 = vadd.f32 %v343_v4, %v303_v30  ;;  %v264_v47 = vmul.f32 %v4790_v16, %v120_v22  ;;  %v559_v51 = vmul.f32 %v3209_v37, %v87_v36  ;;  %v56_v50 = vld [vmem:[#allocation4 + $0x78] sm:$0xff] }
  0x9e   :  { %v647_v0 = vadd.f32 %v615_v38, %v575_v29  ;;  %v527_v61 = vadd.f32 %v495_v17, %v455_v40  ;;  %v336_v21 = vmul.f32 %v3058_v18, %v128_v7  ;;  %v631_v12 = vmul.f32 %v3213_v8, %v95_v41  ;;  %v152_v56 = vld [vmem:[#allocation4 + $0x378] sm:$0xff] }
  0x9f   :  { %805 = vadd.xlane.f32.xlu1 %v759_v43  ;;  %v447_v42 = vadd.f32 %v415_v59, %v375_v13  ;;  %v296_v10 = vadd.f32 %v264_v47, %v192_v11  ;;  %v408_v28 = vmul.f32 %v3062_v19, %v136_v63  ;;  %v64_v33 = vld [vmem:[#allocation4 + $0xb8] sm:$0xff]  ;;  %v703_v38 = vmul.f32 %v3220_v5, %v103_v55 }
  0xa0   :  { %v3518_v52 = vadd.f32 %v687_v31, %v647_v0  ;;  %v599_v54 = vadd.f32 %v567_v34, %v527_v61  ;;  %v480_v36 = vmul.f32 %v3072_v23, %v3510_v62  ;;  %v72_v17 = vld [vmem:[#allocation4 + $0xf8] sm:$0xff]  ;;  %v184_v41 = vmul.f32 %v4789_v32, %v48_v9 }
  0xa1   :  { %v519_v4 = vadd.f32 %v487_v53, %v447_v42  ;;  %v160_v30 = vld [vmem:[#allocation4 + $0x3b8] sm:$0xff]  ;;  %v368_v29 = vadd.f32 %v336_v21, %v296_v10  ;;  %v256_v40 = vmul.f32 %v4790_v16, %v56_v50  ;;  %v552_v31 = vmul.f32 %v3076_v24, %v152_v56 }
  0xa2   :  { %4814 = vst [vmem:[#allocation35_spill] sm:$0xff] %v3518_v52  ;;  %v80_v59 = vld [vmem:[#allocation4 + $0x138] sm:$0xff]  ;;  %v751_v43 = vmul.f32 0.5, %v3518_v52  ;;  %v671_v13 = vadd.f32 %v639_v39, %v599_v54  ;;  %v328_v34 = vmul.f32 %v3058_v18, %v64_v33  ;;  %v400_v53 = vmul.f32 %v3062_v19, %v72_v17 }
  0xa3   :  { %v591_v55 = vadd.f32 %v559_v51, %v519_v4  ;;  %v168_v11 = vld [vmem:[#allocation4 + $0x3f8] sm:$0xff]  ;;  %v440_v47 = vadd.f32 %v408_v28, %v368_v29  ;;  %v288_v0 = vadd.f32 %v256_v40, %v184_v41  ;;  %v624_v32 = vmul.f32 %v3080_v25, %v160_v30 }
  0xa4   :  { %789 = vadd.xlane.f32.xlu0 %v751_v43  ;;  %v3529_v61 = vadd.f32 %v711_v57, %v671_v13  ;;  %v88_v21 = vld [vmem:[#allocation4 + $0x178] sm:$0xff]  ;;  %v472_v16 = vmul.f32 %v3072_v23, %v80_v59  ;;  %v208_v18 = vmul.f32 %v3179_v48, %v112_v60  ;;  %v696_v28 = vmul.f32 %v3084_v26, %v168_v11 }
  0xa5   :  { %v663_v42 = vadd.f32 %v631_v12, %v591_v55  ;;  %v512_v39 = vadd.f32 %v480_v36, %v440_v47  ;;  %v96_v10 = vld [vmem:[#allocation4 + $0x1b8] sm:$0xff]  ;;  %v360_v54 = vadd.f32 %v328_v34, %v288_v0  ;;  %v280_v19 = vmul.f32 %v3182_v44, %v120_v22 }
  0xa6   :  { %4815 = vst [vmem:[#allocation36_spill] sm:$0xff] %v3529_v61  ;;  %v775_v51 = vmul.f32 0.5, %v3529_v61  ;;  %v352_v57 = vmul.f32 %v3187_v45, %v128_v7  ;;  %v544_v23 = vmul.f32 %v3076_v24, %v88_v21  ;;  %v104_v12 = vld [vmem:[#allocation4 + $0x1f8] sm:$0xff]  ;;  %v616_v36 = vmul.f32 %v3080_v25, %v96_v10 }
  0xa7   :  { %v3538_v4 = vadd.f32 %v703_v38, %v663_v42  ;;  %v584_v29 = vadd.f32 %v552_v31, %v512_v39  ;;  %v432_v41 = vadd.f32 %v400_v53, %v360_v54  ;;  %v312_v40 = vadd.f32 %v280_v19, %v208_v18 }
  0xa8   :  { %837 = vadd.xlane.f32.xlu1 %v775_v51  ;;  %v424_v60 = vmul.f32 %v3191_v49, %v136_v63  ;;  %v200_v22 = vmul.f32 %v3179_v48, %v48_v9  ;;  %v496_v38 = vmul.f32 %v3202_v35, %v3510_v62  ;;  %v272_v31 = vmul.f32 %v3182_v44, %v56_v50 }
  0xa9   :  { %4816 = vst [vmem:[#allocation37_spill] sm:$0xff] %v3538_v4  ;;  %v767_v43 = vmul.f32 0.5, %v3538_v4  ;;  %v656_v13 = vadd.f32 %v624_v32, %v584_v29  ;;  %v504_v34 = vadd.f32 %v472_v16, %v432_v41  ;;  %v384_v7 = vadd.f32 %v352_v57, %v312_v40 }
  0xaa   :  { %v344_v24 = vmul.f32 %v3187_v45, %v64_v33  ;;  %v688_v63 = vmul.f32 %v3084_v26, %v104_v12  ;;  %v568_v0 = vmul.f32 %v3209_v37, %v152_v56  ;;  %v304_v53 = vadd.f32 %v272_v31, %v200_v22 }
  0xab   :  { %821 = vadd.xlane.f32.xlu0 %v767_v43  ;;  %v3549_v55 = vadd.f32 %v696_v28, %v656_v13  ;;  %v576_v25 = vadd.f32 %v544_v23, %v504_v34  ;;  %v456_v47 = vadd.f32 %v424_v60, %v384_v7  ;;  %v416_v48 = vmul.f32 %v3191_v49, %v72_v17 }
  0xac   :  { %v640_v44 = vmul.f32 %v3213_v8, %v160_v30  ;;  %v376_v50 = vadd.f32 %v344_v24, %v304_v53  ;;  %v488_v45 = vmul.f32 %v3202_v35, %v80_v59  ;;  %v712_v26 = vmul.f32 %v3220_v5, %v168_v11 }
  0xad   :  { %4817 = vst [vmem:[#allocation38_spill] sm:$0xff] %v3549_v55  ;;  %v760_v9 = vmul.f32 0.5, %v3549_v55  ;;  %v648_v32 = vadd.f32 %v616_v36, %v576_v25  ;;  %v528_v62 = vadd.f32 %v496_v38, %v456_v47  ;;  %v560_v56 = vmul.f32 %v3209_v37, %v88_v21 }
  0xae   :  { %v448_v42 = vadd.f32 %v416_v48, %v376_v50  ;;  %v632_v54 = vmul.f32 %v3213_v8, %v96_v10  ;;  %v704_v35 = vmul.f32 %v3220_v5, %v104_v12  ;;  %v4821_v25 = vlaneseq }
  0xaf   :  { %807 = vadd.xlane.f32.xlu1 %v760_v9  ;;  %v3557_v33 = vadd.f32 %v688_v63, %v648_v32  ;;  %v600_v16 = vadd.f32 %v568_v0, %v528_v62  ;;  %vm2813_vm14 = vcmask 917312   ;;  %vm2820_vm15 = vcmask 982912  }
  0xb0   :  { %v520_v39 = vadd.f32 %v488_v45, %v448_v42  ;;  %v3615_v63 = vand.u32 127, %v4821_v25 }
  0xb1   :  { %4818 = vst [vmem:[#allocation39_spill] sm:$0xff] %v3557_v33  ;;  %v752_v49 = vmul.f32 0.5, %v3557_v33  ;;  %v672_v17 = vadd.f32 %v640_v44, %v600_v16 }
  0xb2   :  { %v592_v18 = vadd.f32 %v560_v56, %v520_v39  ;;  %4822 = vst [vmem:[#allocation42_spill] sm:$0xff] %v3615_v63  ;;  %v911_v0 = vadd.s32 4294967288, %v3615_v63  ;;  %v918_v48 = vadd.s32 4294967280, %v3615_v63  ;;  %v925_v62 = vadd.s32 4294967272, %v3615_v63 }
  0xb3   :  { %791 = vadd.xlane.f32.xlu0 %v752_v49  ;;  %v3563_v30 = vadd.f32 %v712_v26, %v672_v17  ;;  %v932_v44 = vadd.s32 4294967264, %v3615_v63  ;;  %v939_v16 = vadd.s32 4294967256, %v3615_v63  ;;  %v946_v26 = vadd.s32 4294967248, %v3615_v63 }
  0xb4   :  { %v664_v51 = vadd.f32 %v632_v54, %v592_v18  ;;  %v3624_v9 = vsub.s32 %v911_v0, %v3026_v1  ;;  %v3638_v42 = vsub.s32 %v3615_v63, %v3026_v1  ;;  %v953_v49 = vadd.s32 4294967240, %v3615_v63 }
  0xb5   :  { %4819 = vst [vmem:[#allocation40_spill] sm:$0xff] %v3563_v30  ;;  %v776_v59 = vmul.f32 0.5, %v3563_v30  ;;  %v3647_v54 = vsub.s32 %v918_v48, %v3026_v1  ;;  %v3650_v18 = vsub.s32 %v925_v62, %v3026_v1  ;;  %v3661_v25 = vsub.s32 %v939_v16, %v3026_v1 }
  0xb6   :  { %v3567_v11 = vadd.f32 %v704_v35, %v664_v51  ;;  %4823 = vst [vmem:[#allocation43_spill] sm:$0xff] %v3624_v9  ;;  %4824 = vst [vmem:[#allocation44_spill] sm:$0xff] %v3638_v42  ;;  %v3653_v35 = vsub.s32 %v932_v44, %v3026_v1  ;;  %v3664_v0 = vsub.s32 %v946_v26, %v3026_v1 }
  0xb7   :  { %839 = vadd.xlane.f32.xlu1 %v776_v59  ;;  %4825 = vst [vmem:[#allocation45_spill] sm:$0xff] %v3647_v54  ;;  %4826 = vst [vmem:[#allocation46_spill] sm:$0xff] %v3650_v18  ;;  %v3672_v44 = vsub.s32 %v953_v49, %v3026_v1 }
  0xb8   :  { %4820 = vst [vmem:[#allocation41_spill] sm:$0xff] %v3567_v11  ;;  %v768_v37 = vmul.f32 0.5, %v3567_v11  ;;  %4828 = vst [vmem:[#allocation48_spill] sm:$0xff] %v3661_v25 }
  0xb9   :  { %4829 = vst [vmem:[#allocation49_spill] sm:$0xff] %v3664_v0  ;;  %4830 = vst [vmem:[#allocation50_spill] sm:$0xff] %v3672_v44 }
  0xba   :  { %823 = vadd.xlane.f32.xlu0 %v768_v37 }
  0xcd   :  { %v3570_v21 = vpop.xlane.xlu1 %793 }
  0xce   :  { %v849_v56 = vmul.f32 %v3570_v21, %v3570_v21 }
  0xcf   :  { %v3572_v28 = vpop.xlane.xlu0 %777 }
  0xd0   :  { %v841_v17 = vmul.f32 %v3572_v28, %v3572_v28  ;;  %v963_v48 = vrot.slane %v849_v56, %v3638_v42 }
  0xd2   :  { %v3574_v8 = vpop.xlane.xlu1 %795 }
  0xd3   :  { %v850_v32 = vmul.f32 %v3574_v8, %v3574_v8 }
  0xd5   :  { %v3576_v10 = vpop.xlane.xlu0 %779  ;;  %v967_v39 = vrot.slane %v850_v32, %v3624_v9 }
  0xd6   :  { %v842_v45 = vmul.f32 %v3576_v10, %v3576_v10 }
  0xd7   :  { %v968_v63 = vsel %vm916_vm0, %v967_v39, %v963_v48 }
  0xd8   :  { %v915_v51 = vrot.slane %v842_v45, %v3624_v9  ;;  %v910_v45 = vrot.slane %v841_v17, %v3638_v42 }
  0xda   :  { %v917_v11 = vsel %vm916_vm0, %v915_v51, %v910_v45 }
  0xdb   :  { %v3578_v19 = vpop.xlane.xlu1 %811 }
  0xdc   :  { %v3677_v16 = vmul.f32 %v3578_v19, %v3578_v19 }
  0xde   :  { %v1006_v45 = vrot.slane %v3677_v16, %v3624_v9 }
  0xe2   :  { %v3580_v5 = vpop.xlane.xlu0 %809 }
  0xe3   :  { %v3681_v26 = vmul.f32 %v3580_v5, %v3580_v5 }
  0xe5   :  { %v3582_v57 = vpop.xlane.xlu1 %827 }
  0xe6   :  { %v866_v49 = vmul.f32 %v3582_v57, %v3582_v57 }
  0xe8   :  { %v3584_v29 = vpop.xlane.xlu0 %825  ;;  %v1045_v55 = vrot.slane %v866_v49, %v3624_v9 }
  0xe9   :  { %v865_v33 = vmul.f32 %v3584_v29, %v3584_v29 }
  0xeb   :  { %v1041_v16 = vrot.slane %v865_v33, %v3638_v42 }
  0xec   :  { %v3586_v41 = vpop.xlane.xlu1 %797 }
  0xed   :  { %v851_v37 = vmul.f32 %v3586_v41, %v3586_v41 }
  0xef   :  { %v3588_v23 = vpop.xlane.xlu0 %781  ;;  %v972_v4 = vrot.slane %v851_v37, %v3647_v54  ;;  %v1002_v37 = vrot.slane %v3681_v26, %v3638_v42 }
  0xf0   :  { %v843_v32 = vmul.f32 %v3588_v23, %v3588_v23 }
  0xf1   :  { %v973_v26 = vsel %vm923_vm1, %v972_v4, %v968_v63 }
  0xf2   :  { %v922_v48 = vrot.slane %v843_v32, %v3647_v54 }
  0xf4   :  { %v3590_v12 = vpop.xlane.xlu1 %829  ;;  %v924_v49 = vsel %vm923_vm1, %v922_v48, %v917_v11 }
  0xf5   :  { %v867_v14 = vmul.f32 %v3590_v12, %v3590_v12 }
  0xf9   :  { %v3592_v36 = vpop.xlane.xlu0 %813 }
  0xfa   :  { %v859_v15 = vmul.f32 %v3592_v36, %v3592_v36 }
  0xfc   :  { %v3594_v40 = vpop.xlane.xlu1 %799 }
  0xfd   :  { %v852_v56 = vmul.f32 %v3594_v40, %v3594_v40 }
  0xff   :  { %v977_v61 = vrot.slane %v852_v56, %v3650_v18 }
 0x100   :  { %v3596_v60 = vpop.xlane.xlu0 %783 }
 0x101   :  { %v844_v17 = vmul.f32 %v3596_v60, %v3596_v60  ;;  %v978_v33 = vsel %vm930_vm2, %v977_v61, %v973_v26 }
 0x103   :  { %v929_v58 = vrot.slane %v844_v17, %v3650_v18  ;;  %v1050_v17 = vrot.slane %v867_v14, %v3647_v54 }
 0x104   :  { %v3598_v43 = vpop.xlane.xlu1 %831 }
 0x105   :  { %v868_v11 = vmul.f32 %v3598_v43, %v3598_v43 }
 0x109   :  { %v3600_v13 = vpop.xlane.xlu0 %815 }
 0x10d   :  { %v3602_v34 = vpop.xlane.xlu1 %801 }
 0x10e   :  { %v853_v1 = vmul.f32 %v3602_v34, %v3602_v34 }
 0x110   :  { %v3604_v22 = vpop.xlane.xlu0 %785  ;;  %v982_v27 = vrot.slane %v853_v1, %v3653_v35 }
 0x111   :  { %v845_v52 = vmul.f32 %v3604_v22, %v3604_v22 }
 0x112   :  { %v983_v14 = vsel %vm937_vm3, %v982_v27, %v978_v33 }
 0x113   :  { %v3606_v7 = vpop.xlane.xlu1 %833  ;;  %v936_v1 = vrot.slane %v845_v52, %v3653_v35 }
 0x114   :  { %v869_v61 = vmul.f32 %v3606_v7, %v3606_v7 }
 0x118   :  { %v3608_v38 = vpop.xlane.xlu0 %817 }
 0x119   :  { %v861_v27 = vmul.f32 %v3608_v38, %v3608_v38 }
 0x11d   :  { %v3610_v31 = vpop.xlane.xlu1 %803 }
 0x11e   :  { %v854_v39 = vmul.f32 %v3610_v31, %v3610_v31 }
 0x120   :  { %v987_v56 = vrot.slane %v854_v39, %v3661_v25  ;;  %v931_v39 = vsel %vm930_vm2, %v929_v58, %v924_v49 }
 0x121   :  { %v3612_v24 = vpop.xlane.xlu0 %787 }
 0x122   :  { %v846_v32 = vmul.f32 %v3612_v24, %v3612_v24  ;;  %v988_v58 = vsel %vm944_vm4, %v987_v56, %v983_v14  ;;  %v1046_v56 = vsel %vm916_vm0, %v1045_v55, %v1041_v16 }
 0x124   :  { %v3617_v47 = vpop.xlane.xlu1 %835  ;;  %v943_v4 = vrot.slane %v846_v32, %v3661_v25  ;;  %v938_v32 = vsel %vm937_vm3, %v936_v1, %v931_v39  ;;  %v1055_v1 = vrot.slane %v868_v11, %v3650_v18  ;;  %v1021_v11 = vrot.slane %v861_v27, %v3653_v35 }
 0x126   :  { %v945_v42 = vsel %vm944_vm4, %v943_v4, %v938_v32  ;;  %v1007_v32 = vsel %vm916_vm0, %v1006_v45, %v1002_v37 }
 0x128   :  { %v3620_v53 = vpop.xlane.xlu0 %819 }
 0x129   :  { %v862_v39 = vmul.f32 %v3620_v53, %v3620_v53 }
 0x12c   :  { %v3630_v50 = vpop.xlane.xlu1 %805 }
 0x12d   :  { %v855_v30 = vmul.f32 %v3630_v50, %v3630_v50 }
 0x12f   :  { %v992_v9 = vrot.slane %v855_v30, %v3664_v0  ;;  %v860_v30 = vmul.f32 %v3600_v13, %v3600_v13 }
 0x131   :  { %v3655_v59 = vpop.xlane.xlu0 %789  ;;  %v993_v26 = vsel %vm951_vm5, %v992_v9, %v988_v58  ;;  %v1011_v9 = vrot.slane %v859_v15, %v3647_v54  ;;  %v1060_v58 = vrot.slane %v869_v61, %v3653_v35  ;;  %v1016_v55 = vrot.slane %v860_v30, %v3650_v18 }
 0x132   :  { %4827 = vst [vmem:[#allocation47_spill] sm:$0xff] %v3655_v59  ;;  %v847_v6 = vmul.f32 %v3655_v59, %v3655_v59  ;;  %v1051_v15 = vsel %vm923_vm1, %v1050_v17, %v1046_v56  ;;  %v1026_v30 = vrot.slane %v862_v39, %v3661_v25 }
 0x134   :  { %v950_v52 = vrot.slane %v847_v6, %v3664_v0  ;;  %v870_v6 = vmul.f32 %v3617_v47, %v3617_v47 }
 0x135   :  { %v3669_v62 = vpop.xlane.xlu1 %837 }
 0x136   :  { %v871_v49 = vmul.f32 %v3669_v62, %v3669_v62  ;;  %v952_v14 = vsel %vm951_vm5, %v950_v52, %v945_v42  ;;  %v1065_v16 = vrot.slane %v870_v6, %v3661_v25 }
 0x138   :  { %v3705_v51 = vpop.xlane.xlu0 %821  ;;  %v1070_v52 = vrot.slane %v871_v49, %v3664_v0 }
 0x13c   :  { %v3719_v46 = vpop.xlane.xlu1 %807 }
 0x13d   :  { %v856_v20 = vmul.f32 %v3719_v46, %v3719_v46 }
 0x13f   :  { %v997_v63 = vrot.slane %v856_v20, %v3672_v44 }
 0x140   :  { %v3740_v48 = vpop.xlane.xlu0 %791 }
 0x141   :  { %4831 = vst [vmem:[#allocation51_spill] sm:$0xff] %v3740_v48  ;;  %v848_v20 = vmul.f32 %v3740_v48, %v3740_v48  ;;  %v998_v48 = vsel %vm958_vm6, %v997_v63, %v993_v26  ;;  %v1056_v26 = vsel %vm930_vm2, %v1055_v1, %v1051_v15 }
 0x143   :  { %v957_v33 = vrot.slane %v848_v20, %v3672_v44  ;;  %v863_v20 = vmul.f32 %v3705_v51, %v3705_v51 }
 0x144   :  { %v3769_v59 = vpop.xlane.xlu1 %839 }
 0x145   :  { %v959_v4 = vsel %vm958_vm6, %v957_v33, %v952_v14  ;;  %v872_v63 = vmul.f32 %v3769_v59, %v3769_v59  ;;  %v1012_v33 = vsel %vm923_vm1, %v1011_v9, %v1007_v32  ;;  %v1031_v17 = vrot.slane %v863_v20, %v3664_v0 }
 0x146   :  { %v1078_v42 = vsel %vm1077_vm7, %v998_v48, %v959_v4  ;;  %v1061_v48 = vsel %vm937_vm3, %v1060_v58, %v1056_v26  ;;  %v1017_v49 = vsel %vm930_vm2, %v1016_v55, %v1012_v33 }
 0x147   :  { %v1083_v61 = vsel %vm1082_vm8, %v1078_v42, 0.0  ;;  %v1075_v6 = vrot.slane %v872_v63, %v3672_v44  ;;  %v3788_v27 = vpop.xlane.xlu0 %823  ;;  %v1066_v37 = vsel %vm944_vm4, %v1065_v16, %v1061_v48  ;;  %v1022_v56 = vsel %vm937_vm3, %v1021_v11, %v1017_v49 }
 0x148   :  { %1084 = vadd.xlane.f32.xlu0 %v1083_v61  ;;  %v864_v45 = vmul.f32 %v3788_v27, %v3788_v27  ;;  %v1071_v1 = vsel %vm951_vm5, %v1070_v52, %v1066_v37  ;;  %v1027_v14 = vsel %vm944_vm4, %v1026_v30, %v1022_v56  ;;  %v2985_v16 = vmov 0  }
 0x149   :  { %v1076_v9 = vsel %vm958_vm6, %v1075_v6, %v1071_v1  ;;  %v1032_v58 = vsel %vm951_vm5, %v1031_v17, %v1027_v14  ;;  %2884 = vset.pattern.permute.xlu1 %v2985_v16  ;;  %2883 = vset.pattern.permute.xlu0 %v2985_v16 }
 0x14a   :  { %v1036_v39 = vrot.slane %v864_v45, %v3672_v44  ;;  %v4861_v44 = vld [vmem:[#allocation35_spill] sm:$0xff] }
 0x14c   :  { %v1037_v20 = vsel %vm958_vm6, %v1036_v39, %v1032_v58 }
 0x14d   :  { %v1079_v4 = vsel %vm1077_vm7, %v1076_v9, %v1037_v20 }
 0x14e   :  { %v1086_v55 = vsel %vm1082_vm8, %v1079_v4, 0.0  ;;  %v4833_v4 = vld [vmem:[#allocation51_spill] sm:$0xff] }
 0x14f   :  { %1087 = vadd.xlane.f32.xlu1 %v1086_v55 }
 0x1d5   :  { %v1085_v63 = vpop.xlane.xlu0 %1084 }
 0x1d6   :  { %2885 = vrsqrt.f32 %v1085_v63  ;;  %v1093_v42 = vadd.f32 1.0, %v1085_v63 }
 0x1d8   :  { %2887 = vrcp.f32 %v1093_v42 }
 0x1dc   :  { %v1088_v15 = vpop.xlane.xlu1 %1087 }
 0x1dd   :  { %2889 = vrsqrt.f32 %v1088_v15  ;;  %v1094_v11 = vadd.f32 1.0, %v1088_v15 }
 0x1df   :  { %2891 = vrcp.f32 %v1094_v11 }
 0x1e0   :  { %v2886_v52 = vpop.eup %2885 }
 0x1e1   :  { %v1091_v61 = vmul.f32 %v2886_v52, %v1085_v63 }
 0x1e2   :  { %v2888_v32 = vpop.eup %2887 }
 0x1e3   :  { %v1097_v26 = vmul.f32 %v2888_v32, %v1091_v61 }
 0x1e5   :  { %v3804_v30 = vrot.slane %v1097_v26, %v3029_v2  ;;  %v1108_v6 = vrot.slane %v1097_v26, %v3032_v3 }
 0x1e7   :  { %v1122_v33 = vmul.f32 %v3804_v30, %v3576_v10  ;;  %v1121_v48 = vmul.f32 %v3804_v30, %v3572_v28  ;;  %v2890_v17 = vpop.eup %2889  ;;  %v1129_v37 = vmul.f32 %v1108_v6, %v3570_v21  ;;  %v1131_v56 = vmul.f32 %v1108_v6, %v3586_v41 }
 0x1e8   :  { %v1092_v49 = vmul.f32 %v2890_v17, %v1088_v15  ;;  %v1130_v10 = vmul.f32 %v1108_v6, %v3574_v8  ;;  %v1132_v58 = vmul.f32 %v1108_v6, %v3594_v40  ;;  %v1133_v8 = vmul.f32 %v1108_v6, %v3602_v34 }
 0x1e9   :  { %1160 = vperm.xlu1 %2884, %v1122_v33   ;;  %1155 = vperm.xlu0 %2883, %v1121_v48   ;;  %v2892_v45 = vpop.eup %2891  ;;  %v1123_v40 = vmul.f32 %v3804_v30, %v3588_v23  ;;  %v1135_v34 = vmul.f32 %v1108_v6, %v3630_v50 }
 0x1ea   :  { %v1098_v1 = vmul.f32 %v2892_v45, %v1092_v49  ;;  %v4834_v45 = vld [vmem:[#allocation25_spill] sm:$0xff] }
 0x1ec   :  { %v1116_v39 = vrot.slane %v1098_v1, %v3032_v3  ;;  %v1112_v14 = vrot.slane %v1098_v1, %v3029_v2  ;;  %v4860_v3 = vld [vmem:[#allocation29_spill] sm:$0xff] }
 0x1ed   :  { %1195 = vperm.xlu1 %2884, %v1129_v37   ;;  %1205 = vperm.xlu0 %2883, %v1131_v56   ;;  %v4835_v56 = vld [vmem:[#allocation20_spill] sm:$0xff] }
 0x1ee   :  { %v1147_v28 = vmul.f32 %v1116_v39, %v3590_v12  ;;  %v1137_v9 = vmul.f32 %v1112_v14, %v3580_v5  ;;  %v1138_v21 = vmul.f32 %v1112_v14, %v3578_v19  ;;  %v1148_v41 = vmul.f32 %v1116_v39, %v3598_v43 }
 0x1ef   :  { %v1145_v20 = vmul.f32 %v1116_v39, %v3584_v29  ;;  %v1146_v12 = vmul.f32 %v1116_v39, %v3582_v57  ;;  %v1149_v5 = vmul.f32 %v1116_v39, %v3606_v7  ;;  %v1134_v19 = vmul.f32 %v1108_v6, %v3610_v31 }
 0x1f0   :  { %v1139_v43 = vmul.f32 %v1112_v14, %v3592_v36  ;;  %v1150_v29 = vmul.f32 %v1116_v39, %v3617_v47  ;;  %v1124_v57 = vmul.f32 %v3804_v30, %v3596_v60  ;;  %v1140_v7 = vmul.f32 %v1112_v14, %v3600_v13 }
 0x1f1   :  { %1200 = vperm.xlu1 %2884, %v1130_v10   ;;  %1285 = vperm.xlu0 %2883, %v1147_v28   ;;  %v1151_v23 = vmul.f32 %v1116_v39, %v3669_v62  ;;  %v1125_v36 = vmul.f32 %v3804_v30, %v3604_v22  ;;  %v1136_v31 = vmul.f32 %v1108_v6, %v3719_v46  ;;  %v4832_v62 = vld [vmem:[#allocation47_spill] sm:$0xff]  ;;  %v4837_v28 = vld [vmem:[#allocation12_spill] sm:$0xff] }
 0x1f2   :  { %v1141_v47 = vmul.f32 %v1112_v14, %v3608_v38  ;;  %v1152_v60 = vmul.f32 %v1116_v39, %v3769_v59  ;;  %v1126_v13 = vmul.f32 %v3804_v30, %v3612_v24  ;;  %v1142_v50 = vmul.f32 %v1112_v14, %v3620_v53 }
 0x1f3   :  { %v1127_v22 = vmul.f32 %v3804_v30, %v4832_v62  ;;  %v1143_v46 = vmul.f32 %v1112_v14, %v3705_v51  ;;  %v1128_v38 = vmul.f32 %v3804_v30, %v4833_v4  ;;  %v1144_v59 = vmul.f32 %v1112_v14, %v3788_v27  ;;  %v4836_v14 = vld [vmem:[#allocation23_spill] sm:$0xff]  ;;  %v4844_v4 = vld [vmem:[#allocation28_spill] sm:$0xff] }
 0x1f5   :  { %1235 = vperm.xlu1 %2884, %v1137_v9   ;;  %1210 = vperm.xlu0 %2883, %v1132_v58  }
 0x1f9   :  { %1240 = vperm.xlu1 %2884, %v1138_v21   ;;  %1290 = vperm.xlu0 %2883, %v1148_v41  }
 0x1fd   :  { %1275 = vperm.xlu1 %2884, %v1145_v20   ;;  %1215 = vperm.xlu0 %2883, %v1133_v8   ;;  %v4838_v8 = vld [vmem:[#allocation21_spill] sm:$0xff] }
 0x201   :  { %1280 = vperm.xlu1 %2884, %v1146_v12   ;;  %1295 = vperm.xlu0 %2883, %v1149_v5   ;;  %v4839_v5 = vld [vmem:[#allocation22_spill] sm:$0xff] }
 0x205   :  { %1165 = vperm.xlu1 %2884, %v1123_v40   ;;  %1220 = vperm.xlu0 %2883, %v1134_v19  }
 0x209   :  { %1245 = vperm.xlu1 %2884, %v1139_v43   ;;  %1300 = vperm.xlu0 %2883, %v1150_v29   ;;  %v4840_v43 = vld [vmem:[#allocation15_spill] sm:$0xff] }
 0x20d   :  { %1170 = vperm.xlu1 %2884, %v1124_v57   ;;  %1225 = vperm.xlu0 %2883, %v1135_v34  }
 0x211   :  { %1250 = vperm.xlu1 %2884, %v1140_v7   ;;  %1305 = vperm.xlu0 %2883, %v1151_v23   ;;  %v4841_v7 = vld [vmem:[#allocation17_spill] sm:$0xff] }
 0x215   :  { %1175 = vperm.xlu1 %2884, %v1125_v36   ;;  %1230 = vperm.xlu0 %2883, %v1136_v31   ;;  %v4842_v36 = vld [vmem:[#allocation19_spill] sm:$0xff] }
 0x219   :  { %1255 = vperm.xlu1 %2884, %v1141_v47   ;;  %1310 = vperm.xlu0 %2883, %v1152_v60  }
 0x21d   :  { %1180 = vperm.xlu1 %2884, %v1126_v13  }
 0x221   :  { %1260 = vperm.xlu1 %2884, %v1142_v50   ;;  %v4843_v50 = vld [vmem:[#allocation30_spill] sm:$0xff] }
 0x225   :  { %1185 = vperm.xlu1 %2884, %v1127_v22  }
 0x229   :  { %1265 = vperm.xlu1 %2884, %v1143_v46  }
 0x22d   :  { %1190 = vperm.xlu1 %2884, %v1128_v38  }
 0x231   :  { %1270 = vperm.xlu1 %2884, %v1144_v59   ;;  %v4845_v59 = vld [vmem:[#allocation34_spill] sm:$0xff] }
 0x268   :  { %v1161_v55 = vpop.permute.xlu1 %1160  ;;  %v1156_v24 = vpop.permute.xlu0 %1155 }
 0x26c   :  { %v1196_v16 = vpop.permute.xlu1 %1195  ;;  %v1206_v63 = vpop.permute.xlu0 %1205 }
 0x26d   :  { %v1321_v10 = vmul.f32 %v1196_v16, %v4836_v14  ;;  %v1323_v12 = vmul.f32 %v1206_v63, %v4838_v8  ;;  %v4846_v63 = vld [vmem:[#allocation26_spill] sm:$0xff] }
 0x270   :  { %v1201_v53 = vpop.permute.xlu1 %1200  ;;  %v1286_v42 = vpop.permute.xlu0 %1285 }
 0x271   :  { %v1322_v37 = vmul.f32 %v1201_v53, %v4834_v45  ;;  %v1339_v40 = vmul.f32 %v1286_v42, %v4839_v5  ;;  %v1314_v53 = vmul.f32 %v1161_v55, %v4846_v63  ;;  %v4847_v42 = vld [vmem:[#allocation24_spill] sm:$0xff] }
 0x272   :  { %v4853_v55 = vld [vmem:[#allocation16_spill] sm:$0xff] }
 0x273   :  { %v1358_v58 = vadd.f32 %v1322_v37, %v1321_v10 }
 0x274   :  { %v1236_v15 = vpop.permute.xlu1 %1235  ;;  %v1211_v11 = vpop.permute.xlu0 %1210 }
 0x275   :  { %v1359_v19 = vadd.f32 %v1358_v58, %v1323_v12  ;;  %v1324_v29 = vmul.f32 %v1211_v11, %v4840_v43  ;;  %v1313_v11 = vmul.f32 %v1156_v24, %v4847_v42  ;;  %v4850_v58 = vld [vmem:[#allocation13_spill] sm:$0xff]  ;;  %v4851_v12 = vld [vmem:[#allocation36_spill] sm:$0xff] }
 0x277   :  { %v1360_v60 = vadd.f32 %v1359_v19, %v1324_v29  ;;  %v4852_v19 = vld [vmem:[#allocation10_spill] sm:$0xff] }
 0x278   :  { %v1241_v52 = vpop.permute.xlu1 %1240  ;;  %v1291_v61 = vpop.permute.xlu0 %1290 }
 0x279   :  { %v1340_v23 = vmul.f32 %v1291_v61, %v4841_v7  ;;  %v4848_v61 = vld [vmem:[#allocation32_spill] sm:$0xff] }
 0x27c   :  { %v1276_v32 = vpop.permute.xlu1 %1275  ;;  %v1216_v51 = vpop.permute.xlu0 %1215 }
 0x27d   :  { %v1337_v9 = vmul.f32 %v1276_v32, %v4837_v28  ;;  %v1325_v31 = vmul.f32 %v1216_v51, %v4842_v36  ;;  %v4849_v51 = vld [vmem:[#allocation38_spill] sm:$0xff] }
 0x27f   :  { %v1361_v46 = vadd.f32 %v1360_v60, %v1325_v31  ;;  %v4855_v60 = vld [vmem:[#allocation11_spill] sm:$0xff] }
 0x280   :  { %v1281_v26 = vpop.permute.xlu1 %1280  ;;  %v1296_v6 = vpop.permute.xlu0 %1295 }
 0x281   :  { %v1338_v1 = vmul.f32 %v1281_v26, %v4835_v56  ;;  %v1341_v38 = vmul.f32 %v1296_v6, %v4844_v4  ;;  %v1345_v6 = vadd.f32 %v1314_v53, %v1313_v11 }
 0x283   :  { %v1384_v21 = vadd.f32 %v1338_v1, %v1337_v9 }
 0x284   :  { %v1166_v33 = vpop.permute.xlu1 %1165  ;;  %v1221_v30 = vpop.permute.xlu0 %1220 }
 0x285   :  { %v1385_v57 = vadd.f32 %v1384_v21, %v1339_v40  ;;  %v1326_v62 = vmul.f32 %v1221_v30, %v4843_v50  ;;  %v1315_v30 = vmul.f32 %v1166_v33, %v4850_v58  ;;  %v4857_v33 = vld [vmem:[#allocation27_spill] sm:$0xff] }
 0x287   :  { %v1386_v13 = vadd.f32 %v1385_v57, %v1340_v23  ;;  %v1362_v26 = vadd.f32 %v1361_v46, %v1326_v62  ;;  %v4854_v23 = vld [vmem:[#allocation40_spill] sm:$0xff]  ;;  %v1346_v46 = vadd.f32 %v1345_v6, %v1315_v30 }
 0x288   :  { %v1246_v48 = vpop.permute.xlu1 %1245  ;;  %v1301_v17 = vpop.permute.xlu0 %1300 }
 0x289   :  { %v1387_v32 = vadd.f32 %v1386_v13, %v1341_v38  ;;  %v1342_v37 = vmul.f32 %v1301_v17, %v4848_v61  ;;  %v1329_v17 = vmul.f32 %v1236_v15, %v4855_v60  ;;  %v4856_v13 = vld [vmem:[#allocation14_spill] sm:$0xff] }
 0x28b   :  { %v1388_v29 = vadd.f32 %v1387_v32, %v1342_v37  ;;  %v4859_v37 = vld [vmem:[#allocation31_spill] sm:$0xff] }
 0x28c   :  { %v1171_v27 = vpop.permute.xlu1 %1170  ;;  %v1226_v49 = vpop.permute.xlu0 %1225 }
 0x28d   :  { %v1327_v16 = vmul.f32 %v1226_v49, %v4845_v59  ;;  %v1330_v49 = vmul.f32 %v1241_v52, %v4852_v19  ;;  %v1316_v57 = vmul.f32 %v1171_v27, %v4853_v55 }
 0x28f   :  { %v1363_v21 = vadd.f32 %v1362_v26, %v1327_v16  ;;  %v1371_v26 = vadd.f32 %v1330_v49, %v1329_v17  ;;  %v1347_v11 = vadd.f32 %v1346_v46, %v1316_v57  ;;  %v4863_v17 = vld [vmem:[#allocation37_spill] sm:$0xff]  ;;  %v4864_v46 = vld [vmem:[#allocation39_spill] sm:$0xff] }
 0x290   :  { %v1251_v39 = vpop.permute.xlu1 %1250  ;;  %v1306_v41 = vpop.permute.xlu0 %1305 }
 0x291   :  { %v1343_v40 = vmul.f32 %v1306_v41, %v4851_v12  ;;  %v4858_v41 = vld [vmem:[#allocation18_spill] sm:$0xff] }
 0x292   :  { %v1332_v53 = vmul.f32 %v1251_v39, %v4858_v41 }
 0x293   :  { %v1389_v38 = vadd.f32 %v1388_v29, %v1343_v40 }
 0x294   :  { %v1176_v20 = vpop.permute.xlu1 %1175  ;;  %v1231_v47 = vpop.permute.xlu0 %1230 }
 0x295   :  { %v1328_v1 = vmul.f32 %v1231_v47, %v4849_v51  ;;  %v1331_v47 = vmul.f32 %v1246_v48, %v4856_v13  ;;  %v1317_v16 = vmul.f32 %v1176_v20, %v4857_v33  ;;  %v4862_v20 = vld [vmem:[#allocation33_spill] sm:$0xff] }
 0x297   :  { %v1364_v24 = vadd.f32 %v1363_v21, %v1328_v1  ;;  %v1372_v1 = vadd.f32 %v1371_v26, %v1331_v47 }
 0x298   :  { %v1256_v34 = vpop.permute.xlu1 %1255  ;;  %v1311_v10 = vpop.permute.xlu0 %1310 }
 0x299   :  { %v1344_v31 = vmul.f32 %v1311_v10, %v4854_v23  ;;  %v1365_v52 = vrot.slane %v1364_v24, 4  ;;  %v1348_v10 = vadd.f32 %v1347_v11, %v1317_v16  ;;  %v1333_v15 = vmul.f32 %v1256_v34, %v4860_v3 }
 0x29a   :  { %v1373_v0 = vadd.f32 %v1372_v1, %v1332_v53  ;;  %v4865_v53 = vld [vmem:[#allocation41_spill] sm:$0xff] }
 0x29b   :  { %v1390_v32 = vadd.f32 %v1389_v38, %v1344_v31  ;;  %v1366_v30 = vadd.f32 %v1365_v52, %v1364_v24 }
 0x29c   :  { %v1181_v22 = vpop.permute.xlu1 %1180  ;;  %v1374_v39 = vadd.f32 %v1373_v0, %v1333_v15 }
 0x29d   :  { %v1318_v27 = vmul.f32 %v1181_v22, %v4859_v37  ;;  %v1391_v40 = vrot.slane %v1390_v32, 4  ;;  %v1367_v47 = vrot.slane %v1366_v30, 2 }
 0x29f   :  { %v1349_v6 = vadd.f32 %v1348_v10, %v1318_v27  ;;  %v1392_v38 = vadd.f32 %v1391_v40, %v1390_v32  ;;  %v1368_v52 = vadd.f32 %v1367_v47, %v1366_v30 }
 0x2a0   :  { %v1261_v9 = vpop.permute.xlu1 %1260 }
 0x2a1   :  { %v1334_v49 = vmul.f32 %v1261_v9, %v4862_v20  ;;  %v1393_v27 = vrot.slane %v1392_v38, 2  ;;  %v1369_v15 = vrot.slane %v1368_v52, 1 }
 0x2a3   :  { %v1375_v16 = vadd.f32 %v1374_v39, %v1334_v49  ;;  %v3881_v32 = vadd.f32 %v1369_v15, %v1368_v52 }
 0x2a4   :  { %v1186_v62 = vpop.permute.xlu1 %1185 }
 0x2a5   :  { %v1319_v48 = vmul.f32 %v1186_v62, %v4861_v44  ;;  %4866 = vst [vmem:[#allocation47_spill] sm:$0xff] %v3881_v32 }
 0x2a7   :  { %v1350_v57 = vadd.f32 %v1349_v6, %v1319_v48  ;;  %v1394_v48 = vadd.f32 %v1393_v27, %v1392_v38 }
 0x2a8   :  { %v1266_v21 = vpop.permute.xlu1 %1265 }
 0x2a9   :  { %v1335_v31 = vmul.f32 %v1266_v21, %v4863_v17  ;;  %v1395_v40 = vrot.slane %v1394_v48, 1 }
 0x2ab   :  { %v1376_v11 = vadd.f32 %v1375_v16, %v1335_v31  ;;  %v3887_v31 = vadd.f32 %v1395_v40, %v1394_v48 }
 0x2ac   :  { %v1191_v29 = vpop.permute.xlu1 %1190 }
 0x2ad   :  { %v1320_v22 = vmul.f32 %v1191_v29, %v4864_v46  ;;  %4868 = vst [vmem:[#allocation26_spill] sm:$0xff] %v3887_v31 }
 0x2af   :  { %v1351_v26 = vadd.f32 %v1350_v57, %v1320_v22 }
 0x2b0   :  { %v1271_v34 = vpop.permute.xlu1 %1270 }
 0x2b1   :  { %v1352_v62 = vrot.slane %v1351_v26, 4  ;;  %v1336_v24 = vmul.f32 %v1271_v34, %v4865_v53 }
 0x2b3   :  { %v1353_v1 = vadd.f32 %v1352_v62, %v1351_v26  ;;  %v1377_v9 = vadd.f32 %v1376_v11, %v1336_v24 }
 0x2b5   :  { %v1354_v10 = vrot.slane %v1353_v1, 2  ;;  %v1378_v0 = vrot.slane %v1377_v9, 4 }
 0x2b7   :  { %v1355_v21 = vadd.f32 %v1354_v10, %v1353_v1  ;;  %v1379_v6 = vadd.f32 %v1378_v0, %v1377_v9 }
 0x2b9   :  { %v1356_v29 = vrot.slane %v1355_v21, 1  ;;  %v1380_v25 = vrot.slane %v1379_v6, 2 }
 0x2bb   :  { %v3883_v49 = vadd.f32 %v1356_v29, %v1355_v21  ;;  %v1381_v39 = vadd.f32 %v1380_v25, %v1379_v6 }
 0x2bd   :  { %4867 = vst [vmem:[#allocation51_spill] sm:$0xff] %v3883_v49  ;;  %v1401_v30 = vmax.f32 %v3883_v49, %v3881_v32  ;;  %v1382_v57 = vrot.slane %v1381_v39, 1 }
 0x2bf   :  { %v1403_v22 = vsub.f32 %v3883_v49, %v1401_v30  ;;  %v1404_v47 = vsub.f32 %v3881_v32, %v1401_v30  ;;  %v3891_v38 = vadd.f32 %v1382_v57, %v1381_v39 }
 0x2c1   :  { %4869 = vst [vmem:[#allocation24_spill] sm:$0xff] %v3891_v38  ;;  %v1409_v16 = vmul.f32 1.442695, %v1404_v47  ;;  %v1402_v26 = vmax.f32 %v3891_v38, %v3887_v31  ;;  %v1407_v34 = vmul.f32 1.442695, %v1403_v22 }
 0x2c3   :  { %v1405_v11 = vsub.f32 %v3891_v38, %v1402_v26  ;;  %v1406_v25 = vsub.f32 %v3887_v31, %v1402_v26  ;;  %2893 = vpow2.f32 %v1409_v16 }
 0x2c4   :  { %2895 = vpow2.f32 %v1407_v34 }
 0x2c5   :  { %v1413_v62 = vmul.f32 1.442695, %v1406_v25  ;;  %v1411_v24 = vmul.f32 1.442695, %v1405_v11 }
 0x2c7   :  { %2897 = vpow2.f32 %v1413_v62 }
 0x2c8   :  { %2899 = vpow2.f32 %v1411_v24 }
 0x2cd   :  { %v2894_v52 = vpop.eup %2893 }
 0x2ce   :  { %v1419_v27 = vrot.slane %v2894_v52, 7  ;;  %v2896_v1 = vpop.eup %2895 }
 0x2d0   :  { %v1420_v9 = vsel %vm1077_vm7, %v1419_v27, %v2896_v1 }
 0x2d1   :  { %v2898_v10 = vpop.eup %2897  ;;  %v1426_v0 = vsel %vm1425_vm9, %v1420_v9, 0.0 }
 0x2d2   :  { %v1427_v15 = vrot.slane %v1426_v0, 4  ;;  %v1421_v48 = vrot.slane %v2898_v10, 7  ;;  %v2900_v21 = vpop.eup %2899 }
 0x2d4   :  { %v1428_v6 = vadd.f32 %v1427_v15, %v1426_v0  ;;  %v1422_v29 = vsel %vm1077_vm7, %v1421_v48, %v2900_v21 }
 0x2d5   :  { %v1433_v40 = vsel %vm1425_vm9, %v1422_v29, 0.0 }
 0x2d6   :  { %v1429_v39 = vrot.slane %v1428_v6, 2  ;;  %v1434_v30 = vrot.slane %v1433_v40, 4 }
 0x2d8   :  { %v1430_v57 = vadd.f32 %v1429_v39, %v1428_v6  ;;  %v1435_v22 = vadd.f32 %v1434_v30, %v1433_v40 }
 0x2da   :  { %v1431_v47 = vrot.slane %v1430_v57, 1  ;;  %v1436_v16 = vrot.slane %v1435_v22, 2 }
 0x2dc   :  { %v1432_v26 = vadd.f32 %v1431_v47, %v1430_v57  ;;  %v1437_v34 = vadd.f32 %v1436_v16, %v1435_v22 }
 0x2de   :  { %v1443_v11 = vrot.slane %v1432_v26, %v3029_v2  ;;  %v1438_v25 = vrot.slane %v1437_v34, 1 }
 0x2e0   :  { %2901 = vrcp.f32 %v1443_v11  ;;  %v1439_v62 = vadd.f32 %v1438_v25, %v1437_v34 }
 0x2e2   :  { %v1447_v24 = vrot.slane %v1439_v62, %v3029_v2 }
 0x2e4   :  { %2903 = vrcp.f32 %v1447_v24 }
 0x2ea   :  { %v2902_v27 = vpop.eup %2901 }
 0x2eb   :  { %v1449_v9 = vmul.f32 %v2902_v27, %v2896_v1  ;;  %v1450_v0 = vmul.f32 %v2902_v27, %v2894_v52 }
 0x2ed   :  { %v3904_v15 = vrot.slane %v1449_v9, %v3029_v2  ;;  %v1461_v6 = vrot.slane %v1450_v0, %v3029_v2 }
 0x2ee   :  { %v2904_v48 = vpop.eup %2903 }
 0x2ef   :  { %v1452_v29 = vmul.f32 %v2904_v48, %v2900_v21  ;;  %v1471_v40 = vmul.f32 %v3904_v15, %v4846_v63  ;;  %v1470_v39 = vmul.f32 %v3904_v15, %v4847_v42  ;;  %v1453_v30 = vmul.f32 %v2904_v48, %v2898_v10 }
 0x2f0   :  { %v1478_v52 = vmul.f32 %v1461_v6, %v4836_v14  ;;  %v1479_v1 = vmul.f32 %v1461_v6, %v4834_v45  ;;  %v1480_v26 = vmul.f32 %v1461_v6, %v4838_v8  ;;  %v1472_v34 = vmul.f32 %v3904_v15, %v4850_v58  ;;  %v4874_v58 = vld [vmem:[#allocation50_spill] sm:$0xff] }
 0x2f1   :  { %1504 = vadd.xlane.f32.xlu0 %v1471_v40  ;;  %1502 = vadd.xlane.f32.xlu1 %v1470_v39  ;;  %v1465_v57 = vrot.slane %v1452_v29, %v3029_v2  ;;  %v1469_v22 = vrot.slane %v1453_v30, %v3029_v2  ;;  %v1481_v62 = vmul.f32 %v1461_v6, %v4840_v43 }
 0x2f2   :  { %v1473_v24 = vmul.f32 %v3904_v15, %v4853_v55  ;;  %v1482_v0 = vmul.f32 %v1461_v6, %v4842_v36  ;;  %v1474_v48 = vmul.f32 %v3904_v15, %v4857_v33  ;;  %v1483_v39 = vmul.f32 %v1461_v6, %v4843_v50 }
 0x2f3   :  { %v1487_v21 = vmul.f32 %v1465_v57, %v4852_v19  ;;  %v1486_v47 = vmul.f32 %v1465_v57, %v4855_v60  ;;  %v1495_v16 = vmul.f32 %v1469_v22, %v4835_v56  ;;  %v1494_v10 = vmul.f32 %v1469_v22, %v4837_v28 }
 0x2f4   :  { %v1496_v11 = vmul.f32 %v1469_v22, %v4839_v5  ;;  %v1488_v25 = vmul.f32 %v1465_v57, %v4856_v13  ;;  %v1497_v27 = vmul.f32 %v1469_v22, %v4841_v7  ;;  %v1489_v9 = vmul.f32 %v1465_v57, %v4858_v41 }
 0x2f5   :  { %1518 = vadd.xlane.f32.xlu0 %v1478_v52  ;;  %1520 = vadd.xlane.f32.xlu1 %v1479_v1  ;;  %v1498_v29 = vmul.f32 %v1469_v22, %v4844_v4  ;;  %v1490_v40 = vmul.f32 %v1465_v57, %v4860_v3  ;;  %v1475_v30 = vmul.f32 %v3904_v15, %v4859_v37 }
 0x2f6   :  { %v1499_v52 = vmul.f32 %v1469_v22, %v4848_v61  ;;  %v1491_v1 = vmul.f32 %v1465_v57, %v4862_v20 }
 0x2f9   :  { %1536 = vadd.xlane.f32.xlu1 %v1487_v21  ;;  %1534 = vadd.xlane.f32.xlu0 %v1486_v47  ;;  %v1484_v21 = vmul.f32 %v1461_v6, %v4845_v59  ;;  %v1476_v47 = vmul.f32 %v3904_v15, %v4861_v44 }
 0x2fd   :  { %1552 = vadd.xlane.f32.xlu1 %v1495_v16  ;;  %1550 = vadd.xlane.f32.xlu0 %v1494_v10  ;;  %v1500_v16 = vmul.f32 %v1469_v22, %v4851_v12  ;;  %v1492_v10 = vmul.f32 %v1465_v57, %v4863_v17  ;;  %v4871_v17 = vld [vmem:[#allocation43_spill] sm:$0xff] }
 0x301   :  { %1522 = vadd.xlane.f32.xlu1 %v1480_v26  ;;  %1506 = vadd.xlane.f32.xlu0 %v1472_v34  ;;  %v1485_v26 = vmul.f32 %v1461_v6, %v4849_v51  ;;  %v1477_v34 = vmul.f32 %v3904_v15, %v4864_v46 }
 0x305   :  { %1554 = vadd.xlane.f32.xlu1 %v1496_v11  ;;  %1538 = vadd.xlane.f32.xlu0 %v1488_v25  ;;  %v1501_v11 = vmul.f32 %v1469_v22, %v4854_v23  ;;  %v1493_v25 = vmul.f32 %v1465_v57, %v4865_v53  ;;  %v4870_v23 = vld [vmem:[#allocation44_spill] sm:$0xff] }
 0x309   :  { %1524 = vadd.xlane.f32.xlu1 %v1481_v62  ;;  %1508 = vadd.xlane.f32.xlu0 %v1473_v24 }
 0x30d   :  { %1556 = vadd.xlane.f32.xlu1 %v1497_v27  ;;  %1540 = vadd.xlane.f32.xlu0 %v1489_v9 }
 0x311   :  { %1526 = vadd.xlane.f32.xlu1 %v1482_v0  ;;  %1510 = vadd.xlane.f32.xlu0 %v1474_v48 }
 0x315   :  { %1558 = vadd.xlane.f32.xlu1 %v1498_v29  ;;  %1542 = vadd.xlane.f32.xlu0 %v1490_v40 }
 0x319   :  { %1528 = vadd.xlane.f32.xlu1 %v1483_v39  ;;  %1512 = vadd.xlane.f32.xlu0 %v1475_v30 }
 0x31d   :  { %1560 = vadd.xlane.f32.xlu1 %v1499_v52  ;;  %1544 = vadd.xlane.f32.xlu0 %v1491_v1 }
 0x321   :  { %1530 = vadd.xlane.f32.xlu1 %v1484_v21  ;;  %1514 = vadd.xlane.f32.xlu0 %v1476_v47 }
 0x325   :  { %1562 = vadd.xlane.f32.xlu1 %v1500_v16  ;;  %1546 = vadd.xlane.f32.xlu0 %v1492_v10 }
 0x329   :  { %1532 = vadd.xlane.f32.xlu1 %v1485_v26  ;;  %1516 = vadd.xlane.f32.xlu0 %v1477_v34 }
 0x32d   :  { %1564 = vadd.xlane.f32.xlu1 %v1501_v11  ;;  %1548 = vadd.xlane.f32.xlu0 %v1493_v25 }
 0x37e   :  { %v3949_v62 = vpop.xlane.xlu1 %1502  ;;  %v3951_v24 = vpop.xlane.xlu0 %1504 }
 0x37f   :  { %v1566_v26 = vmul.f32 %v3949_v62, %v3949_v62  ;;  %v1567_v34 = vmul.f32 %v3951_v24, %v3951_v24 }
 0x381   :  { %v1633_v53 = vrot.slane %v1566_v26, %v4870_v23  ;;  %v1637_v61 = vrot.slane %v1567_v34, %v4871_v17 }
 0x382   :  { %v3953_v27 = vpop.xlane.xlu1 %1520  ;;  %v3955_v9 = vpop.xlane.xlu0 %1518 }
 0x383   :  { %v1575_v11 = vmul.f32 %v3953_v27, %v3953_v27  ;;  %v1574_v25 = vmul.f32 %v3955_v9, %v3955_v9  ;;  %v1638_v41 = vsel %vm916_vm0, %v1637_v61, %v1633_v53 }
 0x385   :  { %v1676_v20 = vrot.slane %v1575_v11, %v4871_v17  ;;  %v1672_v59 = vrot.slane %v1574_v25, %v4870_v23 }
 0x386   :  { %v3957_v6 = vpop.xlane.xlu1 %1536  ;;  %v3959_v0 = vpop.xlane.xlu0 %1534 }
 0x387   :  { %v1583_v31 = vmul.f32 %v3957_v6, %v3957_v6  ;;  %v1582_v38 = vmul.f32 %v3959_v0, %v3959_v0  ;;  %v1677_v13 = vsel %vm916_vm0, %v1676_v20, %v1672_v59 }
 0x389   :  { %v1715_v26 = vrot.slane %v1583_v31, %v4871_v17  ;;  %v1711_v4 = vrot.slane %v1582_v38, %v4870_v23 }
 0x38a   :  { %v3961_v15 = vpop.xlane.xlu1 %1552  ;;  %v3963_v48 = vpop.xlane.xlu0 %1550 }
 0x38b   :  { %v1591_v51 = vmul.f32 %v3961_v15, %v3961_v15  ;;  %v1590_v46 = vmul.f32 %v3963_v48, %v3963_v48  ;;  %v1716_v43 = vsel %vm916_vm0, %v1715_v26, %v1711_v4 }
 0x38d   :  { %v1754_v31 = vrot.slane %v1591_v51, %v4871_v17  ;;  %v1750_v38 = vrot.slane %v1590_v46, %v4870_v23 }
 0x38e   :  { %v3965_v22 = vpop.xlane.xlu1 %1522  ;;  %v3967_v57 = vpop.xlane.xlu0 %1506 }
 0x38f   :  { %v1576_v12 = vmul.f32 %v3965_v22, %v3965_v22  ;;  %v1568_v44 = vmul.f32 %v3967_v57, %v3967_v57  ;;  %v1755_v4 = vsel %vm916_vm0, %v1754_v31, %v1750_v38 }
 0x391   :  { %v1681_v7 = vrot.slane %v1576_v12, %v3647_v54  ;;  %v1642_v36 = vrot.slane %v1568_v44, %v3647_v54 }
 0x392   :  { %v3969_v29 = vpop.xlane.xlu1 %1554  ;;  %v3971_v40 = vpop.xlane.xlu0 %1538 }
 0x393   :  { %v1592_v3 = vmul.f32 %v3969_v29, %v3969_v29  ;;  %v1584_v50 = vmul.f32 %v3971_v40, %v3971_v40  ;;  %v1643_v26 = vsel %vm923_vm1, %v1642_v36, %v1638_v41 }
 0x395   :  { %v1759_v51 = vrot.slane %v1592_v3, %v3647_v54  ;;  %v1720_v46 = vrot.slane %v1584_v50, %v3647_v54  ;;  %v1682_v3 = vsel %vm923_vm1, %v1681_v7, %v1677_v13 }
 0x396   :  { %v3973_v39 = vpop.xlane.xlu1 %1524  ;;  %v3975_v30 = vpop.xlane.xlu0 %1508 }
 0x397   :  { %v1577_v11 = vmul.f32 %v3973_v39, %v3973_v39  ;;  %v1569_v25 = vmul.f32 %v3975_v30, %v3975_v30  ;;  %v1760_v23 = vsel %vm923_vm1, %v1759_v51, %v1755_v4  ;;  %v1721_v31 = vsel %vm923_vm1, %v1720_v46, %v1716_v43  ;;  %v4872_v4 = vld [vmem:[#allocation48_spill] sm:$0xff] }
 0x399   :  { %v1686_v44 = vrot.slane %v1577_v11, %v3650_v18  ;;  %v1647_v61 = vrot.slane %v1569_v25, %v3650_v18 }
 0x39a   :  { %v3977_v52 = vpop.xlane.xlu1 %1556  ;;  %v3979_v1 = vpop.xlane.xlu0 %1540 }
 0x39b   :  { %v1593_v33 = vmul.f32 %v3977_v52, %v3977_v52  ;;  %v1585_v5 = vmul.f32 %v3979_v1, %v3979_v1 }
 0x39d   :  { %v1764_v11 = vrot.slane %v1593_v33, %v3650_v18  ;;  %v1725_v25 = vrot.slane %v1585_v5, %v3650_v18  ;;  %v1687_v33 = vsel %vm930_vm2, %v1686_v44, %v1682_v3  ;;  %v1648_v5 = vsel %vm930_vm2, %v1647_v61, %v1643_v26 }
 0x39e   :  { %v3981_v21 = vpop.xlane.xlu1 %1526  ;;  %v3983_v47 = vpop.xlane.xlu0 %1510 }
 0x39f   :  { %v1578_v53 = vmul.f32 %v3981_v21, %v3981_v21  ;;  %v1570_v59 = vmul.f32 %v3983_v47, %v3983_v47  ;;  %v1765_v56 = vsel %vm930_vm2, %v1764_v11, %v1760_v23  ;;  %v1726_v44 = vsel %vm930_vm2, %v1725_v25, %v1721_v31 }
 0x3a1   :  { %v1691_v41 = vrot.slane %v1578_v53, %v3653_v35  ;;  %v1652_v51 = vrot.slane %v1570_v59, %v3653_v35  ;;  %v4873_v59 = vld [vmem:[#allocation49_spill] sm:$0xff] }
 0x3a2   :  { %v3985_v16 = vpop.xlane.xlu1 %1558  ;;  %v3987_v10 = vpop.xlane.xlu0 %1542 }
 0x3a3   :  { %v1586_v50 = vmul.f32 %v3987_v10, %v3987_v10  ;;  %v1594_v43 = vmul.f32 %v3985_v16, %v3985_v16  ;;  %v1692_v11 = vsel %vm937_vm3, %v1691_v41, %v1687_v33 }
 0x3a5   :  { %v1730_v46 = vrot.slane %v1586_v50, %v3653_v35 }
 0x3a6   :  { %v4001_v32 = vpop.xlane.xlu1 %1528  ;;  %v4003_v49 = vpop.xlane.xlu0 %1512 }
 0x3a7   :  { %v1571_v20 = vmul.f32 %v4003_v49, %v4003_v49  ;;  %v1579_v54 = vmul.f32 %v4001_v32, %v4001_v32 }
 0x3a9   :  { %v1657_v18 = vrot.slane %v1571_v20, %v4872_v4  ;;  %v1696_v61 = vrot.slane %v1579_v54, %v4872_v4  ;;  %v1653_v54 = vsel %vm937_vm3, %v1652_v51, %v1648_v5 }
 0x3aa   :  { %v4023_v37 = vpop.xlane.xlu1 %1560  ;;  %v4025_v34 = vpop.xlane.xlu0 %1544 }
 0x3ab   :  { %v1587_v55 = vmul.f32 %v4025_v34, %v4025_v34  ;;  %v1595_v53 = vmul.f32 %v4023_v37, %v4023_v37  ;;  %v1658_v60 = vsel %vm944_vm4, %v1657_v18, %v1653_v54  ;;  %v1697_v41 = vsel %vm944_vm4, %v1696_v61, %v1692_v11 }
 0x3ad   :  { %v1735_v19 = vrot.slane %v1587_v55, %v4872_v4  ;;  %v1774_v8 = vrot.slane %v1595_v53, %v4872_v4 }
 0x3ae   :  { %v4044_v17 = vpop.xlane.xlu1 %1530  ;;  %v4046_v12 = vpop.xlane.xlu0 %1514 }
 0x3af   :  { %v1580_v7 = vmul.f32 %v4044_v17, %v4044_v17  ;;  %v1572_v13 = vmul.f32 %v4046_v12, %v4046_v12 }
 0x3b1   :  { %v1701_v3 = vrot.slane %v1580_v7, %v4873_v59  ;;  %v1662_v26 = vrot.slane %v1572_v13, %v4873_v59  ;;  %v1769_v7 = vrot.slane %v1594_v43, %v3653_v35  ;;  %v1731_v13 = vsel %vm937_vm3, %v1730_v46, %v1726_v44 }
 0x3b2   :  { %v4071_v38 = vpop.xlane.xlu1 %1562  ;;  %v4073_v36 = vpop.xlane.xlu0 %1546  ;;  %v1736_v11 = vsel %vm944_vm4, %v1735_v19, %v1731_v13 }
 0x3b3   :  { %v1596_v50 = vmul.f32 %v4071_v38, %v4071_v38  ;;  %v1588_v20 = vmul.f32 %v4073_v36, %v4073_v36  ;;  %v1663_v55 = vsel %vm951_vm5, %v1662_v26, %v1658_v60  ;;  %v1702_v18 = vsel %vm951_vm5, %v1701_v3, %v1697_v41 }
 0x3b5   :  { %v1779_v51 = vrot.slane %v1596_v50, %v4873_v59  ;;  %v1740_v45 = vrot.slane %v1588_v20, %v4873_v59  ;;  %v1770_v50 = vsel %vm937_vm3, %v1769_v7, %v1765_v56 }
 0x3b6   :  { %v4096_v28 = vpop.xlane.xlu1 %1532  ;;  %v4098_v23 = vpop.xlane.xlu0 %1516  ;;  %v1775_v54 = vsel %vm944_vm4, %v1774_v8, %v1770_v50  ;;  %v4875_v50 = vld [vmem:[#allocation9_spill] sm:$0xff] }
 0x3b7   :  { %v1581_v25 = vmul.f32 %v4096_v28, %v4096_v28  ;;  %v1573_v31 = vmul.f32 %v4098_v23, %v4098_v23 }
 0x3b9   :  { %v1706_v33 = vrot.slane %v1581_v25, %v4874_v58  ;;  %v1667_v5 = vrot.slane %v1573_v31, %v4874_v58  ;;  %v1741_v25 = vsel %vm951_vm5, %v1740_v45, %v1736_v11  ;;  %v1780_v31 = vsel %vm951_vm5, %v1779_v51, %v1775_v54 }
 0x3ba   :  { %v4116_v14 = vpop.xlane.xlu1 %1564  ;;  %v4118_v43 = vpop.xlane.xlu0 %1548 }
 0x3bb   :  { %v1597_v46 = vmul.f32 %v4116_v14, %v4116_v14  ;;  %v1589_v44 = vmul.f32 %v4118_v43, %v4118_v43  ;;  %v1668_v61 = vsel %vm958_vm6, %v1667_v5, %v1663_v55  ;;  %v1707_v53 = vsel %vm958_vm6, %v1706_v33, %v1702_v18 }
 0x3bc   :  { %v1786_v20 = vsel %vm1077_vm7, %v1707_v53, %v1668_v61 }
 0x3bd   :  { %v1784_v60 = vrot.slane %v1597_v46, %v4874_v58  ;;  %v1745_v3 = vrot.slane %v1589_v44, %v4874_v58  ;;  %v1790_v26 = vsel %vm1082_vm8, %v1786_v20, 0.0 }
 0x3be   :  { %1791 = vadd.xlane.f32.xlu0 %v1790_v26 }
 0x3bf   :  { %v1746_v33 = vsel %vm958_vm6, %v1745_v3, %v1741_v25  ;;  %v1785_v56 = vsel %vm958_vm6, %v1784_v60, %v1780_v31 }
 0x3c0   :  { %v1787_v7 = vsel %vm1077_vm7, %v1785_v56, %v1746_v33 }
 0x3c1   :  { %v1793_v19 = vsel %vm1082_vm8, %v1787_v7, 0.0 }
 0x3c2   :  { %1794 = vadd.xlane.f32.xlu1 %v1793_v19 }
 0x44b   :  { %v1792_v13 = vpop.xlane.xlu0 %1791 }
 0x44c   :  { %2905 = vrsqrt.f32 %v1792_v13  ;;  %v1800_v5 = vadd.f32 1.0, %v1792_v13 }
 0x44e   :  { %2907 = vrcp.f32 %v1800_v5 }
 0x44f   :  { %v1795_v41 = vpop.xlane.xlu1 %1794 }
 0x450   :  { %2909 = vrsqrt.f32 %v1795_v41  ;;  %v1801_v8 = vadd.f32 1.0, %v1795_v41 }
 0x452   :  { %2911 = vrcp.f32 %v1801_v8 }
 0x456   :  { %v2906_v45 = vpop.eup %2905 }
 0x457   :  { %v1798_v55 = vmul.f32 %v2906_v45, %v1792_v13 }
 0x458   :  { %v2908_v51 = vpop.eup %2907 }
 0x459   :  { %v1804_v18 = vmul.f32 %v2908_v51, %v1798_v55 }
 0x45a   :  { %v2910_v46 = vpop.eup %2909 }
 0x45b   :  { %v4142_v44 = vrot.slane %v1804_v18, %v3029_v2  ;;  %v1799_v61 = vmul.f32 %v2910_v46, %v1795_v41  ;;  %v1815_v20 = vrot.slane %v1804_v18, %v4875_v50 }
 0x45c   :  { %v2912_v53 = vpop.eup %2911 }
 0x45d   :  { %v1805_v11 = vmul.f32 %v2912_v53, %v1799_v61  ;;  %v1829_v60 = vmul.f32 %v4142_v44, %v3951_v24  ;;  %v1828_v3 = vmul.f32 %v4142_v44, %v3949_v62  ;;  %v1836_v54 = vmul.f32 %v1815_v20, %v3955_v9 }
 0x45e   :  { %v1837_v25 = vmul.f32 %v1815_v20, %v3953_v27  ;;  %v1830_v9 = vmul.f32 %v4142_v44, %v3967_v57  ;;  %v1838_v27 = vmul.f32 %v1815_v20, %v3965_v22  ;;  %v1832_v22 = vmul.f32 %v4142_v44, %v3983_v47 }
 0x45f   :  { %1867 = vperm.xlu1 %2884, %v1829_v60   ;;  %1862 = vperm.xlu0 %2883, %v1828_v3   ;;  %v1819_v26 = vrot.slane %v1805_v11, %v3029_v2  ;;  %v1823_v31 = vrot.slane %v1805_v11, %v4875_v50  ;;  %v4901_v50 = vld [vmem:[#allocation36_spill] sm:$0xff] }
 0x461   :  { %v1844_v33 = vmul.f32 %v1819_v26, %v3959_v0  ;;  %v1845_v56 = vmul.f32 %v1819_v26, %v3957_v6  ;;  %v1852_v62 = vmul.f32 %v1823_v31, %v3963_v48  ;;  %v1853_v24 = vmul.f32 %v1823_v31, %v3961_v15 }
 0x462   :  { %v1846_v7 = vmul.f32 %v1819_v26, %v3971_v40  ;;  %v1854_v0 = vmul.f32 %v1823_v31, %v3969_v29  ;;  %v1831_v6 = vmul.f32 %v4142_v44, %v3975_v30  ;;  %v1839_v15 = vmul.f32 %v1815_v20, %v3973_v39 }
 0x463   :  { %1902 = vperm.xlu1 %2884, %v1836_v54   ;;  %1907 = vperm.xlu0 %2883, %v1837_v25   ;;  %v1847_v48 = vmul.f32 %v1819_v26, %v3979_v1  ;;  %v1855_v57 = vmul.f32 %v1823_v31, %v3977_v52  ;;  %v1840_v29 = vmul.f32 %v1815_v20, %v3981_v21  ;;  %v4877_v25 = vld [vmem:[#allocation25_spill] sm:$0xff] }
 0x464   :  { %v1848_v40 = vmul.f32 %v1819_v26, %v3987_v10  ;;  %v1856_v30 = vmul.f32 %v1823_v31, %v3985_v16  ;;  %v1833_v39 = vmul.f32 %v4142_v44, %v4003_v49  ;;  %v1841_v52 = vmul.f32 %v1815_v20, %v4001_v32 }
 0x465   :  { %v1849_v1 = vmul.f32 %v1819_v26, %v4025_v34  ;;  %v1857_v47 = vmul.f32 %v1823_v31, %v4023_v37  ;;  %v1834_v21 = vmul.f32 %v4142_v44, %v4046_v12  ;;  %v1842_v16 = vmul.f32 %v1815_v20, %v4044_v17 }
 0x466   :  { %v1850_v10 = vmul.f32 %v1819_v26, %v4073_v36  ;;  %v1858_v49 = vmul.f32 %v1823_v31, %v4071_v38  ;;  %v1835_v32 = vmul.f32 %v4142_v44, %v4098_v23  ;;  %v1843_v37 = vmul.f32 %v1815_v20, %v4096_v28 }
 0x467   :  { %1942 = vperm.xlu1 %2884, %v1844_v33   ;;  %1947 = vperm.xlu0 %2883, %v1845_v56   ;;  %v1851_v34 = vmul.f32 %v1819_v26, %v4118_v43  ;;  %v1859_v12 = vmul.f32 %v1823_v31, %v4116_v14  ;;  %v4876_v26 = vld [vmem:[#allocation23_spill] sm:$0xff] }
 0x46b   :  { %1982 = vperm.xlu1 %2884, %v1852_v62   ;;  %1987 = vperm.xlu0 %2883, %v1853_v24   ;;  %v4878_v62 = vld [vmem:[#allocation13_spill] sm:$0xff] }
 0x46f   :  { %1872 = vperm.xlu1 %2884, %v1830_v9   ;;  %1912 = vperm.xlu0 %2883, %v1838_v27   ;;  %v4879_v9 = vld [vmem:[#allocation21_spill] sm:$0xff] }
 0x473   :  { %1952 = vperm.xlu1 %2884, %v1846_v7   ;;  %1992 = vperm.xlu0 %2883, %v1854_v0   ;;  %v4880_v7 = vld [vmem:[#allocation11_spill] sm:$0xff] }
 0x477   :  { %1877 = vperm.xlu1 %2884, %v1831_v6   ;;  %1917 = vperm.xlu0 %2883, %v1839_v15   ;;  %v4881_v6 = vld [vmem:[#allocation10_spill] sm:$0xff] }
 0x47b   :  { %1957 = vperm.xlu1 %2884, %v1847_v48   ;;  %1997 = vperm.xlu0 %2883, %v1855_v57   ;;  %v4882_v48 = vld [vmem:[#allocation12_spill] sm:$0xff] }
 0x47f   :  { %1882 = vperm.xlu1 %2884, %v1832_v22   ;;  %1922 = vperm.xlu0 %2883, %v1840_v29   ;;  %v4883_v22 = vld [vmem:[#allocation20_spill] sm:$0xff] }
 0x483   :  { %1962 = vperm.xlu1 %2884, %v1848_v40   ;;  %2002 = vperm.xlu0 %2883, %v1856_v30  }
 0x487   :  { %1887 = vperm.xlu1 %2884, %v1833_v39   ;;  %1927 = vperm.xlu0 %2883, %v1841_v52   ;;  %v4884_v39 = vld [vmem:[#allocation16_spill] sm:$0xff] }
 0x48b   :  { %1967 = vperm.xlu1 %2884, %v1849_v1   ;;  %2007 = vperm.xlu0 %2883, %v1857_v47   ;;  %v4885_v1 = vld [vmem:[#allocation15_spill] sm:$0xff] }
 0x48f   :  { %1892 = vperm.xlu1 %2884, %v1834_v21   ;;  %1932 = vperm.xlu0 %2883, %v1842_v16   ;;  %v4886_v21 = vld [vmem:[#allocation14_spill] sm:$0xff] }
 0x493   :  { %1972 = vperm.xlu1 %2884, %v1850_v10   ;;  %2012 = vperm.xlu0 %2883, %v1858_v49   ;;  %v4887_v10 = vld [vmem:[#allocation22_spill] sm:$0xff] }
 0x497   :  { %1897 = vperm.xlu1 %2884, %v1835_v32   ;;  %1937 = vperm.xlu0 %2883, %v1843_v37  }
 0x49b   :  { %1977 = vperm.xlu1 %2884, %v1851_v34   ;;  %2017 = vperm.xlu0 %2883, %v1859_v12  }
 0x4de   :  { %v1868_v17 = vpop.permute.xlu1 %1867  ;;  %v1863_v19 = vpop.permute.xlu0 %1862 }
 0x4df   :  { %v2021_v60 = vmul.f32 %v1868_v17, %v4846_v63  ;;  %v2020_v3 = vmul.f32 %v1863_v19, %v4847_v42  ;;  %v4888_v17 = vld [vmem:[#allocation27_spill] sm:$0xff] }
 0x4e1   :  { %v2052_v40 = vadd.f32 %v2021_v60, %v2020_v3  ;;  %v4892_v60 = vld [vmem:[#allocation31_spill] sm:$0xff]  ;;  %v4893_v3 = vld [vmem:[#allocation30_spill] sm:$0xff] }
 0x4e2   :  { %v1903_v36 = vpop.permute.xlu1 %1902  ;;  %v1908_v13 = vpop.permute.xlu0 %1907 }
 0x4e3   :  { %v2028_v54 = vmul.f32 %v1903_v36, %v4876_v26  ;;  %v2029_v31 = vmul.f32 %v1908_v13, %v4877_v25  ;;  %v4889_v36 = vld [vmem:[#allocation19_spill] sm:$0xff] }
 0x4e5   :  { %v2065_v30 = vadd.f32 %v2029_v31, %v2028_v54 }
 0x4e6   :  { %v1943_v38 = vpop.permute.xlu1 %1942  ;;  %v1948_v5 = vpop.permute.xlu0 %1947 }
 0x4e7   :  { %v2036_v0 = vmul.f32 %v1943_v38, %v4880_v7  ;;  %v2037_v15 = vmul.f32 %v1948_v5, %v4881_v6 }
 0x4e9   :  { %v2078_v38 = vadd.f32 %v2037_v15, %v2036_v0 }
 0x4ea   :  { %v1983_v41 = vpop.permute.xlu1 %1982  ;;  %v1988_v8 = vpop.permute.xlu0 %1987 }
 0x4eb   :  { %v2044_v57 = vmul.f32 %v1983_v41, %v4882_v48  ;;  %v2045_v29 = vmul.f32 %v1988_v8, %v4883_v22  ;;  %v4890_v41 = vld [vmem:[#allocation18_spill] sm:$0xff] }
 0x4ed   :  { %v2091_v5 = vadd.f32 %v2045_v29, %v2044_v57  ;;  %v4896_v57 = vld [vmem:[#allocation35_spill] sm:$0xff]  ;;  %v4897_v29 = vld [vmem:[#allocation34_spill] sm:$0xff] }
 0x4ee   :  { %v1873_v45 = vpop.permute.xlu1 %1872  ;;  %v1913_v23 = vpop.permute.xlu0 %1912 }
 0x4ef   :  { %v2022_v24 = vmul.f32 %v1873_v45, %v4878_v62  ;;  %v2030_v27 = vmul.f32 %v1913_v23, %v4879_v9  ;;  %v4891_v45 = vld [vmem:[#allocation17_spill] sm:$0xff] }
 0x4f1   :  { %v2053_v34 = vadd.f32 %v2052_v40, %v2022_v24  ;;  %v2066_v12 = vadd.f32 %v2065_v30, %v2030_v27  ;;  %v4894_v24 = vld [vmem:[#allocation29_spill] sm:$0xff]  ;;  %v4895_v40 = vld [vmem:[#allocation28_spill] sm:$0xff] }
 0x4f2   :  { %v1953_v55 = vpop.permute.xlu1 %1952  ;;  %v1993_v28 = vpop.permute.xlu0 %1992 }
 0x4f3   :  { %v2038_v16 = vmul.f32 %v1953_v55, %v4886_v21  ;;  %v2046_v49 = vmul.f32 %v1993_v28, %v4887_v10 }
 0x4f5   :  { %v2079_v54 = vadd.f32 %v2078_v38, %v2038_v16  ;;  %v2092_v31 = vadd.f32 %v2091_v5, %v2046_v49  ;;  %v4900_v5 = vld [vmem:[#allocation37_spill] sm:$0xff] }
 0x4f6   :  { %v1878_v51 = vpop.permute.xlu1 %1877  ;;  %v1918_v18 = vpop.permute.xlu0 %1917 }
 0x4f7   :  { %v2023_v52 = vmul.f32 %v1878_v51, %v4884_v39  ;;  %v2031_v47 = vmul.f32 %v1918_v18, %v4885_v1 }
 0x4f9   :  { %v2054_v51 = vadd.f32 %v2053_v34, %v2023_v52  ;;  %v2067_v18 = vadd.f32 %v2066_v12, %v2031_v47  ;;  %v4898_v34 = vld [vmem:[#allocation33_spill] sm:$0xff]  ;;  %v4899_v12 = vld [vmem:[#allocation32_spill] sm:$0xff] }
 0x4fa   :  { %v1958_v46 = vpop.permute.xlu1 %1957  ;;  %v1998_v43 = vpop.permute.xlu0 %1997 }
 0x4fb   :  { %v2039_v8 = vmul.f32 %v1958_v46, %v4890_v41  ;;  %v2047_v23 = vmul.f32 %v1998_v43, %v4891_v45 }
 0x4fd   :  { %v2080_v52 = vadd.f32 %v2079_v54, %v2039_v8  ;;  %v2093_v47 = vadd.f32 %v2092_v31, %v2047_v23  ;;  %v4903_v8 = vld [vmem:[#allocation38_spill] sm:$0xff] }
 0x4fe   :  { %v1883_v44 = vpop.permute.xlu1 %1882  ;;  %v1923_v14 = vpop.permute.xlu0 %1922 }
 0x4ff   :  { %v2024_v19 = vmul.f32 %v1883_v44, %v4888_v17  ;;  %v2032_v13 = vmul.f32 %v1923_v14, %v4889_v36 }
 0x501   :  { %v2055_v0 = vadd.f32 %v2054_v51, %v2024_v19  ;;  %v2068_v15 = vadd.f32 %v2067_v18, %v2032_v13  ;;  %v4902_v18 = vld [vmem:[#allocation39_spill] sm:$0xff] }
 0x502   :  { %v1963_v61 = vpop.permute.xlu1 %1962  ;;  %v2003_v53 = vpop.permute.xlu0 %2002 }
 0x503   :  { %v2040_v27 = vmul.f32 %v1963_v61, %v4894_v24  ;;  %v2048_v44 = vmul.f32 %v2003_v53, %v4895_v40 }
 0x505   :  { %v2081_v38 = vadd.f32 %v2080_v52, %v2040_v27  ;;  %v2094_v61 = vadd.f32 %v2093_v47, %v2048_v44  ;;  %v4905_v52 = vld [vmem:[#allocation40_spill] sm:$0xff] }
 0x506   :  { %v1888_v20 = vpop.permute.xlu1 %1887  ;;  %v1928_v11 = vpop.permute.xlu0 %1927 }
 0x507   :  { %v2025_v55 = vmul.f32 %v1888_v20, %v4892_v60  ;;  %v2033_v28 = vmul.f32 %v1928_v11, %v4893_v3 }
 0x509   :  { %v2056_v16 = vadd.f32 %v2055_v0, %v2025_v55  ;;  %v2069_v49 = vadd.f32 %v2068_v15, %v2033_v28  ;;  %v4904_v15 = vld [vmem:[#allocation41_spill] sm:$0xff] }
 0x50a   :  { %v1968_v33 = vpop.permute.xlu1 %1967  ;;  %v2008_v56 = vpop.permute.xlu0 %2007 }
 0x50b   :  { %v2041_v20 = vmul.f32 %v1968_v33, %v4898_v34  ;;  %v2049_v11 = vmul.f32 %v2008_v56, %v4899_v12 }
 0x50d   :  { %v2082_v54 = vadd.f32 %v2081_v38, %v2041_v20  ;;  %v2095_v33 = vadd.f32 %v2094_v61, %v2049_v11 }
 0x50e   :  { %v1893_v32 = vpop.permute.xlu1 %1892  ;;  %v1933_v37 = vpop.permute.xlu0 %1932 }
 0x50f   :  { %v2026_v46 = vmul.f32 %v1893_v32, %v4896_v57  ;;  %v2034_v43 = vmul.f32 %v1933_v37, %v4897_v29 }
 0x511   :  { %v2057_v51 = vadd.f32 %v2056_v16, %v2026_v46  ;;  %v2070_v32 = vadd.f32 %v2069_v49, %v2034_v43 }
 0x512   :  { %v1973_v30 = vpop.permute.xlu1 %1972  ;;  %v2013_v14 = vpop.permute.xlu0 %2012 }
 0x513   :  { %v2042_v53 = vmul.f32 %v1973_v30, %v4900_v5  ;;  %v2050_v58 = vmul.f32 %v2013_v14, %v4901_v50 }
 0x515   :  { %v2083_v55 = vadd.f32 %v2082_v54, %v2042_v53  ;;  %v2096_v28 = vadd.f32 %v2095_v33, %v2050_v58 }
 0x516   :  { %v1898_v19 = vpop.permute.xlu1 %1897  ;;  %v1938_v13 = vpop.permute.xlu0 %1937 }
 0x517   :  { %v2027_v37 = vmul.f32 %v1898_v19, %v4902_v18  ;;  %v2035_v23 = vmul.f32 %v1938_v13, %v4903_v8 }
 0x519   :  { %v2058_v31 = vadd.f32 %v2057_v51, %v2027_v37  ;;  %v2071_v56 = vadd.f32 %v2070_v32, %v2035_v23 }
 0x51a   :  { %v1978_v27 = vpop.permute.xlu1 %1977  ;;  %v2018_v44 = vpop.permute.xlu0 %2017 }
 0x51b   :  { %v2059_v0 = vrot.slane %v2058_v31, 4  ;;  %v2072_v30 = vrot.slane %v2071_v56, 4  ;;  %v2043_v14 = vmul.f32 %v1978_v27, %v4904_v15  ;;  %v2051_v47 = vmul.f32 %v2018_v44, %v4905_v52 }
 0x51d   :  { %v2060_v46 = vadd.f32 %v2059_v0, %v2058_v31  ;;  %v2073_v43 = vadd.f32 %v2072_v30, %v2071_v56  ;;  %v2084_v16 = vadd.f32 %v2083_v55, %v2043_v14  ;;  %v2097_v49 = vadd.f32 %v2096_v28, %v2051_v47  ;;  %v4906_v31 = vld [vmem:[#allocation51_spill] sm:$0xff] }
 0x51e   :  { %v4907_v55 = vld [vmem:[#allocation47_spill] sm:$0xff] }
 0x51f   :  { %v2061_v19 = vrot.slane %v2060_v46, 2  ;;  %v2074_v13 = vrot.slane %v2073_v43, 2  ;;  %v2085_v20 = vrot.slane %v2084_v16, 4  ;;  %v2098_v11 = vrot.slane %v2097_v49, 4 }
 0x521   :  { %v2062_v38 = vadd.f32 %v2061_v19, %v2060_v46  ;;  %v2075_v61 = vadd.f32 %v2074_v13, %v2073_v43  ;;  %v2086_v53 = vadd.f32 %v2085_v20, %v2084_v16  ;;  %v2099_v58 = vadd.f32 %v2098_v11, %v2097_v49  ;;  %v4908_v49 = vld [vmem:[#allocation24_spill] sm:$0xff]  ;;  %v4909_v13 = vld [vmem:[#allocation26_spill] sm:$0xff] }
 0x523   :  { %v2063_v51 = vrot.slane %v2062_v38, 1  ;;  %v2076_v32 = vrot.slane %v2075_v61, 1  ;;  %v2087_v37 = vrot.slane %v2086_v53, 2  ;;  %v2100_v23 = vrot.slane %v2099_v58, 2 }
 0x525   :  { %v2064_v54 = vadd.f32 %v2063_v51, %v2062_v38  ;;  %v2077_v33 = vadd.f32 %v2076_v32, %v2075_v61  ;;  %v2088_v27 = vadd.f32 %v2087_v37, %v2086_v53  ;;  %v2101_v44 = vadd.f32 %v2100_v23, %v2099_v58 }
 0x527   :  { %v2104_v56 = vadd.f32 %v2064_v54, %v4906_v31  ;;  %v2105_v28 = vadd.f32 %v2077_v33, %v4907_v55  ;;  %v2089_v0 = vrot.slane %v2088_v27, 1  ;;  %v2102_v30 = vrot.slane %v2101_v44, 1 }
 0x529   :  { %v2108_v14 = vmax.f32 %v2104_v56, %v2105_v28  ;;  %v2090_v47 = vadd.f32 %v2089_v0, %v2088_v27  ;;  %v2103_v46 = vadd.f32 %v2102_v30, %v2101_v44 }
 0x52b   :  { %v2110_v43 = vsub.f32 %v2104_v56, %v2108_v14  ;;  %v2111_v16 = vsub.f32 %v2105_v28, %v2108_v14  ;;  %v2106_v19 = vadd.f32 %v2090_v47, %v4908_v49  ;;  %v2107_v20 = vadd.f32 %v2103_v46, %v4909_v13 }
 0x52d   :  { %v2116_v11 = vmul.f32 1.442695, %v2111_v16  ;;  %v2109_v38 = vmax.f32 %v2106_v19, %v2107_v20  ;;  %v2114_v61 = vmul.f32 1.442695, %v2110_v43 }
 0x52f   :  { %v2112_v53 = vsub.f32 %v2106_v19, %v2109_v38  ;;  %v2113_v58 = vsub.f32 %v2107_v20, %v2109_v38  ;;  %2913 = vpow2.f32 %v2116_v11 }
 0x530   :  { %2915 = vpow2.f32 %v2114_v61 }
 0x531   :  { %v2120_v51 = vmul.f32 1.442695, %v2113_v58  ;;  %v2118_v32 = vmul.f32 1.442695, %v2112_v53 }
 0x533   :  { %2917 = vpow2.f32 %v2120_v51 }
 0x534   :  { %2919 = vpow2.f32 %v2118_v32 }
 0x539   :  { %v2914_v37 = vpop.eup %2913 }
 0x53a   :  { %v2126_v23 = vrot.slane %v2914_v37, 7  ;;  %v2916_v54 = vpop.eup %2915 }
 0x53c   :  { %v2127_v33 = vsel %vm1077_vm7, %v2126_v23, %v2916_v54 }
 0x53d   :  { %v2918_v27 = vpop.eup %2917  ;;  %v2132_v44 = vsel %vm1425_vm9, %v2127_v33, 0.0 }
 0x53e   :  { %v2133_v31 = vrot.slane %v2132_v44, 4  ;;  %v2128_v56 = vrot.slane %v2918_v27, 7  ;;  %v2920_v55 = vpop.eup %2919 }
 0x540   :  { %v2134_v28 = vadd.f32 %v2133_v31, %v2132_v44  ;;  %v2129_v0 = vsel %vm1077_vm7, %v2128_v56, %v2920_v55 }
 0x541   :  { %v2139_v30 = vsel %vm1425_vm9, %v2129_v0, 0.0 }
 0x542   :  { %v2135_v14 = vrot.slane %v2134_v28, 2  ;;  %v2140_v47 = vrot.slane %v2139_v30, 4 }
 0x544   :  { %v2136_v46 = vadd.f32 %v2135_v14, %v2134_v28  ;;  %v2141_v43 = vadd.f32 %v2140_v47, %v2139_v30 }
 0x546   :  { %v2137_v16 = vrot.slane %v2136_v46, 1  ;;  %v2142_v49 = vrot.slane %v2141_v43, 2 }
 0x548   :  { %v2138_v19 = vadd.f32 %v2137_v16, %v2136_v46  ;;  %v2143_v13 = vadd.f32 %v2142_v49, %v2141_v43 }
 0x54a   :  { %v2149_v20 = vrot.slane %v2138_v19, %v3029_v2  ;;  %v2144_v11 = vrot.slane %v2143_v13, 1 }
 0x54c   :  { %2921 = vrcp.f32 %v2149_v20  ;;  %v2145_v38 = vadd.f32 %v2144_v11, %v2143_v13 }
 0x54e   :  { %v2153_v61 = vrot.slane %v2145_v38, %v3029_v2 }
 0x550   :  { %2923 = vrcp.f32 %v2153_v61 }
 0x556   :  { %v2922_v53 = vpop.eup %2921 }
 0x557   :  { %v2155_v58 = vmul.f32 %v2922_v53, %v2916_v54  ;;  %v2156_v51 = vmul.f32 %v2922_v53, %v2914_v37 }
 0x559   :  { %v4230_v32 = vrot.slane %v2155_v58, %v3029_v2  ;;  %v2167_v33 = vrot.slane %v2156_v51, %v3029_v2 }
 0x55a   :  { %v2924_v23 = vpop.eup %2923 }
 0x55b   :  { %v2158_v44 = vmul.f32 %v2924_v23, %v2920_v55  ;;  %v2177_v31 = vmul.f32 %v4230_v32, %v4846_v63  ;;  %v2176_v56 = vmul.f32 %v4230_v32, %v4847_v42  ;;  %v2159_v28 = vmul.f32 %v2924_v23, %v2918_v27 }
 0x55c   :  { %v2184_v37 = vmul.f32 %v2167_v33, %v4876_v26  ;;  %v2185_v54 = vmul.f32 %v2167_v33, %v4877_v25  ;;  %v2186_v26 = vmul.f32 %v2167_v33, %v4879_v9  ;;  %v2178_v25 = vmul.f32 %v4230_v32, %v4878_v62 }
 0x55d   :  { %2210 = vadd.xlane.f32.xlu0 %v2177_v31  ;;  %2208 = vadd.xlane.f32.xlu1 %v2176_v56  ;;  %v2171_v0 = vrot.slane %v2158_v44, %v3029_v2  ;;  %v2175_v30 = vrot.slane %v2159_v28, %v3029_v2  ;;  %v2188_v62 = vmul.f32 %v2167_v33, %v4889_v36 }
 0x55f   :  { %v2193_v55 = vmul.f32 %v2171_v0, %v4881_v6  ;;  %v2192_v63 = vmul.f32 %v2171_v0, %v4880_v7  ;;  %v2201_v42 = vmul.f32 %v2175_v30, %v4883_v22  ;;  %v2200_v27 = vmul.f32 %v2175_v30, %v4882_v48 }
 0x560   :  { %v2202_v14 = vmul.f32 %v2175_v30, %v4887_v10  ;;  %v2194_v6 = vmul.f32 %v2171_v0, %v4886_v21  ;;  %v2187_v7 = vmul.f32 %v2167_v33, %v4885_v1  ;;  %v2179_v48 = vmul.f32 %v4230_v32, %v4884_v39 }
 0x561   :  { %2224 = vadd.xlane.f32.xlu0 %v2184_v37  ;;  %2226 = vadd.xlane.f32.xlu1 %v2185_v54  ;;  %v2203_v9 = vmul.f32 %v2175_v30, %v4891_v45  ;;  %v2195_v22 = vmul.f32 %v2171_v0, %v4890_v41  ;;  %v2180_v21 = vmul.f32 %v4230_v32, %v4888_v17 }
 0x562   :  { %v2204_v1 = vmul.f32 %v2175_v30, %v4895_v40  ;;  %v2196_v10 = vmul.f32 %v2171_v0, %v4894_v24  ;;  %v2189_v39 = vmul.f32 %v2167_v33, %v4893_v3  ;;  %v2181_v41 = vmul.f32 %v4230_v32, %v4892_v60 }
 0x563   :  { %v2205_v36 = vmul.f32 %v2175_v30, %v4899_v12  ;;  %v2197_v45 = vmul.f32 %v2171_v0, %v4898_v34  ;;  %v2190_v17 = vmul.f32 %v2167_v33, %v4897_v29  ;;  %v2182_v24 = vmul.f32 %v4230_v32, %v4896_v57 }
 0x564   :  { %v2206_v3 = vmul.f32 %v2175_v30, %v4901_v50  ;;  %v2198_v40 = vmul.f32 %v2171_v0, %v4900_v5  ;;  %v2191_v60 = vmul.f32 %v2167_v33, %v4903_v8  ;;  %v2183_v34 = vmul.f32 %v4230_v32, %v4902_v18 }
 0x565   :  { %2242 = vadd.xlane.f32.xlu1 %v2193_v55  ;;  %2240 = vadd.xlane.f32.xlu0 %v2192_v63  ;;  %v2207_v29 = vmul.f32 %v2175_v30, %v4905_v52  ;;  %v2199_v12 = vmul.f32 %v2171_v0, %v4904_v15  ;;  %v4910_v0 = vld [vmem:[#allocation44_spill] sm:$0xff]  ;;  %v4911_v63 = vld [vmem:[#allocation43_spill] sm:$0xff] }
 0x569   :  { %2258 = vadd.xlane.f32.xlu1 %v2201_v42  ;;  %2256 = vadd.xlane.f32.xlu0 %v2200_v27 }
 0x56d   :  { %2228 = vadd.xlane.f32.xlu1 %v2186_v26  ;;  %2212 = vadd.xlane.f32.xlu0 %v2178_v25 }
 0x571   :  { %2260 = vadd.xlane.f32.xlu1 %v2202_v14  ;;  %2244 = vadd.xlane.f32.xlu0 %v2194_v6 }
 0x575   :  { %2230 = vadd.xlane.f32.xlu1 %v2187_v7  ;;  %2214 = vadd.xlane.f32.xlu0 %v2179_v48 }
 0x579   :  { %2262 = vadd.xlane.f32.xlu1 %v2203_v9  ;;  %2246 = vadd.xlane.f32.xlu0 %v2195_v22 }
 0x57d   :  { %2232 = vadd.xlane.f32.xlu1 %v2188_v62  ;;  %2216 = vadd.xlane.f32.xlu0 %v2180_v21 }
 0x581   :  { %2264 = vadd.xlane.f32.xlu1 %v2204_v1  ;;  %2248 = vadd.xlane.f32.xlu0 %v2196_v10 }
 0x585   :  { %2234 = vadd.xlane.f32.xlu1 %v2189_v39  ;;  %2218 = vadd.xlane.f32.xlu0 %v2181_v41  ;;  %v4912_v39 = vld [vmem:[#allocation45_spill] sm:$0xff] }
 0x589   :  { %2266 = vadd.xlane.f32.xlu1 %v2205_v36  ;;  %2250 = vadd.xlane.f32.xlu0 %v2197_v45 }
 0x58d   :  { %2236 = vadd.xlane.f32.xlu1 %v2190_v17  ;;  %2220 = vadd.xlane.f32.xlu0 %v2182_v24 }
 0x591   :  { %2268 = vadd.xlane.f32.xlu1 %v2206_v3  ;;  %2252 = vadd.xlane.f32.xlu0 %v2198_v40 }
 0x595   :  { %2238 = vadd.xlane.f32.xlu1 %v2191_v60  ;;  %2222 = vadd.xlane.f32.xlu0 %v2183_v34 }
 0x599   :  { %2270 = vadd.xlane.f32.xlu1 %v2207_v29  ;;  %2254 = vadd.xlane.f32.xlu0 %v2199_v12 }
 0x5ea   :  { %v4275_v57 = vpop.xlane.xlu1 %2208  ;;  %v4277_v50 = vpop.xlane.xlu0 %2210 }
 0x5eb   :  { %v2272_v51 = vmul.f32 %v4275_v57, %v4275_v57  ;;  %v2273_v32 = vmul.f32 %v4277_v50, %v4277_v50 }
 0x5ed   :  { %v2339_v37 = vrot.slane %v2272_v51, %v4910_v0  ;;  %v2343_v42 = vrot.slane %v2273_v32, %v4911_v63  ;;  %v4913_v51 = vld [vmem:[#allocation46_spill] sm:$0xff] }
 0x5ee   :  { %v4279_v5 = vpop.xlane.xlu1 %2226  ;;  %v4281_v47 = vpop.xlane.xlu0 %2224 }
 0x5ef   :  { %v2281_v23 = vmul.f32 %v4279_v5, %v4279_v5  ;;  %v2280_v33 = vmul.f32 %v4281_v47, %v4281_v47  ;;  %v2344_v36 = vsel %vm916_vm0, %v2343_v42, %v2339_v37 }
 0x5f1   :  { %v2382_v27 = vrot.slane %v2281_v23, %v4911_v63  ;;  %v2378_v26 = vrot.slane %v2280_v33, %v4910_v0 }
 0x5f2   :  { %v4283_v8 = vpop.xlane.xlu1 %2242  ;;  %v4285_v46 = vpop.xlane.xlu0 %2240 }
 0x5f3   :  { %v2289_v44 = vmul.f32 %v4283_v8, %v4283_v8  ;;  %v2288_v31 = vmul.f32 %v4285_v46, %v4285_v46  ;;  %v2383_v3 = vsel %vm916_vm0, %v2382_v27, %v2378_v26 }
 0x5f5   :  { %v2421_v14 = vrot.slane %v2289_v44, %v4911_v63  ;;  %v2417_v6 = vrot.slane %v2288_v31, %v4910_v0 }
 0x5f6   :  { %v4287_v18 = vpop.xlane.xlu1 %2258  ;;  %v4289_v43 = vpop.xlane.xlu0 %2256 }
 0x5f7   :  { %v2297_v54 = vmul.f32 %v4287_v18, %v4287_v18  ;;  %v2296_v30 = vmul.f32 %v4289_v43, %v4289_v43  ;;  %v2422_v40 = vsel %vm916_vm0, %v2421_v14, %v2417_v6 }
 0x5f9   :  { %v2460_v1 = vrot.slane %v2297_v54, %v4911_v63  ;;  %v2456_v10 = vrot.slane %v2296_v30, %v4910_v0 }
 0x5fa   :  { %v4291_v52 = vpop.xlane.xlu1 %2228  ;;  %v4293_v15 = vpop.xlane.xlu0 %2212 }
 0x5fb   :  { %v2282_v55 = vmul.f32 %v4291_v52, %v4291_v52  ;;  %v2274_v25 = vmul.f32 %v4293_v15, %v4293_v15  ;;  %v2461_v31 = vsel %vm916_vm0, %v2460_v1, %v2456_v10 }
 0x5fd   :  { %v2387_v41 = vrot.slane %v2282_v55, %v4912_v39  ;;  %v2348_v45 = vrot.slane %v2274_v25, %v4912_v39 }
 0x5fe   :  { %v4295_v16 = vpop.xlane.xlu1 %2260  ;;  %v4297_v49 = vpop.xlane.xlu0 %2244 }
 0x5ff   :  { %v2298_v7 = vmul.f32 %v4295_v16, %v4295_v16  ;;  %v2290_v48 = vmul.f32 %v4297_v49, %v4297_v49  ;;  %v2388_v37 = vsel %vm923_vm1, %v2387_v41, %v2383_v3  ;;  %v2349_v55 = vsel %vm923_vm1, %v2348_v45, %v2344_v36 }
 0x601   :  { %v2465_v60 = vrot.slane %v2298_v7, %v4912_v39  ;;  %v2426_v34 = vrot.slane %v2290_v48, %v4912_v39 }
 0x602   :  { %v4299_v19 = vpop.xlane.xlu1 %2230  ;;  %v4301_v13 = vpop.xlane.xlu0 %2214 }
 0x603   :  { %v2283_v62 = vmul.f32 %v4299_v19, %v4299_v19  ;;  %v2275_v21 = vmul.f32 %v4301_v13, %v4301_v13  ;;  %v2466_v25 = vsel %vm923_vm1, %v2465_v60, %v2461_v31  ;;  %v2427_v14 = vsel %vm923_vm1, %v2426_v34, %v2422_v40 }
 0x605   :  { %v2392_v32 = vrot.slane %v2283_v62, %v4913_v51  ;;  %v2353_v23 = vrot.slane %v2275_v21, %v4913_v51 }
 0x606   :  { %v4303_v20 = vpop.xlane.xlu1 %2262  ;;  %v4305_v11 = vpop.xlane.xlu0 %2246 }
 0x607   :  { %v2299_v17 = vmul.f32 %v4303_v20, %v4303_v20  ;;  %v2291_v24 = vmul.f32 %v4305_v11, %v4305_v11  ;;  %v2393_v21 = vsel %vm930_vm2, %v2392_v32, %v2388_v37  ;;  %v2354_v1 = vsel %vm930_vm2, %v2353_v23, %v2349_v55 }
 0x609   :  { %v2470_v42 = vrot.slane %v2299_v17, %v4913_v51  ;;  %v2431_v27 = vrot.slane %v2291_v24, %v4913_v51 }
 0x60a   :  { %v4307_v38 = vpop.xlane.xlu1 %2232  ;;  %v4309_v61 = vpop.xlane.xlu0 %2216 }
 0x60b   :  { %v2284_v33 = vmul.f32 %v4307_v38, %v4307_v38  ;;  %v2276_v44 = vmul.f32 %v4309_v61, %v4309_v61  ;;  %v2471_v3 = vsel %vm930_vm2, %v2470_v42, %v2466_v25  ;;  %v2432_v40 = vsel %vm930_vm2, %v2431_v27, %v2427_v14 }
 0x60d   :  { %v2397_v10 = vrot.slane %v2284_v33, %v3653_v35  ;;  %v2358_v41 = vrot.slane %v2276_v44, %v3653_v35 }
 0x60e   :  { %v4311_v53 = vpop.xlane.xlu1 %2264  ;;  %v4313_v58 = vpop.xlane.xlu0 %2248 }
 0x60f   :  { %v2300_v54 = vmul.f32 %v4311_v53, %v4311_v53  ;;  %v2292_v45 = vmul.f32 %v4313_v58, %v4313_v58 }
 0x611   :  { %v2475_v36 = vrot.slane %v2300_v54, %v3653_v35  ;;  %v2398_v54 = vsel %vm937_vm3, %v2397_v10, %v2393_v21  ;;  %v4914_v21 = vld [vmem:[#allocation50_spill] sm:$0xff] }
 0x612   :  { %v4327_v56 = vpop.xlane.xlu1 %2234  ;;  %v4329_v28 = vpop.xlane.xlu0 %2218 }
 0x613   :  { %v2285_v30 = vmul.f32 %v4327_v56, %v4327_v56  ;;  %v2277_v26 = vmul.f32 %v4329_v28, %v4329_v28  ;;  %v2476_v27 = vsel %vm937_vm3, %v2475_v36, %v2471_v3 }
 0x615   :  { %v2402_v17 = vrot.slane %v2285_v30, %v4872_v4  ;;  %v2363_v60 = vrot.slane %v2277_v26, %v4872_v4  ;;  %v2359_v30 = vsel %vm937_vm3, %v2358_v41, %v2354_v1  ;;  %v2436_v26 = vrot.slane %v2292_v45, %v3653_v35 }
 0x616   :  { %v4349_v9 = vpop.xlane.xlu1 %2266  ;;  %v4351_v22 = vpop.xlane.xlu0 %2250 }
 0x617   :  { %v2301_v24 = vmul.f32 %v4349_v9, %v4349_v9  ;;  %v2293_v34 = vmul.f32 %v4351_v22, %v4351_v22  ;;  %v2403_v25 = vsel %vm944_vm4, %v2402_v17, %v2398_v54 }
 0x619   :  { %v2480_v14 = vrot.slane %v2301_v24, %v4872_v4 }
 0x61a   :  { %v4370_v29 = vpop.xlane.xlu1 %2236  ;;  %v4372_v12 = vpop.xlane.xlu0 %2220 }
 0x61b   :  { %v2286_v6 = vmul.f32 %v4370_v29, %v4370_v29  ;;  %v2278_v7 = vmul.f32 %v4372_v12, %v4372_v12 }
 0x61d   :  { %v2407_v32 = vrot.slane %v2286_v6, %v4873_v59  ;;  %v2368_v23 = vrot.slane %v2278_v7, %v4873_v59  ;;  %v2364_v6 = vsel %vm944_vm4, %v2363_v60, %v2359_v30  ;;  %v2441_v7 = vrot.slane %v2293_v34, %v4872_v4 }
 0x61e   :  { %v4397_v48 = vpop.xlane.xlu1 %2268  ;;  %v4399_v62 = vpop.xlane.xlu0 %2252 }
 0x61f   :  { %v2302_v33 = vmul.f32 %v4397_v48, %v4397_v48  ;;  %v2294_v44 = vmul.f32 %v4399_v62, %v4399_v62  ;;  %v2369_v45 = vsel %vm951_vm5, %v2368_v23, %v2364_v6  ;;  %v2408_v17 = vsel %vm951_vm5, %v2407_v32, %v2403_v25 }
 0x621   :  { %v2485_v41 = vrot.slane %v2302_v33, %v4873_v59  ;;  %v2446_v51 = vrot.slane %v2294_v44, %v4873_v59  ;;  %v2437_v33 = vsel %vm937_vm3, %v2436_v26, %v2432_v40  ;;  %v2481_v44 = vsel %vm944_vm4, %v2480_v14, %v2476_v27 }
 0x622   :  { %v4422_v31 = vpop.xlane.xlu1 %2238  ;;  %v4424_v37 = vpop.xlane.xlu0 %2222  ;;  %v2442_v23 = vsel %vm944_vm4, %v2441_v7, %v2437_v33 }
 0x623   :  { %v2287_v55 = vmul.f32 %v4422_v31, %v4422_v31  ;;  %v2279_v42 = vmul.f32 %v4424_v37, %v4424_v37  ;;  %v2486_v25 = vsel %vm951_vm5, %v2485_v41, %v2481_v44 }
 0x625   :  { %v2412_v1 = vrot.slane %v2287_v55, %v4914_v21  ;;  %v2373_v10 = vrot.slane %v2279_v42, %v4914_v21  ;;  %v2447_v42 = vsel %vm951_vm5, %v2446_v51, %v2442_v23 }
 0x626   :  { %v4442_v39 = vpop.xlane.xlu1 %2270  ;;  %v4444_v36 = vpop.xlane.xlu0 %2254 }
 0x627   :  { %v2303_v24 = vmul.f32 %v4442_v39, %v4442_v39  ;;  %v2295_v3 = vmul.f32 %v4444_v36, %v4444_v36  ;;  %v2374_v60 = vsel %vm958_vm6, %v2373_v10, %v2369_v45  ;;  %v2413_v34 = vsel %vm958_vm6, %v2412_v1, %v2408_v17 }
 0x628   :  { %v2492_v54 = vsel %vm1077_vm7, %v2413_v34, %v2374_v60 }
 0x629   :  { %v2490_v32 = vrot.slane %v2303_v24, %v4914_v21  ;;  %v2451_v30 = vrot.slane %v2295_v3, %v4914_v21  ;;  %v2496_v55 = vsel %vm1082_vm8, %v2492_v54, 0.0 }
 0x62a   :  { %2497 = vadd.xlane.f32.xlu0 %v2496_v55 }
 0x62b   :  { %v2452_v6 = vsel %vm958_vm6, %v2451_v30, %v2447_v42  ;;  %v2491_v40 = vsel %vm958_vm6, %v2490_v32, %v2486_v25  ;;  %v4915_v25 = vld [vmem:[#allocation9_spill] sm:$0xff] }
 0x62c   :  { %v2493_v27 = vsel %vm1077_vm7, %v2491_v40, %v2452_v6 }
 0x62d   :  { %v2499_v26 = vsel %vm1082_vm8, %v2493_v27, 0.0 }
 0x62e   :  { %2500 = vadd.xlane.f32.xlu1 %v2499_v26 }
 0x6b7   :  { %v2498_v14 = vpop.xlane.xlu0 %2497 }
 0x6b8   :  { %2925 = vrsqrt.f32 %v2498_v14  ;;  %v2506_v7 = vadd.f32 1.0, %v2498_v14 }
 0x6ba   :  { %2927 = vrcp.f32 %v2506_v7 }
 0x6bb   :  { %v2501_v1 = vpop.xlane.xlu1 %2500 }
 0x6bc   :  { %2929 = vrsqrt.f32 %v2501_v1  ;;  %v2507_v10 = vadd.f32 1.0, %v2501_v1 }
 0x6be   :  { %2931 = vrcp.f32 %v2507_v10 }
 0x6c2   :  { %v2926_v45 = vpop.eup %2925 }
 0x6c3   :  { %v2504_v51 = vmul.f32 %v2926_v45, %v2498_v14 }
 0x6c4   :  { %v2928_v17 = vpop.eup %2927 }
 0x6c5   :  { %v2510_v41 = vmul.f32 %v2928_v17, %v2504_v51 }
 0x6c6   :  { %v2930_v34 = vpop.eup %2929 }
 0x6c7   :  { %v2517_v24 = vrot.slane %v2510_v41, %v3029_v2  ;;  %v2505_v33 = vmul.f32 %v2930_v34, %v2501_v1 }
 0x6c8   :  { %v2932_v23 = vpop.eup %2931 }
 0x6c9   :  { %v2535_v3 = vmul.f32 %v2517_v24, %v4277_v50  ;;  %v2534_v60 = vmul.f32 %v2517_v24, %v4275_v57  ;;  %v2536_v44 = vmul.f32 %v2517_v24, %v4293_v15  ;;  %v2537_v54 = vmul.f32 %v2517_v24, %v4301_v13 }
 0x6ca   :  { %v2511_v32 = vmul.f32 %v2932_v23, %v2505_v33  ;;  %v2538_v30 = vmul.f32 %v2517_v24, %v4309_v61  ;;  %v2539_v55 = vmul.f32 %v2517_v24, %v4329_v28  ;;  %v2540_v50 = vmul.f32 %v2517_v24, %v4372_v12 }
 0x6cb   :  { %2586 = vperm.xlu1 %2884, %v2535_v3   ;;  %2583 = vperm.xlu0 %2883, %v2534_v60   ;;  %v2541_v42 = vmul.f32 %v2517_v24, %v4424_v37 }
 0x6cc   :  { %v2525_v57 = vrot.slane %v2511_v32, %v3029_v2  ;;  %v2521_v2 = vrot.slane %v2510_v41, %v4915_v25 }
 0x6ce   :  { %v2550_v15 = vmul.f32 %v2525_v57, %v4285_v46  ;;  %v2551_v13 = vmul.f32 %v2525_v57, %v4283_v8  ;;  %v2552_v61 = vmul.f32 %v2525_v57, %v4297_v49  ;;  %v2553_v28 = vmul.f32 %v2525_v57, %v4305_v11 }
 0x6cf   :  { %2589 = vperm.xlu1 %2884, %v2536_v44   ;;  %2592 = vperm.xlu0 %2883, %v2537_v54   ;;  %v2554_v12 = vmul.f32 %v2525_v57, %v4313_v58  ;;  %v2555_v37 = vmul.f32 %v2525_v57, %v4351_v22  ;;  %v2529_v46 = vrot.slane %v2511_v32, %v4915_v25  ;;  %v4916_v44 = vld [vmem:[#allocation45_spill] sm:$0xff] }
 0x6d0   :  { %v2542_v8 = vmul.f32 %v2521_v2, %v4281_v47  ;;  %v2543_v6 = vmul.f32 %v2521_v2, %v4279_v5  ;;  %v2544_v58 = vmul.f32 %v2521_v2, %v4291_v52  ;;  %v2545_v40 = vmul.f32 %v2521_v2, %v4299_v19 }
 0x6d1   :  { %v2558_v49 = vmul.f32 %v2529_v46, %v4289_v43  ;;  %v2559_v11 = vmul.f32 %v2529_v46, %v4287_v18  ;;  %v2560_v22 = vmul.f32 %v2529_v46, %v4295_v16  ;;  %v2561_v47 = vmul.f32 %v2529_v46, %v4303_v20 }
 0x6d2   :  { %v2546_v5 = vmul.f32 %v2521_v2, %v4307_v38  ;;  %v2562_v43 = vmul.f32 %v2529_v46, %v4311_v53  ;;  %v2556_v18 = vmul.f32 %v2525_v57, %v4399_v62  ;;  %v2547_v52 = vmul.f32 %v2521_v2, %v4327_v56 }
 0x6d3   :  { %2595 = vperm.xlu1 %2884, %v2538_v30   ;;  %2598 = vperm.xlu0 %2883, %v2539_v55   ;;  %v2563_v16 = vmul.f32 %v2529_v46, %v4349_v9  ;;  %v2557_v19 = vmul.f32 %v2525_v57, %v4444_v36  ;;  %v2548_v20 = vmul.f32 %v2521_v2, %v4370_v29 }
 0x6d4   :  { %v2564_v38 = vmul.f32 %v2529_v46, %v4397_v48  ;;  %v2549_v53 = vmul.f32 %v2521_v2, %v4422_v31  ;;  %v2565_v62 = vmul.f32 %v2529_v46, %v4442_v39 }
 0x6d7   :  { %2601 = vperm.xlu1 %2884, %v2540_v50   ;;  %2604 = vperm.xlu0 %2883, %v2541_v42   ;;  %v4917_v50 = vld [vmem:[#allocation42_spill] sm:$0xff] }
 0x6d8   :  { %v2775_v42 = vadd.s32 4294967232, %v4917_v50 }
 0x6db   :  { %2607 = vperm.xlu1 %2884, %v2550_v15   ;;  %2610 = vperm.xlu0 %2883, %v2551_v13   ;;  %v2780_v15 = vadd.s32 4294967224, %v4917_v50 }
 0x6df   :  { %2613 = vperm.xlu1 %2884, %v2552_v61   ;;  %2616 = vperm.xlu0 %2883, %v2553_v28   ;;  %v4918_v61 = vld [vmem:[#allocation46_spill] sm:$0xff] }
 0x6e3   :  { %2619 = vperm.xlu1 %2884, %v2554_v12   ;;  %2622 = vperm.xlu0 %2883, %v2555_v37  }
 0x6e7   :  { %2728 = vperm.xlu1 %2884, %v2542_v8   ;;  %2731 = vperm.xlu0 %2883, %v2543_v6   ;;  %v2787_v6 = vadd.s32 4294967216, %v4917_v50 }
 0x6eb   :  { %2752 = vperm.xlu1 %2884, %v2558_v49   ;;  %2755 = vperm.xlu0 %2883, %v2559_v11   ;;  %v2794_v49 = vadd.s32 4294967208, %v4917_v50  ;;  %v4919_v11 = vld [vmem:[#allocation8_spill] sm:$0xff] }
 0x6ef   :  { %2734 = vperm.xlu1 %2884, %v2544_v58   ;;  %2758 = vperm.xlu0 %2883, %v2560_v22   ;;  %v2778_v58 = vsub.s32 %v2775_v42, %v4919_v11  ;;  %v2783_v22 = vsub.s32 %v2780_v15, %v4919_v11 }
 0x6f3   :  { %2737 = vperm.xlu1 %2884, %v2545_v40   ;;  %2761 = vperm.xlu0 %2883, %v2561_v47   ;;  %v2801_v40 = vadd.s32 4294967200, %v4917_v50 }
 0x6f7   :  { %2740 = vperm.xlu1 %2884, %v2546_v5   ;;  %2764 = vperm.xlu0 %2883, %v2562_v43   ;;  %v2808_v43 = vadd.s32 4294967192, %v4917_v50 }
 0x6fb   :  { %2625 = vperm.xlu1 %2884, %v2556_v18   ;;  %2743 = vperm.xlu0 %2883, %v2547_v52  }
 0x6ff   :  { %2767 = vperm.xlu1 %2884, %v2563_v16   ;;  %2628 = vperm.xlu0 %2883, %v2557_v19  }
 0x703   :  { %2746 = vperm.xlu1 %2884, %v2548_v20   ;;  %2770 = vperm.xlu0 %2883, %v2564_v38  }
 0x707   :  { %2749 = vperm.xlu1 %2884, %v2549_v53   ;;  %2773 = vperm.xlu0 %2883, %v2565_v62   ;;  %v2790_v53 = vsub.s32 %v2787_v6, %v4919_v11  ;;  %v2797_v62 = vsub.s32 %v2794_v49, %v4919_v11 }
 0x74a   :  { %v2587_v56 = vpop.permute.xlu1 %2586  ;;  %v2584_v27 = vpop.permute.xlu0 %2583 }
 0x74b   :  { %v2637_v34 = vrot.slane %v2587_v56, %v4911_v63  ;;  %v2633_v33 = vrot.slane %v2584_v27, %v4910_v0  ;;  %v2804_v56 = vsub.s32 %v2801_v40, %v4919_v11 }
 0x74d   :  { %v2638_v13 = vsel %vm916_vm0, %v2637_v34, %v2633_v33 }
 0x74e   :  { %v2590_v26 = vpop.permute.xlu1 %2589  ;;  %v2593_v9 = vpop.permute.xlu0 %2592 }
 0x74f   :  { %v2642_v54 = vrot.slane %v2590_v26, %v4916_v44  ;;  %v2647_v28 = vrot.slane %v2593_v9, %v4918_v61  ;;  %v2815_v26 = vadd.s32 4294967184, %v4917_v50 }
 0x751   :  { %v2643_v25 = vsel %vm923_vm1, %v2642_v54, %v2638_v13 }
 0x752   :  { %v2596_v14 = vpop.permute.xlu1 %2595  ;;  %v2599_v36 = vpop.permute.xlu0 %2598  ;;  %v2648_v47 = vsel %vm930_vm2, %v2647_v28, %v2643_v25 }
 0x753   :  { %v2657_v5 = vrot.slane %v2599_v36, %v4872_v4 }
 0x756   :  { %v4503_v7 = vpop.permute.xlu1 %2601  ;;  %v4505_v1 = vpop.permute.xlu0 %2604 }
 0x757   :  { %v2662_v18 = vrot.slane %v4503_v7, %v4873_v59 }
 0x75a   :  { %v2608_v29 = vpop.permute.xlu1 %2607  ;;  %v2611_v48 = vpop.permute.xlu0 %2610 }
 0x75b   :  { %v2672_v23 = vrot.slane %v2608_v29, %v4910_v0  ;;  %v2676_v32 = vrot.slane %v2611_v48, %v4911_v63  ;;  %v2652_v0 = vrot.slane %v2596_v14, %v3653_v35  ;;  %v2811_v14 = vsub.s32 %v2808_v43, %v4919_v11 }
 0x75d   :  { %v2677_v63 = vsel %vm916_vm0, %v2676_v32, %v2672_v23  ;;  %vm2827_vm0 = vcmask 1048512  }
 0x75e   :  { %v2614_v10 = vpop.permute.xlu1 %2613  ;;  %v2617_v45 = vpop.permute.xlu0 %2616 }
 0x75f   :  { %v2681_v57 = vrot.slane %v2614_v10, %v4916_v44  ;;  %v2686_v2 = vrot.slane %v2617_v45, %v4918_v61 }
 0x761   :  { %v2682_v46 = vsel %vm923_vm1, %v2681_v57, %v2677_v63  ;;  %vm2870_vm1 = vcmask 1041920  }
 0x762   :  { %v2620_v51 = vpop.permute.xlu1 %2619  ;;  %v2623_v31 = vpop.permute.xlu0 %2622  ;;  %v2687_v52 = vsel %vm930_vm2, %v2686_v2, %v2682_v46 }
 0x763   :  { %v2691_v8 = vrot.slane %v2620_v51, %v3653_v35  ;;  %v2653_v35 = vsel %vm937_vm3, %v2652_v0, %v2648_v47  ;;  %v2696_v16 = vrot.slane %v2623_v31, %v4872_v4  ;;  %v2667_v4 = vrot.slane %v4505_v1, %v4914_v21 }
 0x764   :  { %v2658_v9 = vsel %vm944_vm4, %v2657_v5, %v2653_v35 }
 0x765   :  { %v2692_v38 = vsel %vm937_vm3, %v2691_v8, %v2687_v52  ;;  %v2663_v36 = vsel %vm951_vm5, %v2662_v18, %v2658_v9 }
 0x766   :  { %v4507_v17 = vpop.permute.xlu1 %2728  ;;  %v4509_v39 = vpop.permute.xlu0 %2731  ;;  %v2697_v7 = vsel %vm944_vm4, %v2696_v16, %v2692_v38  ;;  %v2668_v54 = vsel %vm958_vm6, %v2667_v4, %v2663_v36 }
 0x767   :  { %v2779_v29 = vrot.slane %v4507_v17, %v2778_v58  ;;  %v2784_v45 = vrot.slane %v4509_v39, %v2783_v22  ;;  %v2818_v17 = vsub.s32 %v2815_v26, %v4919_v11 }
 0x76a   :  { %v4511_v41 = vpop.permute.xlu1 %2752  ;;  %v4513_v24 = vpop.permute.xlu0 %2755 }
 0x76b   :  { %v2832_v51 = vrot.slane %v4511_v41, %v2778_v58  ;;  %v2836_v31 = vrot.slane %v4513_v24, %v2783_v22 }
 0x76d   :  { %v2837_v42 = vsel %vm2785_vm10, %v2836_v31, %v2832_v51 }
 0x76e   :  { %v4515_v3 = vpop.permute.xlu1 %2734  ;;  %v4517_v60 = vpop.permute.xlu0 %2758 }
 0x76f   :  { %v2791_v34 = vrot.slane %v4515_v3, %v2790_v53  ;;  %v2841_v33 = vrot.slane %v4517_v60, %v2790_v53 }
 0x771   :  { %v2842_v13 = vsel %vm2792_vm11, %v2841_v33, %v2837_v42 }
 0x772   :  { %v4524_v30 = vpop.permute.xlu1 %2737  ;;  %v4526_v55 = vpop.permute.xlu0 %2761 }
 0x773   :  { %v2798_v23 = vrot.slane %v4524_v30, %v2797_v62  ;;  %v2846_v39 = vrot.slane %v4526_v55, %v2797_v62 }
 0x775   :  { %v2847_v0 = vsel %vm2799_vm12, %v2846_v39, %v2842_v13 }
 0x776   :  { %v4537_v12 = vpop.permute.xlu1 %2740  ;;  %v4539_v37 = vpop.permute.xlu0 %2764 }
 0x777   :  { %v2805_v24 = vrot.slane %v4537_v12, %v2804_v56 }
 0x77a   :  { %v2626_v19 = vpop.permute.xlu1 %2625  ;;  %v2744_v20 = vpop.permute.xlu0 %2743 }
 0x77b   :  { %v2701_v27 = vrot.slane %v2626_v19, %v4873_v59  ;;  %v2822_v59 = vadd.s32 4294967176, %v4917_v50  ;;  %v2786_v50 = vsel %vm2785_vm10, %v2784_v45, %v2779_v29  ;;  %v2812_v15 = vrot.slane %v2744_v20, %v2811_v14 }
 0x77c   :  { %v2793_v55 = vsel %vm2792_vm11, %v2791_v34, %v2786_v50 }
 0x77d   :  { %v2702_v44 = vsel %vm951_vm5, %v2701_v27, %v2697_v7  ;;  %v2825_v57 = vsub.s32 %v2822_v59, %v4919_v11  ;;  %v2800_v25 = vsel %vm2799_vm12, %v2798_v23, %v2793_v55 }
 0x77e   :  { %v2768_v48 = vpop.permute.xlu1 %2767  ;;  %v2629_v10 = vpop.permute.xlu0 %2628  ;;  %v2807_v63 = vsel %vm2806_vm13, %v2805_v24, %v2800_v25 }
 0x77f   :  { %v2706_v1 = vrot.slane %v2629_v10, %v4914_v21  ;;  %v2851_v21 = vrot.slane %v4539_v37, %v2804_v56  ;;  %v2856_v30 = vrot.slane %v2768_v48, %v2811_v14  ;;  %v2814_v46 = vsel %vm2813_vm14, %v2812_v15, %v2807_v63 }
 0x781   :  { %v2707_v41 = vsel %vm958_vm6, %v2706_v1, %v2702_v44  ;;  %v2852_v2 = vsel %vm2806_vm13, %v2851_v21, %v2847_v0 }
 0x782   :  { %v2708_v3 = vsel %vm1077_vm7, %v2707_v41, %v2668_v54  ;;  %v2747_v32 = vpop.permute.xlu1 %2746  ;;  %v2771_v60 = vpop.permute.xlu0 %2770  ;;  %v2857_v8 = vsel %vm2813_vm14, %v2856_v30, %v2852_v2 }
 0x783   :  { %2710 = vst.msk [vmem:[%s4606_s2] sm:$0x3] %vm1082_vm8, %v2708_v3  ;;  %v2819_v61 = vrot.slane %v2747_v32, %v2818_v17  ;;  %v2861_v28 = vrot.slane %v2771_v60, %v2818_v17 }
 0x785   :  { %v2821_v11 = vsel %vm2820_vm15, %v2819_v61, %v2814_v46  ;;  %v2862_v58 = vsel %vm2820_vm15, %v2861_v28, %v2857_v8 }
 0x786   :  { %v2750_v12 = vpop.permute.xlu1 %2749  ;;  %v2774_v37 = vpop.permute.xlu0 %2773 }
 0x787   :  { %v2826_v6 = vrot.slane %v2750_v12, %v2825_v57  ;;  %v2866_v49 = vrot.slane %v2774_v37, %v2825_v57 }
 0x789   :  { %v2828_v22 = vsel %vm2827_vm0, %v2826_v6, %v2821_v11  ;;  %v2867_v40 = vsel %vm2827_vm0, %v2866_v49, %v2862_v58 }
 0x78a   :  { %v2868_v47 = vsel %vm1077_vm7, %v2867_v40, %v2828_v22 }
 0x78b   :  { %2871 = vst.msk [vmem:[%s4606_s2] sm:$0x3] %vm2870_vm1, %v2868_v47 }
 0x78c   :  { %2876 = vsyncpa [#allocation3], 1 }
 0x78d   :  { %2877 = vsyncpa [#allocation5], 1 }

</bundles_post_ra>
